<compile_context>
chip_gen: v6e
topology: v6e:2x2x1
jax: 0.10.0
libtpu: 0.0.40
codegen_flags: <defaults>
</compile_context>

<pallas_src>
import functools
import math

import jax
import jax.numpy as jnp
from jax.experimental import pallas as pl
from jax.experimental.pallas import tpu as pltpu


# ----------------------------------------------------------------------------
# Helpers
# ----------------------------------------------------------------------------

def _round_up(x, m):
    return (x + m - 1) // m * m


def _layernorm(x, g, b, eps):
    """Two-pass LayerNorm in f32 (avoids E[x^2]-mean^2 cancellation)."""
    mean = jnp.mean(x, axis=-1, keepdims=True)
    xc = x - mean
    var = jnp.mean(xc * xc, axis=-1, keepdims=True)
    return xc * jax.lax.rsqrt(var + eps) * g + b


# ----------------------------------------------------------------------------
# Kernel 1: plain matmul + bias (patch embedding)
# ----------------------------------------------------------------------------

def _matmul_bias_kernel(x_ref, w_ref, b_ref, o_ref):
    y = jnp.dot(x_ref[...].astype(jnp.bfloat16), w_ref[...],
                preferred_element_type=jnp.float32)
    o_ref[...] = (y + b_ref[...].astype(jnp.float32)).astype(o_ref.dtype)


def matmul_bias(x, w, b, tm=256):
    """x: [M, K] f32, w: [K, N] bf16, b: [N] f32 -> [M, N] f32."""
    M, K = x.shape
    N = w.shape[1]
    if M <= tm:
        Mp, tile_m, gm = M, M, 1
    else:
        Mp = _round_up(M, tm)
        tile_m, gm = tm, Mp // tm
    xp = x if Mp == M else jnp.pad(x, ((0, Mp - M), (0, 0)))

    out = pl.pallas_call(
        _matmul_bias_kernel,
        out_shape=jax.ShapeDtypeStruct((Mp, N), jnp.float32),
        grid=(gm,),
        in_specs=[
            pl.BlockSpec((tile_m, K), lambda i: (i, 0)),
            pl.BlockSpec((K, N), lambda i: (0, 0)),
            pl.BlockSpec((1, N), lambda i: (0, 0)),
        ],
        out_specs=pl.BlockSpec((tile_m, N), lambda i: (i, 0)),
        compiler_params=pltpu.CompilerParams(
            dimension_semantics=("parallel",)),
    )(xp, w, b.reshape(1, N))
    return out[:M] if Mp != M else out


# ----------------------------------------------------------------------------
# Kernel 2: fused TransformerEncoderLayer (norm_first, relu, eval mode)
#   grid = (B,): one batch element per step; weights resident across steps.
# ----------------------------------------------------------------------------

def _encoder_layer_kernel(x_ref,
                          ln1_g, ln1_b, qkv_w, qkv_b, out_w, out_b,
                          ln2_g, ln2_b, fc1_w, fc1_b, fc2_w, fc2_b,
                          o_ref, *, num_heads, head_dim, eps):
    E = num_heads * head_dim
    scale = 1.0 / math.sqrt(head_dim)

    x = x_ref[0].astype(jnp.float32)                               # [S, E]

    # ---- self-attention block: LN1 -> qkv -> attention -> out_proj + res ----
    xn1 = _layernorm(x, ln1_g[...].astype(jnp.float32),
                     ln1_b[...].astype(jnp.float32), eps)
    qkv = jnp.dot(xn1.astype(jnp.bfloat16), qkv_w[...],
                  preferred_element_type=jnp.float32) \
        + qkv_b[...].astype(jnp.float32)                           # [S, 3E]

    # residual + out_proj bias (added once); per-head out_proj contributions
    # are accumulated directly -> no lane-wise concat of head outputs.
    attn = x + out_b[...].astype(jnp.float32)                      # [S, E]
    for h in range(num_heads):                                     # static unroll
        lo = h * head_dim
        hi = lo + head_dim
        q = qkv[:, lo:hi]
        k = qkv[:, E + lo:E + hi]
        v = qkv[:, 2 * E + lo:2 * E + hi]
        s = jax.lax.dot_general(
            q.astype(jnp.bfloat16), k.astype(jnp.bfloat16),
            (((1,), (1,)), ((), ())),
            preferred_element_type=jnp.float32) * scale            # [S, S]
        m = jnp.max(s, axis=-1, keepdims=True)
        p = jnp.exp(s - m)
        denom = jnp.sum(p, axis=-1, keepdims=True)
        p = p * pl.reciprocal(denom, approx=True)                  # EUP, not VALU
        ctx = jnp.dot(p.astype(jnp.bfloat16), v.astype(jnp.bfloat16),
                      preferred_element_type=jnp.float32)          # [S, hd]
        attn = attn + jnp.dot(ctx.astype(jnp.bfloat16),
                              out_w[lo:hi, :],
                              preferred_element_type=jnp.float32)  # [S, E]

    # ---- MLP block: LN2 -> fc1 + relu -> fc2 + residual ----
    xn2 = _layernorm(attn, ln2_g[...].astype(jnp.float32),
                     ln2_b[...].astype(jnp.float32), eps)
    h1 = jnp.dot(xn2.astype(jnp.bfloat16), fc1_w[...],
                 preferred_element_type=jnp.float32) \
        + fc1_b[...].astype(jnp.float32)
    h1 = jnp.maximum(h1, 0.0)                                      # [S, 4E]
    out = attn + jnp.dot(h1.astype(jnp.bfloat16), fc2_w[...],
                         preferred_element_type=jnp.float32) \
        + fc2_b[...].astype(jnp.float32)

    o_ref[0] = out.astype(o_ref.dtype)


def encoder_layer(x, layer, *, num_heads, eps=1e-5):
    """x: [B, S, E] f32 residual stream -> [B, S, E] f32."""
    B, S, E = x.shape
    hidden = layer["fc1_w"].shape[1]
    hd = E // num_heads

    idx_x = lambda b: (b, 0, 0)
    idx0 = lambda b: (0, 0)

    in_specs = [
        pl.BlockSpec((1, S, E), idx_x),        # x
        pl.BlockSpec((1, E), idx0),            # ln1_g
        pl.BlockSpec((1, E), idx0),            # ln1_b
        pl.BlockSpec((E, 3 * E), idx0),        # qkv_w
        pl.BlockSpec((1, 3 * E), idx0),        # qkv_b
        pl.BlockSpec((E, E), idx0),            # out_w
        pl.BlockSpec((1, E), idx0),            # out_b
        pl.BlockSpec((1, E), idx0),            # ln2_g
        pl.BlockSpec((1, E), idx0),            # ln2_b
        pl.BlockSpec((E, hidden), idx0),       # fc1_w
        pl.BlockSpec((1, hidden), idx0),       # fc1_b
        pl.BlockSpec((hidden, E), idx0),       # fc2_w
        pl.BlockSpec((1, E), idx0),            # fc2_b
    ]

    return pl.pallas_call(
        functools.partial(_encoder_layer_kernel,
                          num_heads=num_heads, head_dim=hd, eps=eps),
        out_shape=jax.ShapeDtypeStruct((B, S, E), jnp.float32),
        grid=(B,),
        in_specs=in_specs,
        out_specs=pl.BlockSpec((1, S, E), idx_x),
        compiler_params=pltpu.CompilerParams(
            dimension_semantics=("parallel",)),
    )(x,
      layer["ln1_g"].reshape(1, E), layer["ln1_b"].reshape(1, E),
      layer["qkv_w"], layer["qkv_b"].reshape(1, 3 * E),
      layer["out_w"], layer["out_b"].reshape(1, E),
      layer["ln2_g"].reshape(1, E), layer["ln2_b"].reshape(1, E),
      layer["fc1_w"], layer["fc1_b"].reshape(1, hidden),
      layer["fc2_w"], layer["fc2_b"].reshape(1, E))


# ----------------------------------------------------------------------------
# Kernel 3: fused final LayerNorm + classification head (cls token only)
# ----------------------------------------------------------------------------

def _ln_head_kernel(x_ref, g_ref, b_ref, w_ref, hb_ref, o_ref, *, eps):
    xn = _layernorm(x_ref[...].astype(jnp.float32),
                    g_ref[...].astype(jnp.float32),
                    b_ref[...].astype(jnp.float32), eps)
    y = jnp.dot(xn.astype(jnp.bfloat16), w_ref[...],
                preferred_element_type=jnp.float32)
    o_ref[...] = (y + hb_ref[...].astype(jnp.float32)).astype(o_ref.dtype)


def ln_head(x, g, b, w, hb, eps=1e-5):
    """x: [B, E] f32, w: [E, N_pad] bf16 -> [B, N_pad] f32."""
    M, K = x.shape
    N = w.shape[1]
    return pl.pallas_call(
        functools.partial(_ln_head_kernel, eps=eps),
        out_shape=jax.ShapeDtypeStruct((M, N), jnp.float32),
        grid=(1,),
        in_specs=[
            pl.BlockSpec((M, K), lambda i: (0, 0)),
            pl.BlockSpec((1, K), lambda i: (0, 0)),
            pl.BlockSpec((1, K), lambda i: (0, 0)),
            pl.BlockSpec((K, N), lambda i: (0, 0)),
            pl.BlockSpec((1, N), lambda i: (0, 0)),
        ],
        out_specs=pl.BlockSpec((M, N), lambda i: (0, 0)),
    )(x, g.reshape(1, K), b.reshape(1, K), w, hb.reshape(1, N))


# ----------------------------------------------------------------------------
# Model wrapper (glue: patchify / parameter plumbing in plain JAX)
# ----------------------------------------------------------------------------

def vit_forward(x_nchw, params, *, patch_size, num_heads, num_classes):
    B, C, H, W = x_nchw.shape
    p = patch_size
    nH, nW = H // p, W // p
    E = params["pos_embed"].shape[-1]

    # --- PatchEmbedding: Conv2d(k=stride=p) == patchify + matmul ---
    patches = x_nchw.reshape(B, C, nH, p, nW, p)
    patches = jnp.transpose(patches, (0, 2, 4, 1, 3, 5))        # [B,nH,nW,C,p,p]
    patches = patches.reshape(B * nH * nW, C * p * p)
    Kp = params["patch_w"].shape[0]                             # lane-padded K
    if Kp != C * p * p:
        patches = jnp.pad(patches, ((0, 0), (0, Kp - C * p * p)))
    tok = matmul_bias(patches, params["patch_w"], params["patch_b"])
    tok = tok.reshape(B, nH * nW, E)

    # --- cls token + positional embedding (pos_drop == identity in eval) ---
    cls = jnp.broadcast_to(params["cls_token"], (B, 1, E))
    x = jnp.concatenate([cls, tok], axis=1) + params["pos_embed"]  # [B, S, E]

    # --- fused TransformerEncoder layers (one pallas_call each) ---
    for layer in params["layers"]:
        x = encoder_layer(x, layer, num_heads=num_heads)

    # --- final LayerNorm + head on the cls token only ---
    cls_final = x[:, 0]                                            # [B, E]
    logits = ln_head(cls_final, params["norm_g"], params["norm_b"],
                     params["head_w"], params["head_b"])
    return logits[:, :num_classes]


# ----------------------------------------------------------------------------
# Deterministic parameter init (synthetic, mirrors the module's shapes).
# Weights stored transposed vs PyTorch ([in, out]) and in bf16 for the MXU;
# biases / LN params / embeddings stay f32.
# ----------------------------------------------------------------------------

def trunc_normal(key, shape, std=0.02):
    return std * jax.random.truncated_normal(key, -2.0, 2.0, shape, jnp.float32)


def init_params(key, *, in_chans, patch_size, embed_dim, depth, num_heads,
                mlp_ratio, num_classes, num_patches):
    hidden = int(embed_dim * mlp_ratio)
    keys = iter(jax.random.split(key, 8 + 6 * depth))

    def w(shape):
        return trunc_normal(next(keys), shape).astype(jnp.bfloat16)

    patch_k = in_chans * patch_size * patch_size
    patch_kp = _round_up(patch_k, 128)          # lane-align contraction dim
    ncls_pad = _round_up(num_classes, 128)      # lane-pad tiny class dim

    params = {
        # zero-pad the extra contraction rows -> numerically identical
        "patch_w": jnp.pad(w((patch_k, embed_dim)),
                           ((0, patch_kp - patch_k), (0, 0))),
        "patch_b": jnp.zeros((embed_dim,), jnp.float32),
        "cls_token": trunc_normal(next(keys), (1, 1, embed_dim)),
        "pos_embed": trunc_normal(next(keys), (1, num_patches + 1, embed_dim)),
        "norm_g": jnp.ones((embed_dim,), jnp.float32),
        "norm_b": jnp.zeros((embed_dim,), jnp.float32),
        "head_w": jnp.pad(w((embed_dim, num_classes)),
                          ((0, 0), (0, ncls_pad - num_classes))),
        "head_b": jnp.zeros((ncls_pad,), jnp.float32),
        "layers": [],
    }
    for _ in range(depth):
        params["layers"].append({
            "ln1_g": jnp.ones((embed_dim,), jnp.float32),
            "ln1_b": jnp.zeros((embed_dim,), jnp.float32),
            "qkv_w": w((embed_dim, 3 * embed_dim)),
            "qkv_b": jnp.zeros((3 * embed_dim,), jnp.float32),
            "out_w": w((embed_dim, embed_dim)),
            "out_b": jnp.zeros((embed_dim,), jnp.float32),
            "ln2_g": jnp.ones((embed_dim,), jnp.float32),
            "ln2_b": jnp.zeros((embed_dim,), jnp.float32),
            "fc1_w": w((embed_dim, hidden)),
            "fc1_b": jnp.zeros((hidden,), jnp.float32),
            "fc2_w": w((hidden, embed_dim)),
            "fc2_b": jnp.zeros((embed_dim,), jnp.float32),
        })
    return params


# ----------------------------------------------------------------------------
# Main
# ----------------------------------------------------------------------------

if __name__ == "__main__":
    # Small shapes consistent with the module: feature dims match the spec
    # (embed=256, heads=4, mlp_ratio=4, classes=43, channels=3, patch=8);
    # spatial size and depth are reduced to keep the test small.
    B, C = 2, 3
    IMG, PATCH = 32, 8                 # -> (32//8)^2 = 16 patches, seq = 17
    EMBED, DEPTH, HEADS = 256, 2, 4
    MLP_RATIO = 4.0
    NUM_CLASSES = 43
    NUM_PATCHES = (IMG // PATCH) ** 2

    root = jax.random.PRNGKey(0)
    k_x, k_p = jax.random.split(root)
    x = jax.random.normal(k_x, (B, C, IMG, IMG), jnp.float32)   # NCHW like PyTorch
    params = init_params(
        k_p, in_chans=C, patch_size=PATCH, embed_dim=EMBED, depth=DEPTH,
        num_heads=HEADS, mlp_ratio=MLP_RATIO, num_classes=NUM_CLASSES,
        num_patches=NUM_PATCHES)

    fwd = jax.jit(functools.partial(vit_forward, patch_size=PATCH,
                                    num_heads=HEADS, num_classes=NUM_CLASSES))
    logits = fwd(x, params)
    jax.block_until_ready(logits)
    assert logits.shape == (B, NUM_CLASSES)
    assert bool(jnp.all(jnp.isfinite(logits)))
    print("KERNEL_OK")
</pallas_src>

<mosaic_0001>
module attributes {stable_mosaic.version = 11 : i64} {
  func.func @_matmul_bias_kernel(%arg0: i32, %arg1: memref<32x256xf32, #tpu.memory_space<vmem>>, %arg2: memref<256x256xbf16, #tpu.memory_space<vmem>>, %arg3: memref<1x256xf32, #tpu.memory_space<vmem>>, %arg4: memref<32x256xf32, #tpu.memory_space<vmem>>) attributes {dimension_semantics = [#tpu.dimension_semantics<parallel>], iteration_bounds = array<i64: 1>, scalar_prefetch = 0 : i64, scratch_operands = 0 : i64, tpu.core_type = #tpu.core_type<tc>, window_params = [{transform_indices = @transform_0, window_bounds = array<i64: 32, 256>}, {pipeline_mode = #tpu.pipeline_mode<synchronous>, transform_indices = @transform_1, window_bounds = array<i64: 256, 256>}, {pipeline_mode = #tpu.pipeline_mode<synchronous>, transform_indices = @transform_2, window_bounds = array<i64: 1, 256>}, {transform_indices = @transform_3, window_bounds = array<i64: 32, 256>}]} {
    %c0 = arith.constant 0 : index
    %c0_0 = arith.constant 0 : index
    %0 = vector.load %arg1[%c0, %c0_0] : memref<32x256xf32, #tpu.memory_space<vmem>>, vector<32x256xf32>
    %1 = arith.truncf %0 : vector<32x256xf32> to vector<32x256xbf16>
    %c0_1 = arith.constant 0 : index
    %c0_2 = arith.constant 0 : index
    %2 = vector.load %arg2[%c0_1, %c0_2] : memref<256x256xbf16, #tpu.memory_space<vmem>>, vector<256x256xbf16>
    %cst = arith.constant dense<0.000000e+00> : vector<32x256xf32>
    %3 = tpu.matmul %1, %2, %cst {dimension_numbers = #tpu.dot_dimension_numbers<[1], [0], [0], [1], [0, 0, 1, 1], [], []>} : vector<32x256xbf16>, vector<256x256xbf16>, vector<32x256xf32> -> vector<32x256xf32>
    %c0_3 = arith.constant 0 : index
    %c0_4 = arith.constant 0 : index
    %4 = vector.load %arg3[%c0_3, %c0_4] : memref<1x256xf32, #tpu.memory_space<vmem>>, vector<1x256xf32>
    %5 = vector.broadcast %4 : vector<1x256xf32> to vector<32x256xf32>
    %6 = arith.addf %3, %5 : vector<32x256xf32>
    %c0_5 = arith.constant 0 : index
    %c0_6 = arith.constant 0 : index
    %7 = vector.load %arg4[%c0_5, %c0_6] : memref<32x256xf32, #tpu.memory_space<vmem>>, vector<32x256xf32>
    tpu.vector_store %arg4[%c0_5, %c0_6], %6 {strides = array<i32>} : memref<32x256xf32, #tpu.memory_space<vmem>>, vector<32x256xf32>,
    return
  }
  func.func @transform_0(%arg0: i32) -> (i32, i32) {
    %c0_i32 = arith.constant 0 : i32
    %c0_i32_0 = arith.constant 0 : i32
    return %arg0, %c0_i32 : i32, i32
  }
  func.func @transform_1(%arg0: i32) -> (i32, i32) {
    %c0_i32 = arith.constant 0 : i32
    %c0_i32_0 = arith.constant 0 : i32
    %c0_i32_1 = arith.constant 0 : i32
    return %c0_i32, %c0_i32_0 : i32, i32
  }
  func.func @transform_2(%arg0: i32) -> (i32, i32) {
    %c0_i32 = arith.constant 0 : i32
    %c0_i32_0 = arith.constant 0 : i32
    %c0_i32_1 = arith.constant 0 : i32
    return %c0_i32, %c0_i32_0 : i32, i32
  }
  func.func @transform_3(%arg0: i32) -> (i32, i32) {
    %c0_i32 = arith.constant 0 : i32
    %c0_i32_0 = arith.constant 0 : i32
    return %arg0, %c0_i32 : i32, i32
  }
}

module attributes {stable_mosaic.version = 11 : i64} {
  func.func @_encoder_layer_kernel(%arg0: i32, %arg1: memref<1x17x256xf32, #tpu.memory_space<vmem>>, %arg2: memref<1x256xf32, #tpu.memory_space<vmem>>, %arg3: memref<1x256xf32, #tpu.memory_space<vmem>>, %arg4: memref<256x768xbf16, #tpu.memory_space<vmem>>, %arg5: memref<1x768xf32, #tpu.memory_space<vmem>>, %arg6: memref<256x256xbf16, #tpu.memory_space<vmem>>, %arg7: memref<1x256xf32, #tpu.memory_space<vmem>>, %arg8: memref<1x256xf32, #tpu.memory_space<vmem>>, %arg9: memref<1x256xf32, #tpu.memory_space<vmem>>, %arg10: memref<256x1024xbf16, #tpu.memory_space<vmem>>, %arg11: memref<1x1024xf32, #tpu.memory_space<vmem>>, %arg12: memref<1024x256xbf16, #tpu.memory_space<vmem>>, %arg13: memref<1x256xf32, #tpu.memory_space<vmem>>, %arg14: memref<1x17x256xf32, #tpu.memory_space<vmem>>) attributes {dimension_semantics = [#tpu.dimension_semantics<parallel>], iteration_bounds = array<i64: 2>, scalar_prefetch = 0 : i64, scratch_operands = 0 : i64, tpu.core_type = #tpu.core_type<tc>, window_params = [{transform_indices = @transform_0, window_bounds = array<i64: 1, 17, 256>}, {pipeline_mode = #tpu.pipeline_mode<synchronous>, transform_indices = @transform_1, window_bounds = array<i64: 1, 256>}, {pipeline_mode = #tpu.pipeline_mode<synchronous>, transform_indices = @transform_2, window_bounds = array<i64: 1, 256>}, {pipeline_mode = #tpu.pipeline_mode<synchronous>, transform_indices = @transform_3, window_bounds = array<i64: 256, 768>}, {pipeline_mode = #tpu.pipeline_mode<synchronous>, transform_indices = @transform_4, window_bounds = array<i64: 1, 768>}, {pipeline_mode = #tpu.pipeline_mode<synchronous>, transform_indices = @transform_5, window_bounds = array<i64: 256, 256>}, {pipeline_mode = #tpu.pipeline_mode<synchronous>, transform_indices = @transform_6, window_bounds = array<i64: 1, 256>}, {pipeline_mode = #tpu.pipeline_mode<synchronous>, transform_indices = @transform_7, window_bounds = array<i64: 1, 256>}, {pipeline_mode = #tpu.pipeline_mode<synchronous>, transform_indices = @transform_8, window_bounds = array<i64: 1, 256>}, {pipeline_mode = #tpu.pipeline_mode<synchronous>, transform_indices = @transform_9, window_bounds = array<i64: 256, 1024>}, {pipeline_mode = #tpu.pipeline_mode<synchronous>, transform_indices = @transform_10, window_bounds = array<i64: 1, 1024>}, {pipeline_mode = #tpu.pipeline_mode<synchronous>, transform_indices = @transform_11, window_bounds = array<i64: 1024, 256>}, {pipeline_mode = #tpu.pipeline_mode<synchronous>, transform_indices = @transform_12, window_bounds = array<i64: 1, 256>}, {transform_indices = @transform_13, window_bounds = array<i64: 1, 17, 256>}]} {
    %c0 = arith.constant 0 : index
    %c0_0 = arith.constant 0 : index
    %c0_1 = arith.constant 0 : index
    %0 = vector.load %arg1[%c0, %c0_0, %c0_1] : memref<1x17x256xf32, #tpu.memory_space<vmem>>, vector<1x17x256xf32>
    %1 = vector.shape_cast %0 : vector<1x17x256xf32> to vector<17x256xf32>
    %c0_2 = arith.constant 0 : index
    %c0_3 = arith.constant 0 : index
    %2 = vector.load %arg2[%c0_2, %c0_3] : memref<1x256xf32, #tpu.memory_space<vmem>>, vector<1x256xf32>
    %c0_4 = arith.constant 0 : index
    %c0_5 = arith.constant 0 : index
    %3 = vector.load %arg3[%c0_4, %c0_5] : memref<1x256xf32, #tpu.memory_space<vmem>>, vector<1x256xf32>
    %cst = arith.constant dense<0.000000e+00> : vector<17xf32>
    %4 = vector.multi_reduction <add>, %1, %cst [1] : vector<17x256xf32> to vector<17xf32>
    %5 = vector.shape_cast %4 : vector<17xf32> to vector<17x1xf32>
    %cst_6 = arith.constant 2.560000e+02 : f32
    %6 = vector.broadcast %cst_6 : f32 to vector<17x1xf32>
    %7 = arith.divf %5, %6 : vector<17x1xf32>
    %8 = vector.broadcast %7 : vector<17x1xf32> to vector<17x256xf32>
    %9 = arith.subf %1, %8 : vector<17x256xf32>
    %10 = arith.mulf %9, %9 : vector<17x256xf32>
    %cst_7 = arith.constant dense<0.000000e+00> : vector<17xf32>
    %11 = vector.multi_reduction <add>, %10, %cst_7 [1] : vector<17x256xf32> to vector<17xf32>
    %12 = vector.shape_cast %11 : vector<17xf32> to vector<17x1xf32>
    %cst_8 = arith.constant 2.560000e+02 : f32
    %13 = vector.broadcast %cst_8 : f32 to vector<17x1xf32>
    %14 = arith.divf %12, %13 : vector<17x1xf32>
    %cst_9 = arith.constant 9.99999974E-6 : f32
    %15 = vector.broadcast %cst_9 : f32 to vector<17x1xf32>
    %16 = arith.addf %14, %15 : vector<17x1xf32>
    %17 = math.rsqrt %16 : vector<17x1xf32>
    %18 = vector.broadcast %17 : vector<17x1xf32> to vector<17x256xf32>
    %19 = arith.mulf %9, %18 : vector<17x256xf32>
    %20 = vector.broadcast %2 : vector<1x256xf32> to vector<17x256xf32>
    %21 = arith.mulf %19, %20 : vector<17x256xf32>
    %22 = vector.broadcast %3 : vector<1x256xf32> to vector<17x256xf32>
    %23 = arith.addf %21, %22 : vector<17x256xf32>
    %24 = arith.truncf %23 : vector<17x256xf32> to vector<17x256xbf16>
    %c0_10 = arith.constant 0 : index
    %c0_11 = arith.constant 0 : index
    %25 = vector.load %arg4[%c0_10, %c0_11] : memref<256x768xbf16, #tpu.memory_space<vmem>>, vector<256x768xbf16>
    %cst_12 = arith.constant dense<0.000000e+00> : vector<17x768xf32>
    %26 = tpu.matmul %24, %25, %cst_12 {dimension_numbers = #tpu.dot_dimension_numbers<[1], [0], [0], [1], [0, 0, 1, 1], [], []>} : vector<17x256xbf16>, vector<256x768xbf16>, vector<17x768xf32> -> vector<17x768xf32>
    %c0_13 = arith.constant 0 : index
    %c0_14 = arith.constant 0 : index
    %27 = vector.load %arg5[%c0_13, %c0_14] : memref<1x768xf32, #tpu.memory_space<vmem>>, vector<1x768xf32>
    %28 = vector.broadcast %27 : vector<1x768xf32> to vector<17x768xf32>
    %29 = arith.addf %26, %28 : vector<17x768xf32>
    %c0_15 = arith.constant 0 : index
    %c0_16 = arith.constant 0 : index
    %30 = vector.load %arg7[%c0_15, %c0_16] : memref<1x256xf32, #tpu.memory_space<vmem>>, vector<1x256xf32>
    %31 = vector.broadcast %30 : vector<1x256xf32> to vector<17x256xf32>
    %32 = arith.addf %1, %31 : vector<17x256xf32>
    %33 = vector.extract_strided_slice %29 {offsets = [0, 0], sizes = [17, 64], strides = [1, 1]} : vector<17x768xf32> to vector<17x64xf32>
    %34 = vector.extract_strided_slice %29 {offsets = [0, 256], sizes = [17, 64], strides = [1, 1]} : vector<17x768xf32> to vector<17x64xf32>
    %35 = vector.extract_strided_slice %29 {offsets = [0, 512], sizes = [17, 64], strides = [1, 1]} : vector<17x768xf32> to vector<17x64xf32>
    %36 = arith.truncf %33 : vector<17x64xf32> to vector<17x64xbf16>
    %37 = arith.truncf %34 : vector<17x64xf32> to vector<17x64xbf16>
    %cst_17 = arith.constant dense<0.000000e+00> : vector<17x17xf32>
    %38 = tpu.matmul %36, %37, %cst_17 {dimension_numbers = #tpu.dot_dimension_numbers<[1], [1], [0], [0], [0, 0, 1, 0], [], []>} : vector<17x64xbf16>, vector<17x64xbf16>, vector<17x17xf32> -> vector<17x17xf32>
    %cst_18 = arith.constant 1.250000e-01 : f32
    %39 = vector.broadcast %cst_18 : f32 to vector<17x17xf32>
    %40 = arith.mulf %38, %39 : vector<17x17xf32>
    %cst_19 = arith.constant dense<0xFF800000> : vector<17xf32>
    %41 = vector.multi_reduction <maximumf>, %40, %cst_19 [1] : vector<17x17xf32> to vector<17xf32>
    %42 = vector.shape_cast %41 : vector<17xf32> to vector<17x1xf32>
    %43 = vector.broadcast %42 : vector<17x1xf32> to vector<17x17xf32>
    %44 = arith.subf %40, %43 : vector<17x17xf32>
    %45 = math.exp %44 : vector<17x17xf32>
    %cst_20 = arith.constant dense<0.000000e+00> : vector<17xf32>
    %46 = vector.multi_reduction <add>, %45, %cst_20 [1] : vector<17x17xf32> to vector<17xf32>
    %47 = vector.shape_cast %46 : vector<17xf32> to vector<17x1xf32>
    %48 = tpu.reciprocal %47 {approx = true} : vector<17x1xf32> -> vector<17x1xf32>
    %49 = vector.broadcast %48 : vector<17x1xf32> to vector<17x17xf32>
    %50 = arith.mulf %45, %49 : vector<17x17xf32>
    %51 = arith.truncf %50 : vector<17x17xf32> to vector<17x17xbf16>
    %52 = arith.truncf %35 : vector<17x64xf32> to vector<17x64xbf16>
    %cst_21 = arith.constant dense<0.000000e+00> : vector<17x64xf32>
    %53 = tpu.matmul %51, %52, %cst_21 {dimension_numbers = #tpu.dot_dimension_numbers<[1], [0], [0], [1], [0, 0, 1, 1], [], []>} : vector<17x17xbf16>, vector<17x64xbf16>, vector<17x64xf32> -> vector<17x64xf32>
    %54 = arith.truncf %53 : vector<17x64xf32> to vector<17x64xbf16>
    %c0_22 = arith.constant 0 : index
    %c0_23 = arith.constant 0 : index
    %55 = vector.load %arg6[%c0_22, %c0_23] : memref<256x256xbf16, #tpu.memory_space<vmem>>, vector<64x256xbf16>
    %cst_24 = arith.constant dense<0.000000e+00> : vector<17x256xf32>
    %56 = tpu.matmul %54, %55, %cst_24 {dimension_numbers = #tpu.dot_dimension_numbers<[1], [0], [0], [1], [0, 0, 1, 1], [], []>} : vector<17x64xbf16>, vector<64x256xbf16>, vector<17x256xf32> -> vector<17x256xf32>
    %57 = arith.addf %32, %56 : vector<17x256xf32>
    %58 = vector.extract_strided_slice %29 {offsets = [0, 64], sizes = [17, 64], strides = [1, 1]} : vector<17x768xf32> to vector<17x64xf32>
    %59 = vector.extract_strided_slice %29 {offsets = [0, 320], sizes = [17, 64], strides = [1, 1]} : vector<17x768xf32> to vector<17x64xf32>
    %60 = vector.extract_strided_slice %29 {offsets = [0, 576], sizes = [17, 64], strides = [1, 1]} : vector<17x768xf32> to vector<17x64xf32>
    %61 = arith.truncf %58 : vector<17x64xf32> to vector<17x64xbf16>
    %62 = arith.truncf %59 : vector<17x64xf32> to vector<17x64xbf16>
    %cst_25 = arith.constant dense<0.000000e+00> : vector<17x17xf32>
    %63 = tpu.matmul %61, %62, %cst_25 {dimension_numbers = #tpu.dot_dimension_numbers<[1], [1], [0], [0], [0, 0, 1, 0], [], []>} : vector<17x64xbf16>, vector<17x64xbf16>, vector<17x17xf32> -> vector<17x17xf32>
    %cst_26 = arith.constant 1.250000e-01 : f32
    %64 = vector.broadcast %cst_26 : f32 to vector<17x17xf32>
    %65 = arith.mulf %63, %64 : vector<17x17xf32>
    %cst_27 = arith.constant dense<0xFF800000> : vector<17xf32>
    %66 = vector.multi_reduction <maximumf>, %65, %cst_27 [1] : vector<17x17xf32> to vector<17xf32>
    %67 = vector.shape_cast %66 : vector<17xf32> to vector<17x1xf32>
    %68 = vector.broadcast %67 : vector<17x1xf32> to vector<17x17xf32>
    %69 = arith.subf %65, %68 : vector<17x17xf32>
    %70 = math.exp %69 : vector<17x17xf32>
    %cst_28 = arith.constant dense<0.000000e+00> : vector<17xf32>
    %71 = vector.multi_reduction <add>, %70, %cst_28 [1] : vector<17x17xf32> to vector<17xf32>
    %72 = vector.shape_cast %71 : vector<17xf32> to vector<17x1xf32>
    %73 = tpu.reciprocal %72 {approx = true} : vector<17x1xf32> -> vector<17x1xf32>
    %74 = vector.broadcast %73 : vector<17x1xf32> to vector<17x17xf32>
    %75 = arith.mulf %70, %74 : vector<17x17xf32>
    %76 = arith.truncf %75 : vector<17x17xf32> to vector<17x17xbf16>
    %77 = arith.truncf %60 : vector<17x64xf32> to vector<17x64xbf16>
    %cst_29 = arith.constant dense<0.000000e+00> : vector<17x64xf32>
    %78 = tpu.matmul %76, %77, %cst_29 {dimension_numbers = #tpu.dot_dimension_numbers<[1], [0], [0], [1], [0, 0, 1, 1], [], []>} : vector<17x17xbf16>, vector<17x64xbf16>, vector<17x64xf32> -> vector<17x64xf32>
    %79 = arith.truncf %78 : vector<17x64xf32> to vector<17x64xbf16>
    %c64 = arith.constant 64 : index
    %c0_30 = arith.constant 0 : index
    %80 = vector.load %arg6[%c64, %c0_30] : memref<256x256xbf16, #tpu.memory_space<vmem>>, vector<64x256xbf16>
    %cst_31 = arith.constant dense<0.000000e+00> : vector<17x256xf32>
    %81 = tpu.matmul %79, %80, %cst_31 {dimension_numbers = #tpu.dot_dimension_numbers<[1], [0], [0], [1], [0, 0, 1, 1], [], []>} : vector<17x64xbf16>, vector<64x256xbf16>, vector<17x256xf32> -> vector<17x256xf32>
    %82 = arith.addf %57, %81 : vector<17x256xf32>
    %83 = vector.extract_strided_slice %29 {offsets = [0, 128], sizes = [17, 64], strides = [1, 1]} : vector<17x768xf32> to vector<17x64xf32>
    %84 = vector.extract_strided_slice %29 {offsets = [0, 384], sizes = [17, 64], strides = [1, 1]} : vector<17x768xf32> to vector<17x64xf32>
    %85 = vector.extract_strided_slice %29 {offsets = [0, 640], sizes = [17, 64], strides = [1, 1]} : vector<17x768xf32> to vector<17x64xf32>
    %86 = arith.truncf %83 : vector<17x64xf32> to vector<17x64xbf16>
    %87 = arith.truncf %84 : vector<17x64xf32> to vector<17x64xbf16>
    %cst_32 = arith.constant dense<0.000000e+00> : vector<17x17xf32>
    %88 = tpu.matmul %86, %87, %cst_32 {dimension_numbers = #tpu.dot_dimension_numbers<[1], [1], [0], [0], [0, 0, 1, 0], [], []>} : vector<17x64xbf16>, vector<17x64xbf16>, vector<17x17xf32> -> vector<17x17xf32>
    %cst_33 = arith.constant 1.250000e-01 : f32
    %89 = vector.broadcast %cst_33 : f32 to vector<17x17xf32>
    %90 = arith.mulf %88, %89 : vector<17x17xf32>
    %cst_34 = arith.constant dense<0xFF800000> : vector<17xf32>
    %91 = vector.multi_reduction <maximumf>, %90, %cst_34 [1] : vector<17x17xf32> to vector<17xf32>
    %92 = vector.shape_cast %91 : vector<17xf32> to vector<17x1xf32>
    %93 = vector.broadcast %92 : vector<17x1xf32> to vector<17x17xf32>
    %94 = arith.subf %90, %93 : vector<17x17xf32>
    %95 = math.exp %94 : vector<17x17xf32>
    %cst_35 = arith.constant dense<0.000000e+00> : vector<17xf32>
    %96 = vector.multi_reduction <add>, %95, %cst_35 [1] : vector<17x17xf32> to vector<17xf32>
    %97 = vector.shape_cast %96 : vector<17xf32> to vector<17x1xf32>
    %98 = tpu.reciprocal %97 {approx = true} : vector<17x1xf32> -> vector<17x1xf32>
    %99 = vector.broadcast %98 : vector<17x1xf32> to vector<17x17xf32>
    %100 = arith.mulf %95, %99 : vector<17x17xf32>
    %101 = arith.truncf %100 : vector<17x17xf32> to vector<17x17xbf16>
    %102 = arith.truncf %85 : vector<17x64xf32> to vector<17x64xbf16>
    %cst_36 = arith.constant dense<0.000000e+00> : vector<17x64xf32>
    %103 = tpu.matmul %101, %102, %cst_36 {dimension_numbers = #tpu.dot_dimension_numbers<[1], [0], [0], [1], [0, 0, 1, 1], [], []>} : vector<17x17xbf16>, vector<17x64xbf16>, vector<17x64xf32> -> vector<17x64xf32>
    %104 = arith.truncf %103 : vector<17x64xf32> to vector<17x64xbf16>
    %c128 = arith.constant 128 : index
    %c0_37 = arith.constant 0 : index
    %105 = vector.load %arg6[%c128, %c0_37] : memref<256x256xbf16, #tpu.memory_space<vmem>>, vector<64x256xbf16>
    %cst_38 = arith.constant dense<0.000000e+00> : vector<17x256xf32>
    %106 = tpu.matmul %104, %105, %cst_38 {dimension_numbers = #tpu.dot_dimension_numbers<[1], [0], [0], [1], [0, 0, 1, 1], [], []>} : vector<17x64xbf16>, vector<64x256xbf16>, vector<17x256xf32> -> vector<17x256xf32>
    %107 = arith.addf %82, %106 : vector<17x256xf32>
    %108 = vector.extract_strided_slice %29 {offsets = [0, 192], sizes = [17, 64], strides = [1, 1]} : vector<17x768xf32> to vector<17x64xf32>
    %109 = vector.extract_strided_slice %29 {offsets = [0, 448], sizes = [17, 64], strides = [1, 1]} : vector<17x768xf32> to vector<17x64xf32>
    %110 = vector.extract_strided_slice %29 {offsets = [0, 704], sizes = [17, 64], strides = [1, 1]} : vector<17x768xf32> to vector<17x64xf32>
    %111 = arith.truncf %108 : vector<17x64xf32> to vector<17x64xbf16>
    %112 = arith.truncf %109 : vector<17x64xf32> to vector<17x64xbf16>
    %cst_39 = arith.constant dense<0.000000e+00> : vector<17x17xf32>
    %113 = tpu.matmul %111, %112, %cst_39 {dimension_numbers = #tpu.dot_dimension_numbers<[1], [1], [0], [0], [0, 0, 1, 0], [], []>} : vector<17x64xbf16>, vector<17x64xbf16>, vector<17x17xf32> -> vector<17x17xf32>
    %cst_40 = arith.constant 1.250000e-01 : f32
    %114 = vector.broadcast %cst_40 : f32 to vector<17x17xf32>
    %115 = arith.mulf %113, %114 : vector<17x17xf32>
    %cst_41 = arith.constant dense<0xFF800000> : vector<17xf32>
    %116 = vector.multi_reduction <maximumf>, %115, %cst_41 [1] : vector<17x17xf32> to vector<17xf32>
    %117 = vector.shape_cast %116 : vector<17xf32> to vector<17x1xf32>
    %118 = vector.broadcast %117 : vector<17x1xf32> to vector<17x17xf32>
    %119 = arith.subf %115, %118 : vector<17x17xf32>
    %120 = math.exp %119 : vector<17x17xf32>
    %cst_42 = arith.constant dense<0.000000e+00> : vector<17xf32>
    %121 = vector.multi_reduction <add>, %120, %cst_42 [1] : vector<17x17xf32> to vector<17xf32>
    %122 = vector.shape_cast %121 : vector<17xf32> to vector<17x1xf32>
    %123 = tpu.reciprocal %122 {approx = true} : vector<17x1xf32> -> vector<17x1xf32>
    %124 = vector.broadcast %123 : vector<17x1xf32> to vector<17x17xf32>
    %125 = arith.mulf %120, %124 : vector<17x17xf32>
    %126 = arith.truncf %125 : vector<17x17xf32> to vector<17x17xbf16>
    %127 = arith.truncf %110 : vector<17x64xf32> to vector<17x64xbf16>
    %cst_43 = arith.constant dense<0.000000e+00> : vector<17x64xf32>
    %128 = tpu.matmul %126, %127, %cst_43 {dimension_numbers = #tpu.dot_dimension_numbers<[1], [0], [0], [1], [0, 0, 1, 1], [], []>} : vector<17x17xbf16>, vector<17x64xbf16>, vector<17x64xf32> -> vector<17x64xf32>
    %129 = arith.truncf %128 : vector<17x64xf32> to vector<17x64xbf16>
    %c192 = arith.constant 192 : index
    %c0_44 = arith.constant 0 : index
    %130 = vector.load %arg6[%c192, %c0_44] : memref<256x256xbf16, #tpu.memory_space<vmem>>, vector<64x256xbf16>
    %cst_45 = arith.constant dense<0.000000e+00> : vector<17x256xf32>
    %131 = tpu.matmul %129, %130, %cst_45 {dimension_numbers = #tpu.dot_dimension_numbers<[1], [0], [0], [1], [0, 0, 1, 1], [], []>} : vector<17x64xbf16>, vector<64x256xbf16>, vector<17x256xf32> -> vector<17x256xf32>
    %132 = arith.addf %107, %131 : vector<17x256xf32>
    %c0_46 = arith.constant 0 : index
    %c0_47 = arith.constant 0 : index
    %133 = vector.load %arg8[%c0_46, %c0_47] : memref<1x256xf32, #tpu.memory_space<vmem>>, vector<1x256xf32>
    %c0_48 = arith.constant 0 : index
    %c0_49 = arith.constant 0 : index
    %134 = vector.load %arg9[%c0_48, %c0_49] : memref<1x256xf32, #tpu.memory_space<vmem>>, vector<1x256xf32>
    %cst_50 = arith.constant dense<0.000000e+00> : vector<17xf32>
    %135 = vector.multi_reduction <add>, %132, %cst_50 [1] : vector<17x256xf32> to vector<17xf32>
    %136 = vector.shape_cast %135 : vector<17xf32> to vector<17x1xf32>
    %cst_51 = arith.constant 2.560000e+02 : f32
    %137 = vector.broadcast %cst_51 : f32 to vector<17x1xf32>
    %138 = arith.divf %136, %137 : vector<17x1xf32>
    %139 = vector.broadcast %138 : vector<17x1xf32> to vector<17x256xf32>
    %140 = arith.subf %132, %139 : vector<17x256xf32>
    %141 = arith.mulf %140, %140 : vector<17x256xf32>
    %cst_52 = arith.constant dense<0.000000e+00> : vector<17xf32>
    %142 = vector.multi_reduction <add>, %141, %cst_52 [1] : vector<17x256xf32> to vector<17xf32>
    %143 = vector.shape_cast %142 : vector<17xf32> to vector<17x1xf32>
    %cst_53 = arith.constant 2.560000e+02 : f32
    %144 = vector.broadcast %cst_53 : f32 to vector<17x1xf32>
    %145 = arith.divf %143, %144 : vector<17x1xf32>
    %cst_54 = arith.constant 9.99999974E-6 : f32
    %146 = vector.broadcast %cst_54 : f32 to vector<17x1xf32>
    %147 = arith.addf %145, %146 : vector<17x1xf32>
    %148 = math.rsqrt %147 : vector<17x1xf32>
    %149 = vector.broadcast %148 : vector<17x1xf32> to vector<17x256xf32>
    %150 = arith.mulf %140, %149 : vector<17x256xf32>
    %151 = vector.broadcast %133 : vector<1x256xf32> to vector<17x256xf32>
    %152 = arith.mulf %150, %151 : vector<17x256xf32>
    %153 = vector.broadcast %134 : vector<1x256xf32> to vector<17x256xf32>
    %154 = arith.addf %152, %153 : vector<17x256xf32>
    %155 = arith.truncf %154 : vector<17x256xf32> to vector<17x256xbf16>
    %c0_55 = arith.constant 0 : index
    %c0_56 = arith.constant 0 : index
    %156 = vector.load %arg10[%c0_55, %c0_56] : memref<256x1024xbf16, #tpu.memory_space<vmem>>, vector<256x1024xbf16>
    %cst_57 = arith.constant dense<0.000000e+00> : vector<17x1024xf32>
    %157 = tpu.matmul %155, %156, %cst_57 {dimension_numbers = #tpu.dot_dimension_numbers<[1], [0], [0], [1], [0, 0, 1, 1], [], []>} : vector<17x256xbf16>, vector<256x1024xbf16>, vector<17x1024xf32> -> vector<17x1024xf32>
    %c0_58 = arith.constant 0 : index
    %c0_59 = arith.constant 0 : index
    %158 = vector.load %arg11[%c0_58, %c0_59] : memref<1x1024xf32, #tpu.memory_space<vmem>>, vector<1x1024xf32>
    %159 = vector.broadcast %158 : vector<1x1024xf32> to vector<17x1024xf32>
    %160 = arith.addf %157, %159 : vector<17x1024xf32>
    %cst_60 = arith.constant 0.000000e+00 : f32
    %161 = vector.broadcast %cst_60 : f32 to vector<17x1024xf32>
    %162 = arith.maximumf %160, %161 : vector<17x1024xf32>
    %163 = arith.truncf %162 : vector<17x1024xf32> to vector<17x1024xbf16>
    %c0_61 = arith.constant 0 : index
    %c0_62 = arith.constant 0 : index
    %164 = vector.load %arg12[%c0_61, %c0_62] : memref<1024x256xbf16, #tpu.memory_space<vmem>>, vector<1024x256xbf16>
    %cst_63 = arith.constant dense<0.000000e+00> : vector<17x256xf32>
    %165 = tpu.matmul %163, %164, %cst_63 {dimension_numbers = #tpu.dot_dimension_numbers<[1], [0], [0], [1], [0, 0, 1, 1], [], []>} : vector<17x1024xbf16>, vector<1024x256xbf16>, vector<17x256xf32> -> vector<17x256xf32>
    %166 = arith.addf %132, %165 : vector<17x256xf32>
    %c0_64 = arith.constant 0 : index
    %c0_65 = arith.constant 0 : index
    %167 = vector.load %arg13[%c0_64, %c0_65] : memref<1x256xf32, #tpu.memory_space<vmem>>, vector<1x256xf32>
    %168 = vector.broadcast %167 : vector<1x256xf32> to vector<17x256xf32>
    %169 = arith.addf %166, %168 : vector<17x256xf32>
    %c0_66 = arith.constant 0 : index
    %c0_67 = arith.constant 0 : index
    %c0_68 = arith.constant 0 : index
    %170 = vector.load %arg14[%c0_66, %c0_67, %c0_68] : memref<1x17x256xf32, #tpu.memory_space<vmem>>, vector<1x17x256xf32>
    %171 = vector.shape_cast %170 : vector<1x17x256xf32> to vector<17x256xf32>
    %172 = vector.shape_cast %169 : vector<17x256xf32> to vector<1x17x256xf32>
    tpu.vector_store %arg14[%c0_66, %c0_67, %c0_68], %172 {strides = array<i32>} : memref<1x17x256xf32, #tpu.memory_space<vmem>>, vector<1x17x256xf32>,
    return
  }
  func.func @transform_0(%arg0: i32) -> (i32, i32, i32) {
    %c0_i32 = arith.constant 0 : i32
    %c0_i32_0 = arith.constant 0 : i32
    %c0_i32_1 = arith.constant 0 : i32
    return %arg0, %c0_i32, %c0_i32_0 : i32, i32, i32
  }
  func.func @transform_1(%arg0: i32) -> (i32, i32) {
    %c0_i32 = arith.constant 0 : i32
    %c0_i32_0 = arith.constant 0 : i32
    %c0_i32_1 = arith.constant 0 : i32
    return %c0_i32, %c0_i32_0 : i32, i32
  }
  func.func @transform_2(%arg0: i32) -> (i32, i32) {
    %c0_i32 = arith.constant 0 : i32
    %c0_i32_0 = arith.constant 0 : i32
    %c0_i32_1 = arith.constant 0 : i32
    return %c0_i32, %c0_i32_0 : i32, i32
  }
  func.func @transform_3(%arg0: i32) -> (i32, i32) {
    %c0_i32 = arith.constant 0 : i32
    %c0_i32_0 = arith.constant 0 : i32
    %c0_i32_1 = arith.constant 0 : i32
    return %c0_i32, %c0_i32_0 : i32, i32
  }
  func.func @transform_4(%arg0: i32) -> (i32, i32) {
    %c0_i32 = arith.constant 0 : i32
    %c0_i32_0 = arith.constant 0 : i32
    %c0_i32_1 = arith.constant 0 : i32
    return %c0_i32, %c0_i32_0 : i32, i32
  }
  func.func @transform_5(%arg0: i32) -> (i32, i32) {
    %c0_i32 = arith.constant 0 : i32
    %c0_i32_0 = arith.constant 0 : i32
    %c0_i32_1 = arith.constant 0 : i32
    return %c0_i32, %c0_i32_0 : i32, i32
  }
  func.func @transform_6(%arg0: i32) -> (i32, i32) {
    %c0_i32 = arith.constant 0 : i32
    %c0_i32_0 = arith.constant 0 : i32
    %c0_i32_1 = arith.constant 0 : i32
    return %c0_i32, %c0_i32_0 : i32, i32
  }
  func.func @transform_7(%arg0: i32) -> (i32, i32) {
    %c0_i32 = arith.constant 0 : i32
    %c0_i32_0 = arith.constant 0 : i32
    %c0_i32_1 = arith.constant 0 : i32
    return %c0_i32, %c0_i32_0 : i32, i32
  }
  func.func @transform_8(%arg0: i32) -> (i32, i32) {
    %c0_i32 = arith.constant 0 : i32
    %c0_i32_0 = arith.constant 0 : i32
    %c0_i32_1 = arith.constant 0 : i32
    return %c0_i32, %c0_i32_0 : i32, i32
  }
  func.func @transform_9(%arg0: i32) -> (i32, i32) {
    %c0_i32 = arith.constant 0 : i32
    %c0_i32_0 = arith.constant 0 : i32
    %c0_i32_1 = arith.constant 0 : i32
    return %c0_i32, %c0_i32_0 : i32, i32
  }
  func.func @transform_10(%arg0: i32) -> (i32, i32) {
    %c0_i32 = arith.constant 0 : i32
    %c0_i32_0 = arith.constant 0 : i32
    %c0_i32_1 = arith.constant 0 : i32
    return %c0_i32, %c0_i32_0 : i32, i32
  }
  func.func @transform_11(%arg0: i32) -> (i32, i32) {
    %c0_i32 = arith.constant 0 : i32
    %c0_i32_0 = arith.constant 0 : i32
    %c0_i32_1 = arith.constant 0 : i32
    return %c0_i32, %c0_i32_0 : i32, i32
  }
  func.func @transform_12(%arg0: i32) -> (i32, i32) {
    %c0_i32 = arith.constant 0 : i32
    %c0_i32_0 = arith.constant 0 : i32
    %c0_i32_1 = arith.constant 0 : i32
    return %c0_i32, %c0_i32_0 : i32, i32
  }
  func.func @transform_13(%arg0: i32) -> (i32, i32, i32) {
    %c0_i32 = arith.constant 0 : i32
    %c0_i32_0 = arith.constant 0 : i32
    %c0_i32_1 = arith.constant 0 : i32
    return %arg0, %c0_i32, %c0_i32_0 : i32, i32, i32
  }
}

module attributes {stable_mosaic.version = 11 : i64} {
  func.func @_ln_head_kernel(%arg0: i32, %arg1: memref<2x256xf32, #tpu.memory_space<vmem>>, %arg2: memref<1x256xf32, #tpu.memory_space<vmem>>, %arg3: memref<1x256xf32, #tpu.memory_space<vmem>>, %arg4: memref<256x128xbf16, #tpu.memory_space<vmem>>, %arg5: memref<1x128xf32, #tpu.memory_space<vmem>>, %arg6: memref<2x128xf32, #tpu.memory_space<vmem>>) attributes {dimension_semantics = [#tpu.dimension_semantics<arbitrary>], iteration_bounds = array<i64: 1>, scalar_prefetch = 0 : i64, scratch_operands = 0 : i64, tpu.core_type = #tpu.core_type<tc>, window_params = [{pipeline_mode = #tpu.pipeline_mode<synchronous>, transform_indices = @transform_0, window_bounds = array<i64: 2, 256>}, {pipeline_mode = #tpu.pipeline_mode<synchronous>, transform_indices = @transform_1, window_bounds = array<i64: 1, 256>}, {pipeline_mode = #tpu.pipeline_mode<synchronous>, transform_indices = @transform_2, window_bounds = array<i64: 1, 256>}, {pipeline_mode = #tpu.pipeline_mode<synchronous>, transform_indices = @transform_3, window_bounds = array<i64: 256, 128>}, {pipeline_mode = #tpu.pipeline_mode<synchronous>, transform_indices = @transform_4, window_bounds = array<i64: 1, 128>}, {pipeline_mode = #tpu.pipeline_mode<synchronous>, transform_indices = @transform_5, window_bounds = array<i64: 2, 128>}]} {
    %c0 = arith.constant 0 : index
    %c0_0 = arith.constant 0 : index
    %0 = vector.load %arg1[%c0, %c0_0] : memref<2x256xf32, #tpu.memory_space<vmem>>, vector<2x256xf32>
    %c0_1 = arith.constant 0 : index
    %c0_2 = arith.constant 0 : index
    %1 = vector.load %arg2[%c0_1, %c0_2] : memref<1x256xf32, #tpu.memory_space<vmem>>, vector<1x256xf32>
    %c0_3 = arith.constant 0 : index
    %c0_4 = arith.constant 0 : index
    %2 = vector.load %arg3[%c0_3, %c0_4] : memref<1x256xf32, #tpu.memory_space<vmem>>, vector<1x256xf32>
    %cst = arith.constant dense<0.000000e+00> : vector<2xf32>
    %3 = vector.multi_reduction <add>, %0, %cst [1] : vector<2x256xf32> to vector<2xf32>
    %4 = vector.shape_cast %3 : vector<2xf32> to vector<2x1xf32>
    %cst_5 = arith.constant 2.560000e+02 : f32
    %5 = vector.broadcast %cst_5 : f32 to vector<2x1xf32>
    %6 = arith.divf %4, %5 : vector<2x1xf32>
    %7 = vector.broadcast %6 : vector<2x1xf32> to vector<2x256xf32>
    %8 = arith.subf %0, %7 : vector<2x256xf32>
    %9 = arith.mulf %8, %8 : vector<2x256xf32>
    %cst_6 = arith.constant dense<0.000000e+00> : vector<2xf32>
    %10 = vector.multi_reduction <add>, %9, %cst_6 [1] : vector<2x256xf32> to vector<2xf32>
    %11 = vector.shape_cast %10 : vector<2xf32> to vector<2x1xf32>
    %cst_7 = arith.constant 2.560000e+02 : f32
    %12 = vector.broadcast %cst_7 : f32 to vector<2x1xf32>
    %13 = arith.divf %11, %12 : vector<2x1xf32>
    %cst_8 = arith.constant 9.99999974E-6 : f32
    %14 = vector.broadcast %cst_8 : f32 to vector<2x1xf32>
    %15 = arith.addf %13, %14 : vector<2x1xf32>
    %16 = math.rsqrt %15 : vector<2x1xf32>
    %17 = vector.broadcast %16 : vector<2x1xf32> to vector<2x256xf32>
    %18 = arith.mulf %8, %17 : vector<2x256xf32>
    %19 = vector.broadcast %1 : vector<1x256xf32> to vector<2x256xf32>
    %20 = arith.mulf %18, %19 : vector<2x256xf32>
    %21 = vector.broadcast %2 : vector<1x256xf32> to vector<2x256xf32>
    %22 = arith.addf %20, %21 : vector<2x256xf32>
    %23 = arith.truncf %22 : vector<2x256xf32> to vector<2x256xbf16>
    %c0_9 = arith.constant 0 : index
    %c0_10 = arith.constant 0 : index
    %24 = vector.load %arg4[%c0_9, %c0_10] : memref<256x128xbf16, #tpu.memory_space<vmem>>, vector<256x128xbf16>
    %cst_11 = arith.constant dense<0.000000e+00> : vector<2x128xf32>
    %25 = tpu.matmul %23, %24, %cst_11 {dimension_numbers = #tpu.dot_dimension_numbers<[1], [0], [0], [1], [0, 0, 1, 1], [], []>} : vector<2x256xbf16>, vector<256x128xbf16>, vector<2x128xf32> -> vector<2x128xf32>
    %c0_12 = arith.constant 0 : index
    %c0_13 = arith.constant 0 : index
    %26 = vector.load %arg5[%c0_12, %c0_13] : memref<1x128xf32, #tpu.memory_space<vmem>>, vector<1x128xf32>
    %27 = vector.broadcast %26 : vector<1x128xf32> to vector<2x128xf32>
    %28 = arith.addf %25, %27 : vector<2x128xf32>
    %c0_14 = arith.constant 0 : index
    %c0_15 = arith.constant 0 : index
    %29 = vector.load %arg6[%c0_14, %c0_15] : memref<2x128xf32, #tpu.memory_space<vmem>>, vector<2x128xf32>
    tpu.vector_store %arg6[%c0_14, %c0_15], %28 {strides = array<i32>} : memref<2x128xf32, #tpu.memory_space<vmem>>, vector<2x128xf32>,
    return
  }
  func.func @transform_0(%arg0: i32) -> (i32, i32) {
    %c0_i32 = arith.constant 0 : i32
    %c0_i32_0 = arith.constant 0 : i32
    %c0_i32_1 = arith.constant 0 : i32
    return %c0_i32, %c0_i32_0 : i32, i32
  }
  func.func @transform_1(%arg0: i32) -> (i32, i32) {
    %c0_i32 = arith.constant 0 : i32
    %c0_i32_0 = arith.constant 0 : i32
    %c0_i32_1 = arith.constant 0 : i32
    return %c0_i32, %c0_i32_0 : i32, i32
  }
  func.func @transform_2(%arg0: i32) -> (i32, i32) {
    %c0_i32 = arith.constant 0 : i32
    %c0_i32_0 = arith.constant 0 : i32
    %c0_i32_1 = arith.constant 0 : i32
    return %c0_i32, %c0_i32_0 : i32, i32
  }
  func.func @transform_3(%arg0: i32) -> (i32, i32) {
    %c0_i32 = arith.constant 0 : i32
    %c0_i32_0 = arith.constant 0 : i32
    %c0_i32_1 = arith.constant 0 : i32
    return %c0_i32, %c0_i32_0 : i32, i32
  }
  func.func @transform_4(%arg0: i32) -> (i32, i32) {
    %c0_i32 = arith.constant 0 : i32
    %c0_i32_0 = arith.constant 0 : i32
    %c0_i32_1 = arith.constant 0 : i32
    return %c0_i32, %c0_i32_0 : i32, i32
  }
  func.func @transform_5(%arg0: i32) -> (i32, i32) {
    %c0_i32 = arith.constant 0 : i32
    %c0_i32_0 = arith.constant 0 : i32
    %c0_i32_1 = arith.constant 0 : i32
    return %c0_i32, %c0_i32_0 : i32, i32
  }
}

</mosaic_0001>

<bundles_post_ra>
// kernel: vit_forward.4
= control target key start
LH: loop header
LB: loop body
LE: loop exit
PB: predicated region body
PF: predicated region fallthrough
CT: control target
= control target key end

     0   :  { %v60_v44 = vlaneseq  ;;  %s574_s1 = inlined_call_operand.vmem [shape: bf16[256,256], index: 1, kind: input, shape index: {}]   ;;  %s575_s0 = inlined_call_operand.vmem [shape: f32[32,256], index: 0, kind: input, shape index: {}]   ;;  %s576_s2 = inlined_call_operand.vmem [shape: f32[1,256], index: 2, kind: input, shape index: {}]   ;;  %s577_s3 = inlined_call_operand.vmem [shape: f32[32,256], index: 3, kind: output, shape index: {}]  }
   0x1   :  { %v359_v0 = vld [vmem:[%s574_s1 + $0x74] ss:$8 sps:$4 sm:$0xff]   ;;  %v361_v1 = vld [vmem:[%s574_s1 + $0x70] ss:$8 sps:$4 sm:$0xff]   ;;  %v362_v2 = vld [vmem:[%s574_s1 + $0x64] ss:$8 sps:$4 sm:$0xff]  }
   0x2   :  { %230 = vmatprep.subr.bf16.mxu0 %v359_v0  ;;  %327 = vmatprep.subr.bf16.mxu1 %v359_v0  ;;  %v364_v3 = vld [vmem:[%s574_s1 + $0x60] ss:$8 sps:$4 sm:$0xff]   ;;  %v365_v4 = vld [vmem:[%s574_s1 + $0x54] ss:$8 sps:$4 sm:$0xff]   ;;  %v367_v5 = vld [vmem:[%s574_s1 + $0x50] ss:$8 sps:$4 sm:$0xff]  }
   0x3   :  { %231 = vmatpush1.bf16.msra.mxu0 %v361_v1  ;;  %343 = vmatpush1.bf16.msra.mxu1 %v361_v1  ;;  %v368_v6 = vld [vmem:[%s574_s1 + $0x44] ss:$8 sps:$4 sm:$0xff]   ;;  %v370_v7 = vld [vmem:[%s574_s1 + $0x40] ss:$8 sps:$4 sm:$0xff]   ;;  %v371_v8 = vld [vmem:[%s574_s1 + $0x34] ss:$8 sps:$4 sm:$0xff]  }
   0x4   :  { %232 = vmatprep.subr.bf16.mxu0 %v362_v2  ;;  %328 = vmatprep.subr.bf16.mxu1 %v362_v2  ;;  %v373_v9 = vld [vmem:[%s574_s1 + $0x30] ss:$8 sps:$4 sm:$0xff]   ;;  %v374_v10 = vld [vmem:[%s574_s1 + $0x24] ss:$8 sps:$4 sm:$0xff]   ;;  %v376_v11 = vld [vmem:[%s574_s1 + $0x20] ss:$8 sps:$4 sm:$0xff]  }
   0x5   :  { %v377_v12 = vld [vmem:[%s574_s1 + $0x14] ss:$8 sps:$4 sm:$0xff]   ;;  %v15_v13 = vld [vmem:[%s575_s0 + $0x8] sm:$0xff]  ;;  %v379_v18 = vld [vmem:[%s574_s1 + $0x10] ss:$8 sps:$4 sm:$0xff]   ;;  %v61_v45 = vshrl.u32 %v60_v44, 7 }
   0x6   :  { %v17_v14 = vld [vmem:[%s575_s0 + $0x18] sm:$0xff]  ;;  %v19_v16 = vld [vmem:[%s575_s0 + $0x28] sm:$0xff]  ;;  %v14_v38 = vld [vmem:[%s575_s0] sm:$0xff] }
   0x7   :  { %233 = vmatpush1.bf16.msra.mxu0 %v364_v3  ;;  %344 = vmatpush1.bf16.msra.mxu1 %v364_v3  ;;  %v23_v15 = vpack.c.bf16 %v17_v14, %v15_v13  ;;  %v21_v17 = vld [vmem:[%s575_s0 + $0x38] sm:$0xff]  ;;  %v380_v20 = vld [vmem:[%s574_s1 + $0x4] ss:$8 sps:$4 sm:$0xff]   ;;  %v382_v21 = vld [vmem:[%s574_s1] ss:$8 sps:$4 sm:$0xff]   ;;  %v62_v46 = vsub.s32 0, %v61_v45 }
   0x8   :  { %234 = vmatprep.subr.bf16.mxu0 %v365_v4  ;;  %329 = vmatprep.subr.bf16.mxu1 %v365_v4  ;;  %v25_v19 = vpack.c.bf16 %v21_v17, %v19_v16  ;;  %v383_v22 = vld [vmem:[%s574_s1 + $0xf4] ss:$8 sps:$4 sm:$0xff]   ;;  %v385_v23 = vld [vmem:[%s574_s1 + $0xf0] ss:$8 sps:$4 sm:$0xff]   ;;  %v386_v24 = vld [vmem:[%s574_s1 + $0xe4] ss:$8 sps:$4 sm:$0xff]  }
   0x9   :  { %262 = vmatprep.mubr.bf16.mxu0 %v23_v15  ;;  %v388_v25 = vld [vmem:[%s574_s1 + $0xe0] ss:$8 sps:$4 sm:$0xff]   ;;  %v389_v26 = vld [vmem:[%s574_s1 + $0xd4] ss:$8 sps:$4 sm:$0xff]   ;;  %v391_v27 = vld [vmem:[%s574_s1 + $0xd0] ss:$8 sps:$4 sm:$0xff]  }
   0xa   :  { %272 = vmatprep.mubr.bf16.mxu1 %v25_v19  ;;  %v392_v28 = vld [vmem:[%s574_s1 + $0xc4] ss:$8 sps:$4 sm:$0xff]   ;;  %v394_v29 = vld [vmem:[%s574_s1 + $0xc0] ss:$8 sps:$4 sm:$0xff]   ;;  %v395_v30 = vld [vmem:[%s574_s1 + $0xb4] ss:$8 sps:$4 sm:$0xff]  }
   0xb   :  { %235 = vmatpush1.bf16.msra.mxu0 %v367_v5  ;;  %345 = vmatpush1.bf16.msra.mxu1 %v367_v5  ;;  %v397_v31 = vld [vmem:[%s574_s1 + $0xb0] ss:$8 sps:$4 sm:$0xff]   ;;  %v398_v32 = vld [vmem:[%s574_s1 + $0xa4] ss:$8 sps:$4 sm:$0xff]   ;;  %v400_v33 = vld [vmem:[%s574_s1 + $0xa0] ss:$8 sps:$4 sm:$0xff]  }
   0xc   :  { %236 = vmatprep.subr.bf16.mxu0 %v368_v6  ;;  %330 = vmatprep.subr.bf16.mxu1 %v368_v6  ;;  %v401_v34 = vld [vmem:[%s574_s1 + $0x94] ss:$8 sps:$4 sm:$0xff]   ;;  %v403_v35 = vld [vmem:[%s574_s1 + $0x90] ss:$8 sps:$4 sm:$0xff]   ;;  %v404_v36 = vld [vmem:[%s574_s1 + $0x84] ss:$8 sps:$4 sm:$0xff]  }
   0xd   :  { %v406_v37 = vld [vmem:[%s574_s1 + $0x80] ss:$8 sps:$4 sm:$0xff]   ;;  %v16_v39 = vld [vmem:[%s575_s0 + $0x10] sm:$0xff]  ;;  %v66_v48 = vsub.s32 1, %v61_v45 }
   0xe   :  { %v18_v40 = vld [vmem:[%s575_s0 + $0x20] sm:$0xff]  ;;  %v20_v41 = vld [vmem:[%s575_s0 + $0x30] sm:$0xff]  ;;  %v22_v42 = vpack.c.bf16 %v16_v39, %v14_v38 }
   0xf   :  { %237 = vmatpush1.bf16.msra.mxu0 %v370_v7  ;;  %346 = vmatpush1.bf16.msra.mxu1 %v370_v7  ;;  %v24_v43 = vpack.c.bf16 %v20_v41, %v18_v40  ;;  %v58_v47 = vld [vmem:[%s576_s2] sm:$0x3] }
  0x10   :  { %238 = vmatprep.subr.bf16.mxu0 %v371_v8  ;;  %331 = vmatprep.subr.bf16.mxu1 %v371_v8  ;;  %v63_v49 = vrot.slane %v58_v47, %v62_v46  ;;  %v67_v50 = vrot.slane %v58_v47, %v66_v48 }
  0x13   :  { %239 = vmatpush1.bf16.msra.mxu0 %v373_v9  ;;  %347 = vmatpush1.bf16.msra.mxu1 %v373_v9 }
  0x14   :  { %240 = vmatprep.subr.bf16.mxu0 %v374_v10  ;;  %332 = vmatprep.subr.bf16.mxu1 %v374_v10 }
  0x17   :  { %241 = vmatpush1.bf16.msra.mxu0 %v376_v11  ;;  %348 = vmatpush1.bf16.msra.mxu1 %v376_v11 }
  0x18   :  { %242 = vmatprep.subr.bf16.mxu0 %v377_v12  ;;  %333 = vmatprep.subr.bf16.mxu1 %v377_v12 }
  0x1b   :  { %243 = vmatpush1.bf16.msra.mxu0 %v379_v18  ;;  %349 = vmatpush1.bf16.msra.mxu1 %v379_v18 }
  0x1c   :  { %244 = vmatprep.subr.bf16.mxu0 %v380_v20  ;;  %334 = vmatprep.subr.bf16.mxu1 %v380_v20 }
  0x1f   :  { %245 = vmatpush1.bf16.msra.mxu0 %v382_v21  ;;  %350 = vmatpush1.bf16.msra.mxu1 %v382_v21 }
  0x20   :  { %246 = vmatprep.subr.bf16.mxu0 %v383_v22  ;;  %335 = vmatprep.subr.bf16.mxu1 %v383_v22 }
  0x23   :  { %247 = vmatpush2.bf16.msra.mxu0 %v385_v23  ;;  %351 = vmatpush2.bf16.msra.mxu1 %v385_v23 }
  0x24   :  { %248 = vmatprep.subr.bf16.mxu0 %v386_v24  ;;  %336 = vmatprep.subr.bf16.mxu1 %v386_v24 }
  0x27   :  { %249 = vmatpush2.bf16.msra.mxu0 %v388_v25  ;;  %352 = vmatpush2.bf16.msra.mxu1 %v388_v25 }
  0x28   :  { %250 = vmatprep.subr.bf16.mxu0 %v389_v26  ;;  %337 = vmatprep.subr.bf16.mxu1 %v389_v26 }
  0x2b   :  { %251 = vmatpush2.bf16.msra.mxu0 %v391_v27  ;;  %353 = vmatpush2.bf16.msra.mxu1 %v391_v27 }
  0x2c   :  { %252 = vmatprep.subr.bf16.mxu0 %v392_v28  ;;  %338 = vmatprep.subr.bf16.mxu1 %v392_v28 }
  0x2f   :  { %253 = vmatpush2.bf16.msra.mxu0 %v394_v29  ;;  %354 = vmatpush2.bf16.msra.mxu1 %v394_v29 }
  0x30   :  { %254 = vmatprep.subr.bf16.mxu0 %v395_v30  ;;  %339 = vmatprep.subr.bf16.mxu1 %v395_v30 }
  0x33   :  { %255 = vmatpush2.bf16.msra.mxu0 %v397_v31  ;;  %355 = vmatpush2.bf16.msra.mxu1 %v397_v31 }
  0x34   :  { %256 = vmatprep.subr.bf16.mxu0 %v398_v32  ;;  %340 = vmatprep.subr.bf16.mxu1 %v398_v32 }
  0x37   :  { %257 = vmatpush2.bf16.msra.mxu0 %v400_v33  ;;  %356 = vmatpush2.bf16.msra.mxu1 %v400_v33 }
  0x38   :  { %258 = vmatprep.subr.bf16.mxu0 %v401_v34  ;;  %341 = vmatprep.subr.bf16.mxu1 %v401_v34 }
  0x3b   :  { %259 = vmatpush2.bf16.msra.mxu0 %v403_v35  ;;  %357 = vmatpush2.bf16.msra.mxu1 %v403_v35 }
  0x3c   :  { %260 = vmatprep.subr.bf16.mxu0 %v404_v36  ;;  %342 = vmatprep.subr.bf16.mxu1 %v404_v36 }
  0x3f   :  { %261 = vmatpush2.bf16.msra.mxu0 %v406_v37  ;;  %358 = vmatpush2.bf16.msra.mxu1 %v406_v37 }
  0x42   :  { %263 = vmatmul.mubr.bf16.vlgmr.msra.gmra.mxu0 %v22_v42  ;;  %273 = vmatmul.mubr.bf16.vlgmr.msra.gmra.mxu1 %v24_v43 }
 0x102   :  { %v264_v51 = vpop.f32.mrf.mxu0  ;;  %v274_v52 = vpop.f32.mrf.mxu1 }
 0x103   :  { %v265_v53 = vadd.f32 %v264_v51, %v63_v49  ;;  %v275_v54 = vadd.f32 %v274_v52, %v63_v49 }
 0x104   :  { %v266_v55 = vpop.f32.mrf.mxu0  ;;  %v276_v56 = vpop.f32.mrf.mxu1 }
 0x105   :  { %283 = vst [vmem:[%s577_s3] sm:$0xff] %v265_v53  ;;  %287 = vst [vmem:[%s577_s3 + $0x20] sm:$0xff] %v275_v54  ;;  %v267_v57 = vadd.f32 %v266_v55, %v67_v50  ;;  %v277_v58 = vadd.f32 %v276_v56, %v67_v50 }
 0x106   :  { %v268_v59 = vpop.f32.mrf.mxu0  ;;  %v278_v60 = vpop.f32.mrf.mxu1 }
 0x107   :  { %284 = vst [vmem:[%s577_s3 + $0x8] sm:$0xff] %v267_v57  ;;  %288 = vst [vmem:[%s577_s3 + $0x28] sm:$0xff] %v277_v58  ;;  %v269_v61 = vadd.f32 %v268_v59, %v63_v49  ;;  %v279_v62 = vadd.f32 %v278_v60, %v63_v49 }
 0x108   :  { %v270_v63 = vpop.f32.mrf.mxu0  ;;  %v280_v0 = vpop.f32.mrf.mxu1 }
 0x109   :  { %285 = vst [vmem:[%s577_s3 + $0x10] sm:$0xff] %v269_v61  ;;  %289 = vst [vmem:[%s577_s3 + $0x30] sm:$0xff] %v279_v62  ;;  %v271_v1 = vadd.f32 %v270_v63, %v67_v50  ;;  %v281_v2 = vadd.f32 %v280_v0, %v67_v50 }
 0x10b   :  { %286 = vst [vmem:[%s577_s3 + $0x18] sm:$0xff] %v271_v1  ;;  %290 = vst [vmem:[%s577_s3 + $0x38] sm:$0xff] %v281_v2 }

// kernel: vit_forward.7
= control target key start
LH: loop header
LB: loop body
LE: loop exit
PB: predicated region body
PF: predicated region fallthrough
CT: control target
= control target key end

     0   :  { %v29_v0 = vlaneseq  ;;  %v407_v1 = vmov 1983009808   ;;  %vm36_vm0 = vcmask 1041408   ;;  %s520_s0 = inlined_call_operand.vmem [shape: f32[2,256], index: 0, kind: input, shape index: {}]   ;;  %s521_s1 = inlined_call_operand.vmem [shape: f32[1,256], index: 1, kind: input, shape index: {}]   ;;  %s522_s2 = inlined_call_operand.vmem [shape: f32[1,256], index: 2, kind: input, shape index: {}]   ;;  %s523_s3 = inlined_call_operand.vmem [shape: bf16[256,128], index: 3, kind: input, shape index: {}]   ;;  %s524_s4 = inlined_call_operand.vmem [shape: f32[1,128], index: 4, kind: input, shape index: {}]   ;;  %s525_s5 = inlined_call_operand.hbm [shape: f32[2,128], index: 5, kind: output, shape index: {}]  }
   0x1   :  { %v27_v2 = vunpack.c.l.s4 %v407_v1  ;;  %v22_v3 = vld [vmem:[%s520_s0] sm:$0xf] }
   0x2   :  { %v443_v4 = vshrl.u32 %v29_v0, 7 }
   0x3   :  { %v28_v5 = vunpack.c.0.s8 %v27_v2 }
   0x5   :  { %v446_v6 = vsub.s32 %v28_v5, %v443_v4 }
   0x7   :  { %v32_v7 = vrot.slane %v22_v3, %v446_v6 }
   0x9   :  { %v33_v8 = vcombine.high %v32_v7, %v32_v7  ;;  %v37_v9 = vsel %vm36_vm0, %v32_v7, 0.0 }
   0xb   :  { %v38_v10 = vsel %vm36_vm0, %v33_v8, 0.0 }
   0xc   :  { %v39_v11 = vadd.f32 %v38_v10, %v37_v9 }
   0xd   :  { %10 = vsyncpa [#allocation3], 0  ;;  %v408_v12 = vmov 269488144   ;;  %v367_v26 = vld [vmem:[%s523_s3 + $0x78] sm:$0xff]   ;;  %v369_v28 = vld [vmem:[%s523_s3 + $0x70] sm:$0xff]  }
   0xe   :  { %40 = vadd.xlane.f32.xlu0 %v39_v11  ;;  %v46_v13 = vunpack.c.l.s4 %v408_v12  ;;  %v368_v27 = vld [vmem:[%s523_s3 + $0x38] sm:$0xff]   ;;  %342 = vmatprep.subr.bf16.mxu0 %v367_v26  ;;  %v370_v29 = vld [vmem:[%s523_s3 + $0x30] sm:$0xff]   ;;  %v371_v30 = vld [vmem:[%s523_s3 + $0x68] sm:$0xff]   ;;  %v87_v45 = vsub.s32 0, %v443_v4  ;;  %v91_v46 = vsub.s32 1, %v443_v4 }
   0xf   :  { %343 = vmatpush3.bf16.msra.mxu0 %v368_v27  ;;  %v372_v31 = vld [vmem:[%s523_s3 + $0x28] sm:$0xff]   ;;  %v373_v32 = vld [vmem:[%s523_s3 + $0x60] sm:$0xff]   ;;  %v375_v34 = vld [vmem:[%s523_s3 + $0x58] sm:$0xff]  }
  0x10   :  { %v47_v14 = vunpack.c.0.s8 %v46_v13  ;;  %344 = vmatprep.subr.bf16.mxu0 %v369_v28  ;;  %v374_v33 = vld [vmem:[%s523_s3 + $0x20] sm:$0xff]   ;;  %v376_v35 = vld [vmem:[%s523_s3 + $0x18] sm:$0xff]   ;;  %v377_v36 = vld [vmem:[%s523_s3 + $0x50] sm:$0xff]  }
  0x11   :  { %v378_v37 = vld [vmem:[%s523_s3 + $0x10] sm:$0xff]   ;;  %v379_v38 = vld [vmem:[%s523_s3 + $0x48] sm:$0xff]   ;;  %v381_v40 = vld [vmem:[%s523_s3 + $0x40] sm:$0xff]  }
  0x12   :  { %v50_v15 = vsub.s32 %v47_v14, %v443_v4  ;;  %v380_v39 = vld [vmem:[%s523_s3 + $0x8] sm:$0xff]   ;;  %v382_v41 = vld [vmem:[%s523_s3] sm:$0xff]   ;;  %s409_s3 = smov [#allocation2]  }
  0x13   :  { %345 = vmatpush3.bf16.msra.mxu0 %v370_v29  ;;  %v23_v47 = vld [vmem:[%s521_s1] sm:$0x3]  ;;  %s317_s29 = sshll.u32 %s409_s3, 4  ;;  %s318_s29 = int_to_ptr.vmem [resolvable:$true] %s317_s29 }
  0x14   :  { %346 = vmatprep.subr.bf16.mxu0 %v371_v30  ;;  %v24_v48 = vld [vmem:[%s522_s2] sm:$0x3]  ;;  %v88_v49 = vrot.slane %v23_v47, %v87_v45  ;;  %v92_v50 = vrot.slane %v23_v47, %v91_v46  ;;  %s385_s30 = scalar_lea.vmem %s318_s29, 32  ;;  %p390_p1 = scmp.lt.s32.totalorder %s318_s29, %s318_s29 }
  0x15   :  { %v107_v51 = vrot.slane %v24_v48, %v87_v45  ;;  %v111_v52 = vrot.slane %v24_v48, %v91_v46  ;;  %v325_v4 = vld [vmem:[%s524_s4] ss:$0 sm:$0xff]  ;;  %p386_p0 = scmp.ne.s32.totalorder %s318_s29, %s385_s30  ;;  %p391_p2 = scmp.lt.s32.totalorder %s385_s30, %s385_s30 }
  0x16   :  { %v93_v53 = vcombine.low %v88_v49, %v92_v50 }
  0x17   :  { %347 = vmatpush3.bf16.msra.mxu0 %v372_v31  ;;  %v112_v54 = vcombine.low %v107_v51, %v111_v52  ;;  %p392_p3 = por %p391_p2, %p390_p1 }
  0x18   :  { %348 = vmatprep.subr.bf16.mxu0 %v373_v32  ;;  %v100_v57 = vrot.slane %v93_v53, %v446_v6 }
  0x19   :  { %v119_v59 = vrot.slane %v112_v54, %v446_v6  ;;  %p393_p4 = pnand %p392_p3, %p386_p0 }
  0x1b   :  { %349 = vmatpush3.bf16.msra.mxu0 %v374_v33 }
  0x1c   :  { %350 = vmatprep.subr.bf16.mxu0 %v375_v34 }
  0x1f   :  { %351 = vmatpush3.bf16.msra.mxu0 %v376_v35 }
  0x20   :  { %352 = vmatprep.subr.bf16.mxu0 %v377_v36 }
  0x23   :  { %353 = vmatpush3.bf16.msra.mxu0 %v378_v37 }
  0x24   :  { %354 = vmatprep.subr.bf16.mxu0 %v379_v38 }
  0x27   :  { %355 = vmatpush3.bf16.msra.mxu0 %v380_v39 }
  0x28   :  { %356 = vmatprep.subr.bf16.mxu0 %v381_v40 }
  0x2b   :  { %357 = vmatpush3.bf16.msra.mxu0 %v382_v41 }
  0x97   :  { %v41_v16 = vpop.xlane.xlu0 %40 }
  0x98   :  { %v43_v17 = vmul.f32 0.00390625, %v41_v16 }
  0x9a   :  { %v51_v18 = vrot.slane %v43_v17, %v50_v15 }
  0x9c   :  { %v53_v19 = vsub.f32 %v22_v3, %v51_v18 }
  0x9e   :  { %v54_v20 = vmul.f32 %v53_v19, %v53_v19 }
  0xa0   :  { %v62_v21 = vrot.slane %v54_v20, %v446_v6 }
  0xa2   :  { %v63_v22 = vcombine.high %v62_v21, %v62_v21  ;;  %v66_v23 = vsel %vm36_vm0, %v62_v21, 0.0 }
  0xa4   :  { %v67_v24 = vsel %vm36_vm0, %v63_v22, 0.0 }
  0xa5   :  { %v68_v25 = vadd.f32 %v67_v24, %v66_v23 }
  0xa7   :  { %69 = vadd.xlane.f32.xlu0 %v68_v25 }
 0x130   :  { %v70_v42 = vpop.xlane.xlu0 %69 }
 0x131   :  { %v71_v43 = vmul.f32 0.00390625, %v70_v42 }
 0x133   :  { %v72_v44 = vadd.f32 1e-05, %v71_v43 }
 0x135   :  { %383 = vrsqrt.f32 %v72_v44 }
 0x142   :  { %v384_v55 = vpop.eup %383 }
 0x143   :  { %v81_v56 = vrot.slane %v384_v55, %v50_v15 }
 0x145   :  { %v83_v58 = vmul.f32 %v81_v56, %v53_v19 }
 0x147   :  { %v102_v60 = vmul.f32 %v100_v57, %v83_v58 }
 0x149   :  { %v121_v61 = vadd.f32 %v119_v59, %v102_v60 }
 0x14b   :  { %v129_v62 = vrot.slane %v121_v61, %v446_v6 }
 0x14d   :  { %v130_v63 = vcombine.high %v129_v62, %v129_v62  ;;  %v133_v1 = vpack.c.bf16 %v129_v62, %v129_v62 }
 0x14f   :  { %v134_v0 = vpack.c.bf16 %v130_v63, %v130_v63 }
 0x151   :  { %302 = vmatprep.mubr.bf16.mxu0 %v134_v0 }
 0x152   :  { %303 = vmatmul.mubr.bf16.vlgmr.msra.gmra.mxu0 %v133_v1 }
 0x212   :  { %v358_v2 = vpop.f32.mrf.mxu0 }
 0x214   :  { %v359_v3 = vpop.f32.mrf.mxu0 }
 0x215   :  { %v360_v5 = vadd.f32 %v359_v3, %v358_v2 }
 0x216   :  { %v361_v7 = vpop.f32.mrf.mxu0 }
 0x217   :  { %v305_v8 = vadd.f32 %v360_v5, %v325_v4 }
 0x218   :  { %v362_v9 = vpop.f32.mrf.mxu0 }
 0x219   :  { %310 = vst [vmem:[#allocation2] sm:$0x3] %v305_v8 }
 0x21a   :  { %396 = shalt.err (!%p393_p4)
}
 0x21b   :  { %320 = dma.vmem_to_hbm [thread:$0]  %s318_s29, 32, %s525_s5, [#allocation3]  }
 0x21c   :  { %405 = dma.done.wait [#allocation3], 32  }
 0x21d   :  { %406 = vsyncadd [#allocation3], 4294967264 }
 0x21e   :  { %324 = vsyncpa [#allocation3], 1 }

// kernel: vit_forward.5
= control target key start
LH: loop header
LB: loop body
LE: loop exit
PB: predicated region body
PF: predicated region fallthrough
CT: control target
= control target key end

     0   :  { %s5713_s25 = smov 0   ;;  %s7389_s0 = inlined_call_operand.vmem [shape: f32[2,17,256], index: 0, kind: input, shape index: {}]   ;;  %s7390_s1 = inlined_call_operand.vmem [shape: f32[1,256], index: 1, kind: input, shape index: {}]   ;;  %s7391_s2 = inlined_call_operand.vmem [shape: f32[1,256], index: 2, kind: input, shape index: {}]   ;;  %s7392_s3 = inlined_call_operand.vmem [shape: bf16[256,768], index: 3, kind: input, shape index: {}]   ;;  %s7393_s4 = inlined_call_operand.vmem [shape: f32[1,768], index: 4, kind: input, shape index: {}]   ;;  %s7394_s5 = inlined_call_operand.vmem [shape: bf16[256,256], index: 5, kind: input, shape index: {}]   ;;  %s7395_s6 = inlined_call_operand.vmem [shape: f32[1,256], index: 6, kind: input, shape index: {}]   ;;  %s7396_s7 = inlined_call_operand.vmem [shape: f32[1,256], index: 7, kind: input, shape index: {}]   ;;  %s7397_s8 = inlined_call_operand.vmem [shape: f32[1,256], index: 8, kind: input, shape index: {}]   ;;  %s7398_s9 = inlined_call_operand.vmem [shape: bf16[256,1024], index: 9, kind: input, shape index: {}]   ;;  %s7399_s10 = inlined_call_operand.vmem [shape: f32[1,1024], index: 10, kind: input, shape index: {}]   ;;  %s7400_s11 = inlined_call_operand.vmem [shape: bf16[1024,256], index: 11, kind: input, shape index: {}]   ;;  %s7401_s12 = inlined_call_operand.vmem [shape: f32[1,256], index: 12, kind: input, shape index: {}]   ;;  %s7402_s13 = inlined_call_operand.vmem [shape: f32[2,17,256], index: 13, kind: output, shape index: {}]  }
   0x1 LB: > { %s4651_s26 = sadd.s32 4294967295, %s5639_s25   ;;  %p4655_p0 = scmp.ge.s32.totalorder %s5639_s25, 1  ;;  %s5639_s25 = sphi %s5713_s25, %s23_s25  }
   0x2   : > { %p387_p1 = scmp.lt.s32.totalorder %s5639_s25, 3 }
   0x4   : > { %p388_p2 = pnand %p4655_p0, %p387_p1 }
   0x5   : > { %p431_p3 = scmp.lt.s32.totalorder (!%p388_p2), %s4651_s26, 1  ;;  %s5642_s17 = smov (!%p388_p2), 64  }
   0x6   : > { %391 = sbr.rel (%p388_p2) target bundleno = 4070 (0xfe6), region = 72 }
   0xb   : > { %s7404_s26 = smov (!%p431_p3, %s4651_s26), 1  ;;  %vm456_vm0 = vcmask 1040384   ;;  %v5183_v11 = vld [vmem:[%s7392_s3 + $0x154] ss:$24 sps:$4 sm:$0xff]   ;;  %v5185_v12 = vld [vmem:[%s7392_s3 + $0x150] ss:$24 sps:$4 sm:$0xff]  }
   0xc   : > { %s5172_s27 = smul.u32 48, %s7404_s26  ;;  %v5186_v13 = vld [vmem:[%s7392_s3 + $0x15c] ss:$24 sps:$4 sm:$0xff]   ;;  %v5188_v14 = vld [vmem:[%s7392_s3 + $0x158] ss:$24 sps:$4 sm:$0xff]   ;;  %1150 = vmatprep.subr.bf16.mxu0 %v5183_v11  ;;  %vm1325_vm1 = vcmask 523264  }
   0xd   : > { %v5189_v15 = vld [vmem:[%s7392_s3 + $0x124] ss:$24 sps:$4 sm:$0xff]   ;;  %1201 = vmatprep.subr.bf16.mxu1 %v5186_v13  ;;  %1151 = vmatpush1.bf16.msra.mxu0 %v5185_v12  ;;  %v5191_v17 = vld [vmem:[%s7392_s3 + $0x120] ss:$24 sps:$4 sm:$0xff]   ;;  %v5195_v19 = vld [vmem:[%s7392_s3 + $0xf4] ss:$24 sps:$4 sm:$0xff]  }
   0xe   : > { %s5729_s30 = scalar_lea.vmem %s7389_s0, %s5172_s27  ;;  %v5192_v16 = vld [vmem:[%s7392_s3 + $0x12c] ss:$24 sps:$4 sm:$0xff]   ;;  %1202 = vmatpush1.bf16.msra.mxu1 %v5188_v14  ;;  %v5194_v18 = vld [vmem:[%s7392_s3 + $0x128] ss:$24 sps:$4 sm:$0xff]   ;;  %1152 = vmatprep.subr.bf16.mxu0 %v5189_v15  ;;  %v5198_v20 = vld [vmem:[%s7392_s3 + $0xfc] ss:$24 sps:$4 sm:$0xff]   ;;  %s7373_s23 = scalar_lea.vmem %s7402_s13, %s5172_s27 }
   0xf   : > { %v5732_v0 = vld [vmem:[%s5729_s30] sm:$0xff]  ;;  %v5735_v1 = vld [vmem:[%s5729_s30 + $0x8] sm:$0xff]  ;;  %v5748_v6 = vld [vmem:[%s5729_s30 + $0x10] sm:$0xff]  ;;  %1203 = vmatprep.subr.bf16.mxu1 %v5192_v16  ;;  %vm1389_vm2 = vcmask 138240   ;;  %vm1396_vm3 = vcmask 131072  }
  0x10   : > { %v5738_v2 = vld [vmem:[%s5729_s30 + $0x20] sm:$0x1]  ;;  %v450_v3 = vadd.f32 %v5735_v1, %v5732_v0  ;;  %v5743_v4 = vld [vmem:[%s5729_s30 + $0x28] sm:$0x1]  ;;  %v5751_v7 = vld [vmem:[%s5729_s30 + $0x18] sm:$0xff] }
  0x11   : > { %v457_v5 = vsel %vm456_vm0, %v5738_v2, 0.0  ;;  %v458_v8 = vsel %vm456_vm0, %v5743_v4, 0.0  ;;  %v453_v10 = vadd.f32 %v5751_v7, %v5748_v6  ;;  %1153 = vmatpush1.bf16.msra.mxu0 %v5191_v17  ;;  %v5197_v21 = vld [vmem:[%s7392_s3 + $0xf0] ss:$24 sps:$4 sm:$0xff]   ;;  %v5201_v23 = vld [vmem:[%s7392_s3 + $0xc4] ss:$24 sps:$4 sm:$0xff]  }
  0x12   : > { %451 = vadd.xlane.f32.xlu0 %v450_v3  ;;  %v459_v9 = vadd.f32 %v458_v8, %v457_v5  ;;  %1204 = vmatpush1.bf16.msra.mxu1 %v5194_v18  ;;  %v5200_v22 = vld [vmem:[%s7392_s3 + $0xf8] ss:$24 sps:$4 sm:$0xff]   ;;  %v5204_v24 = vld [vmem:[%s7392_s3 + $0xcc] ss:$24 sps:$4 sm:$0xff]   ;;  %v5206_v26 = vld [vmem:[%s7392_s3 + $0xc8] ss:$24 sps:$4 sm:$0xff]  }
  0x13   : > { %1154 = vmatprep.subr.bf16.mxu0 %v5195_v19  ;;  %1205 = vmatprep.subr.bf16.mxu1 %v5198_v20  ;;  %v5203_v25 = vld [vmem:[%s7392_s3 + $0xc0] ss:$24 sps:$4 sm:$0xff]   ;;  %v5207_v27 = vld [vmem:[%s7392_s3 + $0x94] ss:$24 sps:$4 sm:$0xff]   ;;  %v5209_v29 = vld [vmem:[%s7392_s3 + $0x90] ss:$24 sps:$4 sm:$0xff]  }
  0x14   : > { %460 = vadd.xlane.f32.xlu1 %v459_v9  ;;  %v5210_v28 = vld [vmem:[%s7392_s3 + $0x9c] ss:$24 sps:$4 sm:$0xff]   ;;  %v5212_v30 = vld [vmem:[%s7392_s3 + $0x98] ss:$24 sps:$4 sm:$0xff]   ;;  %v5216_v32 = vld [vmem:[%s7392_s3 + $0x6c] ss:$24 sps:$4 sm:$0xff]  }
  0x15   : > { %1155 = vmatpush1.bf16.msra.mxu0 %v5197_v21  ;;  %v5213_v31 = vld [vmem:[%s7392_s3 + $0x64] ss:$24 sps:$4 sm:$0xff]   ;;  %v5215_v33 = vld [vmem:[%s7392_s3 + $0x60] ss:$24 sps:$4 sm:$0xff]   ;;  %v5219_v35 = vld [vmem:[%s7392_s3 + $0x34] ss:$24 sps:$4 sm:$0xff]  }
  0x16   : > { %454 = vadd.xlane.f32.xlu0 %v453_v10  ;;  %1206 = vmatpush1.bf16.msra.mxu1 %v5200_v22  ;;  %v5218_v34 = vld [vmem:[%s7392_s3 + $0x68] ss:$24 sps:$4 sm:$0xff]   ;;  %v5222_v36 = vld [vmem:[%s7392_s3 + $0x3c] ss:$24 sps:$4 sm:$0xff]   ;;  %v5224_v38 = vld [vmem:[%s7392_s3 + $0x38] ss:$24 sps:$4 sm:$0xff]  }
  0x17   : > { %1156 = vmatprep.subr.bf16.mxu0 %v5201_v23  ;;  %1207 = vmatprep.subr.bf16.mxu1 %v5204_v24  ;;  %v5221_v37 = vld [vmem:[%s7392_s3 + $0x30] ss:$24 sps:$4 sm:$0xff]   ;;  %v5225_v39 = vld [vmem:[%s7392_s3 + $0x4] ss:$24 sps:$4 sm:$0xff]   ;;  %v5227_v41 = vld [vmem:[%s7392_s3] ss:$24 sps:$4 sm:$0xff]  }
  0x18   : > { %v5228_v40 = vld [vmem:[%s7392_s3 + $0xc] ss:$24 sps:$4 sm:$0xff]   ;;  %v5230_v42 = vld [vmem:[%s7392_s3 + $0x8] ss:$24 sps:$4 sm:$0xff]   ;;  %v5234_v44 = vld [vmem:[%s7392_s3 + $0x2dc] ss:$24 sps:$4 sm:$0xff]  }
  0x19   : > { %1157 = vmatpush1.bf16.msra.mxu0 %v5203_v25  ;;  %v5231_v43 = vld [vmem:[%s7392_s3 + $0x2d4] ss:$24 sps:$4 sm:$0xff]   ;;  %v5233_v45 = vld [vmem:[%s7392_s3 + $0x2d0] ss:$24 sps:$4 sm:$0xff]   ;;  %v5249_v14 = vld [vmem:[%s7392_s3 + $0x244] ss:$24 sps:$4 sm:$0xff]  }
  0x1a   : > { %1208 = vmatpush1.bf16.msra.mxu1 %v5206_v26  ;;  %1158 = vmatprep.subr.bf16.mxu0 %v5207_v27  ;;  %v5236_v5 = vld [vmem:[%s7392_s3 + $0x2d8] ss:$24 sps:$4 sm:$0xff]   ;;  %v5240_v8 = vld [vmem:[%s7392_s3 + $0x2ac] ss:$24 sps:$4 sm:$0xff]   ;;  %v5242_v9 = vld [vmem:[%s7392_s3 + $0x2a8] ss:$24 sps:$4 sm:$0xff]  }
  0x1b   : > { %1209 = vmatprep.subr.bf16.mxu1 %v5210_v28  ;;  %v5243_v10 = vld [vmem:[%s7392_s3 + $0x274] ss:$24 sps:$4 sm:$0xff]   ;;  %v5245_v11 = vld [vmem:[%s7392_s3 + $0x270] ss:$24 sps:$4 sm:$0xff]   ;;  %v5251_v15 = vld [vmem:[%s7392_s3 + $0x240] ss:$24 sps:$4 sm:$0xff]  }
  0x1c   : > { %v5246_v12 = vld [vmem:[%s7392_s3 + $0x27c] ss:$24 sps:$4 sm:$0xff]   ;;  %v5248_v13 = vld [vmem:[%s7392_s3 + $0x278] ss:$24 sps:$4 sm:$0xff]   ;;  %v5252_v16 = vld [vmem:[%s7392_s3 + $0x24c] ss:$24 sps:$4 sm:$0xff]  }
  0x1d   : > { %1159 = vmatpush1.bf16.msra.mxu0 %v5209_v29  ;;  %v5254_v17 = vld [vmem:[%s7392_s3 + $0x248] ss:$24 sps:$4 sm:$0xff]   ;;  %v5255_v18 = vld [vmem:[%s7392_s3 + $0x214] ss:$24 sps:$4 sm:$0xff]   ;;  %v5260_v21 = vld [vmem:[%s7392_s3 + $0x218] ss:$24 sps:$4 sm:$0xff]  }
  0x1e   : > { %1210 = vmatpush1.bf16.msra.mxu1 %v5212_v30  ;;  %1160 = vmatprep.subr.bf16.mxu0 %v5213_v31  ;;  %v5258_v19 = vld [vmem:[%s7392_s3 + $0x21c] ss:$24 sps:$4 sm:$0xff]   ;;  %v5257_v20 = vld [vmem:[%s7392_s3 + $0x210] ss:$24 sps:$4 sm:$0xff]   ;;  %v5264_v23 = vld [vmem:[%s7392_s3 + $0x1ec] ss:$24 sps:$4 sm:$0xff]  }
  0x1f   : > { %1211 = vmatprep.subr.bf16.mxu1 %v5216_v32  ;;  %v5261_v22 = vld [vmem:[%s7392_s3 + $0x1e4] ss:$24 sps:$4 sm:$0xff]   ;;  %v5263_v24 = vld [vmem:[%s7392_s3 + $0x1e0] ss:$24 sps:$4 sm:$0xff]   ;;  %v5267_v26 = vld [vmem:[%s7392_s3 + $0x1b4] ss:$24 sps:$4 sm:$0xff]  }
  0x20   : > { %v5266_v25 = vld [vmem:[%s7392_s3 + $0x1e8] ss:$24 sps:$4 sm:$0xff]   ;;  %v5270_v27 = vld [vmem:[%s7392_s3 + $0x1bc] ss:$24 sps:$4 sm:$0xff]   ;;  %v5272_v29 = vld [vmem:[%s7392_s3 + $0x1b8] ss:$24 sps:$4 sm:$0xff]  }
  0x21   : > { %1161 = vmatpush1.bf16.msra.mxu0 %v5215_v33  ;;  %v5269_v28 = vld [vmem:[%s7392_s3 + $0x1b0] ss:$24 sps:$4 sm:$0xff]   ;;  %v5273_v30 = vld [vmem:[%s7392_s3 + $0x184] ss:$24 sps:$4 sm:$0xff]   ;;  %v5275_v32 = vld [vmem:[%s7392_s3 + $0x180] ss:$24 sps:$4 sm:$0xff]  }
  0x22   : > { %1212 = vmatpush1.bf16.msra.mxu1 %v5218_v34  ;;  %1162 = vmatprep.subr.bf16.mxu0 %v5219_v35  ;;  %v5276_v31 = vld [vmem:[%s7392_s3 + $0x18c] ss:$24 sps:$4 sm:$0xff]   ;;  %v5278_v33 = vld [vmem:[%s7392_s3 + $0x188] ss:$24 sps:$4 sm:$0xff]  }
  0x23   : > { %1213 = vmatprep.subr.bf16.mxu1 %v5222_v36  ;;  %v5281_v34 = vld [vmem:[%s7392_s3 + $0x164] ss:$24 sps:$4 sm:$0xff]  }
  0x25   : > { %1163 = vmatpush1.bf16.msra.mxu0 %v5221_v37 }
  0x26   : > { %1214 = vmatpush1.bf16.msra.mxu1 %v5224_v38  ;;  %1164 = vmatprep.subr.bf16.mxu0 %v5225_v39 }
  0x27   : > { %1215 = vmatprep.subr.bf16.mxu1 %v5228_v40 }
  0x29   : > { %1165 = vmatpush1.bf16.msra.mxu0 %v5227_v41 }
  0x2a   : > { %1216 = vmatpush1.bf16.msra.mxu1 %v5230_v42  ;;  %1166 = vmatprep.subr.bf16.mxu0 %v5231_v43  ;;  %v505_v43 = vlaneseq }
  0x2b   : > { %1217 = vmatprep.subr.bf16.mxu1 %v5234_v44 }
  0x2d   : > { %1167 = vmatpush2.bf16.msra.mxu0 %v5233_v45  ;;  %v5984_v45 = vshrl.u32 %v505_v43, 7  ;;  %v5321_v43 = vld [vmem:[%s7392_s3 + $0x1c0] ss:$24 sps:$4 sm:$0xff]  }
  0x2e   : > { %1218 = vmatpush2.bf16.msra.mxu1 %v5236_v5 }
  0x2f   : > { %1219 = vmatprep.subr.bf16.mxu1 %v5240_v8 }
  0x32   : > { %1220 = vmatpush2.bf16.msra.mxu1 %v5242_v9 }
  0x33   : > { %1221 = vmatprep.subr.bf16.mxu1 %v5246_v12 }
  0x36   : > { %1222 = vmatpush2.bf16.msra.mxu1 %v5248_v13 }
  0x37   : > { %1223 = vmatprep.subr.bf16.mxu1 %v5252_v16  ;;  %v5287_v16 = vld [vmem:[%s7392_s3 + $0x104] ss:$24 sps:$4 sm:$0xff]  }
  0x3a   : > { %1224 = vmatpush2.bf16.msra.mxu1 %v5254_v17 }
  0x3b   : > { %1225 = vmatprep.subr.bf16.mxu1 %v5258_v19 }
  0x3e   : > { %1226 = vmatpush2.bf16.msra.mxu1 %v5260_v21  ;;  %v5288_v21 = vld [vmem:[%s7392_s3 + $0xd0] ss:$24 sps:$4 sm:$0xff]  }
  0x3f   : > { %1227 = vmatprep.subr.bf16.mxu1 %v5264_v23  ;;  %v5291_v23 = vld [vmem:[%s7392_s3 + $0xa0] ss:$24 sps:$4 sm:$0xff]  }
  0x42   : > { %1228 = vmatpush2.bf16.msra.mxu1 %v5266_v25  ;;  %v5294_v25 = vld [vmem:[%s7392_s3 + $0x70] ss:$24 sps:$4 sm:$0xff]  }
  0x43   : > { %1229 = vmatprep.subr.bf16.mxu1 %v5270_v27  ;;  %v5297_v27 = vld [vmem:[%s7392_s3 + $0x40] ss:$24 sps:$4 sm:$0xff]  }
  0x46   : > { %1230 = vmatpush2.bf16.msra.mxu1 %v5272_v29  ;;  %v5300_v29 = vld [vmem:[%s7392_s3 + $0x10] ss:$24 sps:$4 sm:$0xff]  }
  0x47   : > { %1231 = vmatprep.subr.bf16.mxu1 %v5276_v31  ;;  %v5303_v31 = vld [vmem:[%s7392_s3 + $0x2e0] ss:$24 sps:$4 sm:$0xff]  }
  0x4a   : > { %1232 = vmatpush2.bf16.msra.mxu1 %v5278_v33  ;;  %v5306_v33 = vld [vmem:[%s7392_s3 + $0x2b0] ss:$24 sps:$4 sm:$0xff]  }
  0x9b   : > { %v452_v46 = vpop.xlane.xlu0 %451 }
  0x9c   : > { %v463_v47 = vmul.f32 0.00390625, %v452_v46  ;;  %v5987_v46 = vsub.s32 1, %v5984_v45 }
  0x9d   : > { %v461_v48 = vpop.xlane.xlu1 %460 }
  0x9e   : > { %v5863_v49 = vsub.f32 %v5732_v0, %v463_v47  ;;  %v5866_v50 = vsub.f32 %v5735_v1, %v463_v47  ;;  %v465_v51 = vmul.f32 0.00390625, %v461_v48  ;;  %v5990_v47 = vsub.s32 0, %v5984_v45  ;;  %v448_v48 = vld [vmem:[%s7390_s1] sm:$0x3] }
  0x9f   : > { %v455_v52 = vpop.xlane.xlu0 %454 }
  0xa0   : > { %v5869_v53 = vsub.f32 %v5738_v2, %v465_v51  ;;  %v5872_v54 = vsub.f32 %v5743_v4, %v465_v51  ;;  %v464_v55 = vmul.f32 0.00390625, %v455_v52  ;;  %v472_v56 = vmul.f32 %v5863_v49, %v5863_v49  ;;  %v449_v52 = vld [vmem:[%s7391_s2] sm:$0x3] }
  0xa1   : > { %v473_v57 = vmul.f32 %v5866_v50, %v5866_v50 }
  0xa2   : > { %v5879_v58 = vsub.f32 %v5748_v6, %v464_v55  ;;  %v5882_v59 = vsub.f32 %v5751_v7, %v464_v55  ;;  %v476_v60 = vmul.f32 %v5869_v53, %v5869_v53  ;;  %v477_v61 = vmul.f32 %v5872_v54, %v5872_v54  ;;  %v5237_v6 = vld [vmem:[%s7392_s3 + $0x2a4] ss:$24 sps:$4 sm:$0xff]   ;;  %v5239_v7 = vld [vmem:[%s7392_s3 + $0x2a0] ss:$24 sps:$4 sm:$0xff]  }
  0xa3   : > { %v478_v62 = vadd.f32 %v473_v57, %v472_v56  ;;  %1168 = vmatprep.subr.bf16.mxu0 %v5237_v6  ;;  %v512_v55 = vrot.slane %v448_v48, %v5987_v46  ;;  %v508_v56 = vrot.slane %v448_v48, %v5990_v47  ;;  %v5324_v48 = vld [vmem:[%s7392_s3 + $0x190] ss:$24 sps:$4 sm:$0xff]  }
  0xa4   : > { %v484_v63 = vsel %vm456_vm0, %v476_v60, 0.0  ;;  %v485_v0 = vsel %vm456_vm0, %v477_v61, 0.0  ;;  %v474_v1 = vmul.f32 %v5879_v58, %v5879_v58  ;;  %v475_v2 = vmul.f32 %v5882_v59, %v5882_v59  ;;  %1169 = vmatpush2.bf16.msra.mxu0 %v5239_v7 }
  0xa5   : > { %479 = vadd.xlane.f32.xlu1 %v478_v62  ;;  %v486_v3 = vadd.f32 %v485_v0, %v484_v63  ;;  %1170 = vmatprep.subr.bf16.mxu0 %v5243_v10  ;;  %v529_v62 = vrot.slane %v449_v52, %v5987_v46  ;;  %v525_v63 = vrot.slane %v449_v52, %v5990_v47  ;;  %v638_v52 = vld [vmem:[%s7393_s4] sm:$0x3f] }
  0xa6   : > { %v481_v4 = vadd.f32 %v475_v2, %v474_v1 }
  0xa8   : > { %482 = vadd.xlane.f32.xlu0 %v481_v4  ;;  %1171 = vmatpush2.bf16.msra.mxu0 %v5245_v11 }
  0xa9   : > { %487 = vadd.xlane.f32.xlu1 %v486_v3  ;;  %1172 = vmatprep.subr.bf16.mxu0 %v5249_v14 }
  0xac   : > { %1173 = vmatpush2.bf16.msra.mxu0 %v5251_v15  ;;  %v5282_v15 = vld [vmem:[%s7392_s3 + $0x130] ss:$24 sps:$4 sm:$0xff]  }
  0xad   : > { %1174 = vmatprep.subr.bf16.mxu0 %v5255_v18  ;;  %v5285_v18 = vld [vmem:[%s7392_s3 + $0x100] ss:$24 sps:$4 sm:$0xff]  }
  0xb0   : > { %1175 = vmatpush2.bf16.msra.mxu0 %v5257_v20  ;;  %v5290_v20 = vld [vmem:[%s7392_s3 + $0xd4] ss:$24 sps:$4 sm:$0xff]  }
  0xb1   : > { %1176 = vmatprep.subr.bf16.mxu0 %v5261_v22  ;;  %v5293_v22 = vld [vmem:[%s7392_s3 + $0xa4] ss:$24 sps:$4 sm:$0xff]  }
  0xb4   : > { %1177 = vmatpush2.bf16.msra.mxu0 %v5263_v24  ;;  %v5296_v24 = vld [vmem:[%s7392_s3 + $0x74] ss:$24 sps:$4 sm:$0xff]  }
  0xb5   : > { %1178 = vmatprep.subr.bf16.mxu0 %v5267_v26  ;;  %v5299_v26 = vld [vmem:[%s7392_s3 + $0x44] ss:$24 sps:$4 sm:$0xff]  }
  0xb8   : > { %1179 = vmatpush2.bf16.msra.mxu0 %v5269_v28  ;;  %v5302_v28 = vld [vmem:[%s7392_s3 + $0x14] ss:$24 sps:$4 sm:$0xff]  }
  0xb9   : > { %1180 = vmatprep.subr.bf16.mxu0 %v5273_v30  ;;  %v5305_v30 = vld [vmem:[%s7392_s3 + $0x2e4] ss:$24 sps:$4 sm:$0xff]  }
  0xbc   : > { %1181 = vmatpush2.bf16.msra.mxu0 %v5275_v32  ;;  %v5308_v32 = vld [vmem:[%s7392_s3 + $0x2b4] ss:$24 sps:$4 sm:$0xff]  }
  0xbd   : > { %1252 = vmatprep.subr.bf16.mxu0 %v5281_v34  ;;  %v5311_v34 = vld [vmem:[%s7392_s3 + $0x284] ss:$24 sps:$4 sm:$0xff]  }
 0x12e   : > { %v480_v35 = vpop.xlane.xlu1 %479 }
 0x12f   : > { %v489_v36 = vmul.f32 0.00390625, %v480_v35  ;;  %v5309_v35 = vld [vmem:[%s7392_s3 + $0x280] ss:$24 sps:$4 sm:$0xff]  }
 0x131   : > { %v492_v37 = vadd.f32 1e-05, %v489_v36  ;;  %v483_v38 = vpop.xlane.xlu0 %482  ;;  %v5314_v36 = vld [vmem:[%s7392_s3 + $0x254] ss:$24 sps:$4 sm:$0xff]  }
 0x132   : > { %v488_v39 = vpop.xlane.xlu1 %487  ;;  %v490_v40 = vmul.f32 0.00390625, %v483_v38  ;;  %v5317_v38 = vld [vmem:[%s7392_s3 + $0x224] ss:$24 sps:$4 sm:$0xff]  }
 0x133   : > { %5567 = vrsqrt.f32 %v492_v37  ;;  %v491_v41 = vmul.f32 0.00390625, %v488_v39  ;;  %v5312_v37 = vld [vmem:[%s7392_s3 + $0x250] ss:$24 sps:$4 sm:$0xff]   ;;  %v5315_v39 = vld [vmem:[%s7392_s3 + $0x220] ss:$24 sps:$4 sm:$0xff]  }
 0x134   : > { %v493_v42 = vadd.f32 1e-05, %v490_v40  ;;  %v5320_v40 = vld [vmem:[%s7392_s3 + $0x1f4] ss:$24 sps:$4 sm:$0xff]  }
 0x135   : > { %v494_v44 = vadd.f32 1e-05, %v491_v41  ;;  %v5318_v41 = vld [vmem:[%s7392_s3 + $0x1f0] ss:$24 sps:$4 sm:$0xff]  }
 0x136   : > { %5569 = vrsqrt.f32 %v493_v42  ;;  %v5323_v42 = vld [vmem:[%s7392_s3 + $0x1c4] ss:$24 sps:$4 sm:$0xff]  }
 0x137   : > { %5571 = vrsqrt.f32 %v494_v44  ;;  %v5326_v44 = vld [vmem:[%s7392_s3 + $0x194] ss:$24 sps:$4 sm:$0xff]  }
 0x140   : > { %v5568_v51 = vpop.eup %5567 }
 0x141   : > { %v499_v57 = vmul.f32 %v5568_v51, %v5866_v50  ;;  %v498_v60 = vmul.f32 %v5568_v51, %v5863_v49  ;;  %v5641_v51 = vmov 0  }
 0x143   : > { %v5570_v61 = vpop.eup %5569  ;;  %v516_v2 = vmul.f32 %v512_v55, %v499_v57  ;;  %v515_v4 = vmul.f32 %v508_v56, %v498_v60  ;;  %v643_v60 = vrot.slane %v638_v52, %v5990_v47 }
 0x144   : > { %v5572_v0 = vpop.eup %5571  ;;  %v501_v1 = vmul.f32 %v5570_v61, %v5882_v59  ;;  %v500_v3 = vmul.f32 %v5570_v61, %v5879_v58  ;;  %v5279_v59 = vld [vmem:[%s7392_s3 + $0x160] ss:$24 sps:$4 sm:$0xff]   ;;  %v650_v61 = vsub.s32 2, %v5984_v45 }
 0x145   : > { %v503_v5 = vmul.f32 %v5572_v0, %v5872_v54  ;;  %v502_v50 = vmul.f32 %v5572_v0, %v5869_v53  ;;  %v533_v49 = vadd.f32 %v529_v62, %v516_v2  ;;  %v532_v10 = vadd.f32 %v525_v63, %v515_v4  ;;  %v5284_v54 = vld [vmem:[%s7392_s3 + $0x134] ss:$24 sps:$4 sm:$0xff]  }
 0x146   : > { %v518_v6 = vmul.f32 %v512_v55, %v501_v1  ;;  %v517_v7 = vmul.f32 %v508_v56, %v500_v3 }
 0x147   : > { %v520_v8 = vmul.f32 %v512_v55, %v503_v5  ;;  %v519_v58 = vmul.f32 %v508_v56, %v502_v50  ;;  %v654_v55 = vsub.s32 3, %v5984_v45 }
 0x148   : > { %v535_v9 = vadd.f32 %v529_v62, %v518_v6  ;;  %v534_v11 = vadd.f32 %v525_v63, %v517_v7  ;;  %v651_v6 = vrot.slane %v638_v52, %v650_v61 }
 0x149   : > { %v537_v12 = vadd.f32 %v529_v62, %v520_v8  ;;  %v536_v17 = vadd.f32 %v525_v63, %v519_v58  ;;  %v6119_v62 = vrot.slane %v638_v52, %v5987_v46  ;;  %v6123_v1 = vrot.slane %v638_v52, %v654_v55 }
 0x14a   : > { %v539_v13 = vpack.c.bf16 %v535_v9, %v533_v49  ;;  %v6011_v14 = vpack.c.bf16 %v534_v11, %v532_v10 }
 0x14b   : > { %v6016_v53 = vpack.c.bf16 %v537_v12, %v537_v12  ;;  %v540_v19 = vpack.c.bf16 %v536_v17, %v536_v17 }
 0x14c   : > { %1182 = vmatprep.mubr.bf16.mxu0 %v539_v13  ;;  %1233 = vmatprep.mubr.bf16.mxu1 %v539_v13 }
 0x14d   : > { %1183 = vmatmul.mubr.bf16.vlgmr.msra.gmra.mxu0 %v6011_v14  ;;  %1234 = vmatmul.mubr.bf16.vlgmr.msra.gmra.mxu1 %v6011_v14 }
 0x14e   : > { %1253 = vmatpush1.bf16.msra.mxu0 %v5279_v59  ;;  %1192 = vmatprep.mubr.bf16.mxu0 %v6016_v53 }
 0x14f   : > { %1243 = vmatprep.mubr.bf16.mxu1 %v6016_v53  ;;  %1254 = vmatprep.subr.bf16.mxu0 %v5284_v54 }
 0x152   : > { %1255 = vmatpush1.bf16.msra.mxu0 %v5282_v15 }
 0x153   : > { %1256 = vmatprep.subr.bf16.mxu0 %v5287_v16 }
 0x155   : > { %1193 = vmatmul.mubr.bf16.gmra.mxu0 %v540_v19  ;;  %1244 = vmatmul.mubr.bf16.gmra.mxu1 %v540_v19 }
 0x156   : > { %1257 = vmatpush1.bf16.msra.mxu0 %v5285_v18  ;;  %1284 = vmatprep.mubr.bf16.mxu0 %v539_v13 }
 0x157   : > { %1258 = vmatprep.subr.bf16.mxu0 %v5290_v20 }
 0x15a   : > { %1259 = vmatpush1.bf16.msra.mxu0 %v5288_v21 }
 0x15b   : > { %1260 = vmatprep.subr.bf16.mxu0 %v5293_v22 }
 0x15e   : > { %1261 = vmatpush1.bf16.msra.mxu0 %v5291_v23 }
 0x15f   : > { %1262 = vmatprep.subr.bf16.mxu0 %v5296_v24 }
 0x162   : > { %1263 = vmatpush1.bf16.msra.mxu0 %v5294_v25 }
 0x163   : > { %1264 = vmatprep.subr.bf16.mxu0 %v5299_v26 }
 0x166   : > { %1265 = vmatpush1.bf16.msra.mxu0 %v5297_v27  ;;  %v662_v27 = vsub.s32 5, %v5984_v45 }
 0x167   : > { %1266 = vmatprep.subr.bf16.mxu0 %v5302_v28 }
 0x16a   : > { %1267 = vmatpush1.bf16.msra.mxu0 %v5300_v29 }
 0x16b   : > { %1268 = vmatprep.subr.bf16.mxu0 %v5305_v30  ;;  %v658_v30 = vsub.s32 4, %v5984_v45 }
 0x16e   : > { %1269 = vmatpush2.bf16.msra.mxu0 %v5303_v31  ;;  %v6163_v31 = vrot.slane %v638_v52, %v662_v27 }
 0x16f   : > { %1270 = vmatprep.subr.bf16.mxu0 %v5308_v32 }
 0x172   : > { %1271 = vmatpush2.bf16.msra.mxu0 %v5306_v33 }
 0x173   : > { %1272 = vmatprep.subr.bf16.mxu0 %v5311_v34  ;;  %v659_v34 = vrot.slane %v638_v52, %v658_v30 }
 0x176   : > { %1273 = vmatpush2.bf16.msra.mxu0 %v5309_v35 }
 0x177   : > { %1274 = vmatprep.subr.bf16.mxu0 %v5314_v36 }
 0x17a   : > { %1275 = vmatpush2.bf16.msra.mxu0 %v5312_v37 }
 0x17b   : > { %1276 = vmatprep.subr.bf16.mxu0 %v5317_v38 }
 0x17e   : > { %1277 = vmatpush2.bf16.msra.mxu0 %v5315_v39 }
 0x17f   : > { %1278 = vmatprep.subr.bf16.mxu0 %v5320_v40  ;;  %v6173_v40 = vsel %vm456_vm0, 65535, %v5641_v51 }
 0x182   : > { %1279 = vmatpush2.bf16.msra.mxu0 %v5318_v41 }
 0x183   : > { %1280 = vmatprep.subr.bf16.mxu0 %v5323_v42 }
 0x186   : > { %1281 = vmatpush2.bf16.msra.mxu0 %v5321_v43 }
 0x187   : > { %1282 = vmatprep.subr.bf16.mxu0 %v5326_v44 }
 0x18a   : > { %1283 = vmatpush2.bf16.msra.mxu0 %v5324_v48 }
 0x18d   : > { %1285 = vmatmul.mubr.bf16.vlgmr.msra.gmra.mxu0 %v6011_v14 }
 0x18e   : > { %1294 = vmatprep.mubr.bf16.mxu0 %v6016_v53 }
 0x195   : > { %1295 = vmatmul.mubr.bf16.gmra.mxu0 %v540_v19 }
 0x196   : > { %1862 = vmatprep.mubr.bf16.mxu0 %v5641_v51 }
 0x20d   : > { %v1184_v56 = vpop.f32.mrf.mxu0  ;;  %v1235_v57 = vpop.f32.mrf.mxu1 }
 0x20e   : > { %v1185_v4 = vadd.f32 %v1184_v56, %v643_v60  ;;  %v1236_v16 = vadd.f32 %v1235_v57, %v651_v6 }
 0x20f   : > { %v1186_v63 = vpop.f32.mrf.mxu0  ;;  %v1237_v0 = vpop.f32.mrf.mxu1 }
 0x210   : > { %v1187_v7 = vadd.f32 %v1186_v63, %v6119_v62  ;;  %v1238_v49 = vadd.f32 %v1237_v0, %v6123_v1 }
 0x211   : > { %v1188_v2 = vpop.f32.mrf.mxu0  ;;  %v1239_v3 = vpop.f32.mrf.mxu1 }
 0x212   : > { %v1189_v5 = vadd.f32 %v1188_v2, %v643_v60  ;;  %v1240_v59 = vadd.f32 %v1239_v3, %v651_v6 }
 0x213   : > { %v1190_v8 = vpop.f32.mrf.mxu0  ;;  %v1241_v50 = vpop.f32.mrf.mxu1 }
 0x214   : > { %v6129_v9 = vpack.c.bf16 %v1189_v5, %v1185_v4  ;;  %v1191_v10 = vadd.f32 %v1190_v8, %v6119_v62  ;;  %v1242_v11 = vadd.f32 %v1241_v50, %v6123_v1  ;;  %v6145_v20 = vpack.c.bf16 %v1240_v59, %v1236_v16 }
 0x215   : > { %v1194_v12 = vpop.f32.mrf.mxu0  ;;  %v1245_v13 = vpop.f32.mrf.mxu1 }
 0x216   : > { %v6133_v14 = vpack.c.bf16 %v1191_v10, %v1187_v7  ;;  %v6135_v54 = vpack.c.bf16 %v1242_v11, %v1238_v49  ;;  %v1246_v58 = vadd.f32 %v1245_v13, %v651_v6  ;;  %5104 = vmatprep.mubr.msk.bf16.mxu1 %vm1325_vm1, %v6129_v9  ;;  %v1333_v24 = vsel %vm1325_vm1, %v6145_v20, 0 }
 0x217   : > { %v6139_v53 = vpop.f32.mrf.mxu0  ;;  %v6141_v15 = vpop.f32.mrf.mxu1  ;;  %v1195_v25 = vadd.f32 %v1194_v12, %v643_v60 }
 0x218   : > { %v6143_v17 = vpack.c.bf16 %v1246_v58, %v1246_v58 }
 0x219   : > { %v1198_v18 = vpop.f32.mrf.mxu0  ;;  %v1249_v19 = vpop.f32.mrf.mxu1  ;;  %v6155_v26 = vpack.c.bf16 %v1195_v25, %v1195_v25  ;;  %v5329_v25 = vld [vmem:[%s7394_s5 + $0x34] ss:$8 sps:$4 sm:$0xff]  }
 0x21a   : > { %5164 = vmatprep.subr.msk.bf16.mxu1 %vm1325_vm1, %v6143_v17  ;;  %v1336_v21 = vsel %vm1325_vm1, %v6143_v17, 0 }
 0x21b   : > { %v1199_v22 = vpop.f32.mrf.mxu0  ;;  %v1250_v23 = vpop.f32.mrf.mxu1  ;;  %5101 = vmatpush3.bf16.xpose.msra.mxu1 %v1336_v21 }
 0x21c   : > { %5165 = vmatprep.subr.msk.bf16.mxu1 %vm1325_vm1, %v6145_v20 }
 0x223   : > { %5103 = vmatpush3.bf16.xpose.msra.mxu1 %v1333_v24 }
 0x22a   : > { %5105 = vmatmul.mubr.msk.bf16.vlgmr.msra.gmra.mxu1 %vm1325_vm1, %v6155_v26 }
 0x24d   : > { %v1286_v28 = vpop.f32.mrf.mxu0 }
 0x24e   : > { %v1287_v48 = vadd.f32 %v1286_v28, %v659_v34 }
 0x24f   : > { %v1288_v29 = vpop.f32.mrf.mxu0 }
 0x250   : > { %v1289_v35 = vadd.f32 %v1288_v29, %v6163_v31 }
 0x251   : > { %v1290_v32 = vpop.f32.mrf.mxu0 }
 0x252   : > { %v1291_v42 = vadd.f32 %v1290_v32, %v659_v34 }
 0x253   : > { %v1292_v33 = vpop.f32.mrf.mxu0 }
 0x254   : > { %v1293_v36 = vadd.f32 %v1292_v33, %v6163_v31  ;;  %v6181_v57 = vpack.c.bf16 %v1291_v42, %v1287_v48  ;;  %v5330_v42 = vld [vmem:[%s7394_s5 + $0x20] ss:$8 sps:$4 sm:$0xff]   ;;  %v5333_v48 = vld [vmem:[%s7394_s5 + $0x10] ss:$8 sps:$4 sm:$0xff]  }
 0x255   : > { %v1296_v37 = vpop.f32.mrf.mxu0 }
 0x256   : > { %v6169_v38 = vpack.c.bf16 %v1293_v36, %v1289_v35  ;;  %v1297_v39 = vadd.f32 %v1296_v37, %v659_v34 }
 0x257   : > { %v6175_v41 = vpop.f32.mrf.mxu0 }
 0x258   : > { %v6177_v43 = vpack.c.bf16 %v1297_v39, %v1297_v39  ;;  %v5332_v39 = vld [vmem:[%s7394_s5 + $0x24] ss:$8 sps:$4 sm:$0xff]  }
 0x259   : > { %v1300_v44 = vpop.f32.mrf.mxu0 }
 0x25a   : > { %v1437_v52 = vand.u32 %v6173_v40, %v6177_v43  ;;  %v5335_v44 = vld [vmem:[%s7394_s5 + $0x14] ss:$8 sps:$4 sm:$0xff]  }
 0x25b   : > { %v1301_v56 = vpop.f32.mrf.mxu0 }
 0x25c   : > { %5108 = vmatprep.subr.bf16.mxu1 %v1437_v52  ;;  %v5336_v56 = vld [vmem:[%s7394_s5] ss:$8 sps:$4 sm:$0xff]  }
 0x25d   : > { %5109 = vmatpush3.bf16.msra.mxu1 %v1437_v52  ;;  %v5338_v52 = vld [vmem:[%s7394_s5 + $0x4] ss:$8 sps:$4 sm:$0xff]  }
 0x25e   : > { %5110 = vmatprep.subr.bf16.mxu1 %v6181_v57 }
 0x261   : > { %5111 = vmatpush3.bf16.msra.mxu1 %v6181_v57 }
 0x262   : > { %1551 = vmatprep.subr.bf16.mxu1 %v5329_v25 }
 0x2ea   : > { %v5106_v60 = vpop.f32.mrf.mxu1 }
 0x2eb   : > { %v1388_v3 = vmul.f32 0.125, %v5106_v60 }
 0x2ec   : > { %v1372_v63 = vpop.f32.mrf.mxu1 }
 0x2ed   : > { %v1386_v0 = vmul.f32 0.125, %v1372_v63  ;;  %v1397_v7 = vsel %vm1396_vm3, %v1388_v3, -inf }
 0x2ee   : > { %v5107_v2 = vpop.f32.mrf.mxu1 }
 0x2ef   : > { %v1390_v4 = vsel %vm1389_vm2, %v1386_v0, -inf }
 0x2f0   : > { %1391 = vmax.xlane.f32.xlu0 %v1390_v4  ;;  %v1375_v5 = vpop.f32.mrf.mxu1 }
 0x2f1   : > { %v1387_v6 = vmul.f32 0.125, %v1375_v5 }
 0x2f3   : > { %v1393_v8 = vsel %vm1389_vm2, %v1387_v6, -inf }
 0x2f4   : > { %1398 = vmax.xlane.f32.xlu0 %v1397_v7  ;;  %1394 = vmax.xlane.f32.xlu1 %v1393_v8 }
 0x379   : > { %v1392_v50 = vpop.xlane.xlu0 %1391 }
 0x37a   : > { %v1400_v49 = vsub.f32 %v1386_v0, %v1392_v50 }
 0x37c   : > { %v1403_v10 = vmul.f32 1.442695, %v1400_v49 }
 0x37d   : > { %v1399_v11 = vpop.xlane.xlu0 %1398  ;;  %v1395_v12 = vpop.xlane.xlu1 %1394 }
 0x37e   : > { %5573 = vpow2.f32 %v1403_v10  ;;  %v1402_v13 = vsub.f32 %v1388_v3, %v1399_v11  ;;  %v1401_v59 = vsub.f32 %v1387_v6, %v1395_v12 }
 0x380   : > { %v1407_v58 = vmul.f32 1.442695, %v1402_v13  ;;  %v1405_v16 = vmul.f32 1.442695, %v1401_v59 }
 0x382   : > { %5575 = vpow2.f32 %v1407_v58 }
 0x383   : > { %5577 = vpow2.f32 %v1405_v16 }
 0x38b   : > { %v5574_v18 = vpop.eup %5573 }
 0x38c   : > { %v1409_v19 = vsel %vm1389_vm2, %v5574_v18, 0.0 }
 0x38d   : > { %1410 = vadd.xlane.f32.xlu1 %v1409_v19 }
 0x38f   : > { %v5576_v21 = vpop.eup %5575 }
 0x390   : > { %v5578_v22 = vpop.eup %5577  ;;  %v1415_v23 = vsel %vm1396_vm3, %v5576_v21, 0.0 }
 0x391   : > { %1416 = vadd.xlane.f32.xlu1 %v1415_v23  ;;  %v1412_v24 = vsel %vm1389_vm2, %v5578_v22, 0.0 }
 0x392   : > { %1413 = vadd.xlane.f32.xlu0 %v1412_v24 }
 0x3a2   : > { %1608 = vrot.lane.b32.xlu1 %v6145_v20, %s5642_s17 }
 0x3a6   : > { %1602 = vrot.lane.b32.xlu1 %v6129_v9, %s5642_s17 }
 0x3a8   : > { %1610 = vrot.lane.b32.xlu0 %v6143_v17, %s5642_s17 }
 0x3aa   : > { %1604 = vrot.lane.b32.xlu1 %v6155_v26, %s5642_s17  ;;  %v5327_v26 = vld [vmem:[%s7394_s5 + $0x30] ss:$8 sps:$4 sm:$0xff]  }
 0x416   : > { %v1411_v28 = vpop.xlane.xlu1 %1410 }
 0x417   : > { %5579 = vrcp.f32 %v1411_v28 }
 0x41a   : > { %v1417_v29 = vpop.xlane.xlu1 %1416 }
 0x41b   : > { %v1414_v32 = vpop.xlane.xlu0 %1413  ;;  %5581 = vrcp.f32 %v1417_v29 }
 0x41c   : > { %5583 = vrcp.f32 %v1414_v32 }
 0x41e   : > { %v1609_v6 = vpop.permute.xlu1 %1608 }
 0x41f   : > { %v1611_v60 = vpop.permute.xlu0 %1610  ;;  %v1619_v8 = vsel %vm1325_vm1, %v1609_v6, 0 }
 0x420   : > { %v1622_v5 = vsel %vm1325_vm1, %v1611_v60, 0 }
 0x422   : > { %v1603_v50 = vpop.permute.xlu1 %1602 }
 0x424   : > { %v5580_v20 = vpop.eup %5579 }
 0x425   : > { %v1421_v35 = vmul.f32 %v5580_v20, %v5574_v18 }
 0x426   : > { %v1605_v49 = vpop.permute.xlu1 %1604 }
 0x428   : > { %v5582_v33 = vpop.eup %5581 }
 0x429   : > { %v5584_v9 = vpop.eup %5583  ;;  %v1423_v34 = vmul.f32 %v5582_v33, %v5576_v21 }
 0x42a   : > { %v1422_v17 = vmul.f32 %v5584_v9, %v5578_v22 }
 0x42b   : > { %v1425_v36 = vpack.c.bf16 %v1423_v34, %v1423_v34 }
 0x42c   : > { %v1424_v37 = vpack.c.bf16 %v1422_v17, %v1421_v35 }
 0x42e   : > { %5112 = vmatprep.mubr.msk.bf16.mxu1 %vm1389_vm2, %v1424_v37 }
 0x42f   : > { %5113 = vmatmul.mubr.msk.bf16.vlgmr.msra.gmra.mxu1 %vm1389_vm2, %v1425_v36 }
 0x430   : > { %1552 = vmatpush1.bf16.msra.mxu1 %v5327_v26  ;;  %1575 = vmatprep.mubr.bf16.mxu1 %v5641_v51 }
 0x431   : > { %1553 = vmatprep.subr.bf16.mxu1 %v5332_v39 }
 0x434   : > { %1554 = vmatpush1.bf16.msra.mxu1 %v5330_v42 }
 0x435   : > { %1555 = vmatprep.subr.bf16.mxu1 %v5335_v44 }
 0x438   : > { %1556 = vmatpush1.bf16.msra.mxu1 %v5333_v48 }
 0x439   : > { %1557 = vmatprep.subr.bf16.mxu1 %v5338_v52 }
 0x43c   : > { %1558 = vmatpush1.bf16.msra.mxu1 %v5336_v56 }
 0x43d   : > { %5166 = vmatprep.subr.msk.bf16.mxu1 %vm1325_vm1, %v1611_v60 }
 0x4ef   : > { %v5114_v63 = vpop.f32.mrf.mxu1 }
 0x4f0   : > { %v1488_v7 = vpack.c.bf16 %v5114_v63, %v5114_v63  ;;  %v5339_v63 = vld [vmem:[%s7394_s5 + $0x70] ss:$8 sps:$4 sm:$0xff]  }
 0x4f1   : > { %v1473_v0 = vpop.f32.mrf.mxu1 }
 0x4f3   : > { %v5115_v2 = vpop.f32.mrf.mxu1 }
 0x4f4   : > { %v5344_v2 = vld [vmem:[%s7394_s5 + $0x64] ss:$8 sps:$4 sm:$0xff]  }
 0x4f5   : > { %v1476_v3 = vpop.f32.mrf.mxu1 }
 0x4f6   : > { %v1487_v4 = vpack.c.bf16 %v1476_v3, %v1473_v0  ;;  %v5341_v0 = vld [vmem:[%s7394_s5 + $0x74] ss:$8 sps:$4 sm:$0xff]  }
 0x4f7   : > { %1838 = vmatprep.subr.bf16.mxu0 %v5341_v0 }
 0x4f8   : > { %4766 = vmatmul.mubr.msk.bf16.vlgmr.msra.gmra.mxu1 %vm1325_vm1, %v1487_v4  ;;  %1839 = vmatpush1.bf16.msra.mxu0 %v5339_v63 }
 0x4f9   : > { %5117 = vmatpush3.bf16.xpose.msra.mxu1 %v1622_v5  ;;  %1585 = vmatprep.mubr.bf16.mxu1 %v5641_v51 }
 0x4fa   : > { %5167 = vmatprep.subr.msk.bf16.mxu1 %vm1325_vm1, %v1609_v6  ;;  %1840 = vmatprep.subr.bf16.mxu0 %v5344_v2 }
 0x500   : > { %4767 = vmatmul.mubr.msk.bf16.gmra.mxu1 %vm1325_vm1, %v1488_v7  ;;  %v1248_v7 = vadd.f32 %v6141_v15, %v6123_v1  ;;  %v1299_v1 = vadd.f32 %v6175_v41, %v6163_v31  ;;  %v1898_v31 = vsel %vm1325_vm1, %v6135_v54, 0  ;;  %v1197_v41 = vadd.f32 %v6139_v53, %v6119_v62  ;;  %v5348_v62 = vld [vmem:[%s7394_s5 + $0x40] ss:$8 sps:$4 sm:$0xff]   ;;  %v5350_v53 = vld [vmem:[%s7394_s5 + $0x44] ss:$8 sps:$4 sm:$0xff]  }
 0x501   : > { %5119 = vmatpush3.bf16.xpose.msra.mxu1 %v1619_v8  ;;  %5120 = vmatprep.mubr.msk.bf16.mxu1 %vm1325_vm1, %v1603_v50 }
 0x502   : > { %v6272_v50 = vpack.c.bf16 %v1248_v7, %v1248_v7 }
 0x504   : > { %v1901_v15 = vsel %vm1325_vm1, %v6272_v50, 0 }
 0x508   : > { %5121 = vmatmul.mubr.msk.bf16.vlgmr.msra.gmra.mxu1 %vm1325_vm1, %v1605_v49 }
 0x5b8   : > { %v6235_v10 = vpop.f32.mrf.mxu1 }
 0x5ba   : > { %v6237_v11 = vpop.f32.mrf.mxu1 }
 0x5bc   : > { %v6239_v12 = vpop.f32.mrf.mxu1 }
 0x5be   : > { %v6241_v13 = vpop.f32.mrf.mxu1 }
 0x5c0   : > { %v6243_v59 = vpop.f32.mrf.mxu1 }
 0x5c2   : > { %v6245_v58 = vpop.f32.mrf.mxu1 }
 0x5c4   : > { %v1591_v16 = vpop.f32.mrf.mxu1 }
 0x5c6   : > { %v1592_v18 = vpop.f32.mrf.mxu1 }
 0x5c8   : > { %v5122_v19 = vpop.f32.mrf.mxu1 }
 0x5c9   : > { %v1674_v24 = vmul.f32 0.125, %v5122_v19 }
 0x5ca   : > { %v1658_v21 = vpop.f32.mrf.mxu1 }
 0x5cb   : > { %v1672_v22 = vmul.f32 0.125, %v1658_v21  ;;  %v1681_v32 = vsel %vm1396_vm3, %v1674_v24, -inf }
 0x5cc   : > { %v5123_v23 = vpop.f32.mrf.mxu1 }
 0x5cd   : > { %v1675_v25 = vsel %vm1389_vm2, %v1672_v22, -inf }
 0x5ce   : > { %1676 = vmax.xlane.f32.xlu0 %v1675_v25  ;;  %v1661_v28 = vpop.f32.mrf.mxu1  ;;  %v6286_v25 = vpack.c.bf16 %v1299_v1, %v1299_v1  ;;  %v5627_v1 = vld [vmem:[%s5729_s30] sm:$0xff] }
 0x5cf   : > { %v1673_v29 = vmul.f32 0.125, %v1661_v28 }
 0x5d0   : > { %v1998_v28 = vand.u32 %v6286_v25, %v6173_v40 }
 0x5d1   : > { %v1678_v20 = vsel %vm1389_vm2, %v1673_v29, -inf }
 0x5d2   : > { %1682 = vmax.xlane.f32.xlu0 %v1681_v32  ;;  %1679 = vmax.xlane.f32.xlu1 %v1678_v20  ;;  %v5347_v32 = vld [vmem:[%s7394_s5 + $0x54] ss:$8 sps:$4 sm:$0xff]   ;;  %v5345_v20 = vld [vmem:[%s7394_s5 + $0x50] ss:$8 sps:$4 sm:$0xff]  }
 0x657   : > { %v1677_v33 = vpop.xlane.xlu0 %1676 }
 0x658   : > { %v1684_v9 = vsub.f32 %v1672_v22, %v1677_v33 }
 0x65a   : > { %v1687_v34 = vmul.f32 1.442695, %v1684_v9 }
 0x65b   : > { %v1683_v35 = vpop.xlane.xlu0 %1682  ;;  %v1680_v17 = vpop.xlane.xlu1 %1679 }
 0x65c   : > { %5585 = vpow2.f32 %v1687_v34  ;;  %v1686_v36 = vsub.f32 %v1674_v24, %v1683_v35  ;;  %v1685_v37 = vsub.f32 %v1673_v29, %v1680_v17  ;;  %v6294_v29 = vpack.c.bf16 %v1197_v41, %v1197_v41 }
 0x65e   : > { %v1691_v26 = vmul.f32 1.442695, %v1686_v36  ;;  %v1689_v39 = vmul.f32 1.442695, %v1685_v37 }
 0x660   : > { %5587 = vpow2.f32 %v1691_v26 }
 0x661   : > { %5589 = vpow2.f32 %v1689_v39 }
 0x669   : > { %v5586_v42 = vpop.eup %5585 }
 0x66a   : > { %v1693_v44 = vsel %vm1389_vm2, %v5586_v42, 0.0 }
 0x66b   : > { %1694 = vadd.xlane.f32.xlu0 %v1693_v44 }
 0x66d   : > { %v5588_v48 = vpop.eup %5587 }
 0x66e   : > { %v5590_v52 = vpop.eup %5589  ;;  %v1699_v56 = vsel %vm1396_vm3, %v5588_v48, 0.0 }
 0x66f   : > { %1700 = vadd.xlane.f32.xlu1 %v1699_v56  ;;  %v1696_v60 = vsel %vm1389_vm2, %v5590_v52, 0.0 }
 0x670   : > { %1697 = vadd.xlane.f32.xlu0 %v1696_v60 }
 0x680   : > { %1712 = vrot.lane.b32.xlu1 %v6181_v57, %s5642_s17  ;;  %v5342_v57 = vld [vmem:[%s7394_s5 + $0x60] ss:$8 sps:$4 sm:$0xff]  }
 0x681   : > { %1841 = vmatpush1.bf16.msra.mxu0 %v5342_v57 }
 0x682   : > { %1842 = vmatprep.subr.bf16.mxu0 %v5347_v32  ;;  %v5629_v32 = vld [vmem:[%s5729_s30 + $0x10] sm:$0xff] }
 0x685   : > { %1843 = vmatpush1.bf16.msra.mxu0 %v5345_v20 }
 0x686   : > { %1714 = vrot.lane.b32.xlu0 %v6177_v43, %s5642_s17  ;;  %1844 = vmatprep.subr.bf16.mxu0 %v5350_v53 }
 0x689   : > { %1845 = vmatpush1.bf16.msra.mxu0 %v5348_v62 }
 0x6f4   : > { %v1695_v43 = vpop.xlane.xlu0 %1694 }
 0x6f5   : > { %5591 = vrcp.f32 %v1695_v43 }
 0x6f8   : > { %v1701_v3 = vpop.xlane.xlu1 %1700 }
 0x6f9   : > { %v1698_v4 = vpop.xlane.xlu0 %1697  ;;  %5593 = vrcp.f32 %v1701_v3 }
 0x6fa   : > { %5595 = vrcp.f32 %v1698_v4 }
 0x6fc   : > { %v1713_v8 = vpop.permute.xlu1 %1712 }
 0x6fd   : > { %v1715_v5 = vpop.permute.xlu0 %1714 }
 0x6fe   : > { %v1724_v6 = vand.u32 %v1715_v5, %v6173_v40 }
 0x700   : > { %5124 = vmatprep.subr.bf16.mxu1 %v1724_v6 }
 0x701   : > { %5125 = vmatpush3.bf16.msra.mxu1 %v1724_v6 }
 0x702   : > { %5126 = vmatprep.subr.bf16.mxu1 %v1713_v8  ;;  %v5592_v49 = vpop.eup %5591 }
 0x703   : > { %v1705_v21 = vmul.f32 %v5592_v49, %v5586_v42 }
 0x705   : > { %5127 = vmatpush3.bf16.msra.mxu1 %v1713_v8 }
 0x706   : > { %v5594_v16 = vpop.eup %5593  ;;  %5168 = vmatprep.subr.msk.bf16.mxu1 %vm1325_vm1, %v6272_v50 }
 0x707   : > { %v5596_v18 = vpop.eup %5595  ;;  %v1707_v19 = vmul.f32 %v5594_v16, %v5588_v48 }
 0x708   : > { %v1706_v22 = vmul.f32 %v5596_v18, %v5590_v52 }
 0x709   : > { %v1709_v23 = vpack.c.bf16 %v1707_v19, %v1707_v19 }
 0x70a   : > { %v1708_v24 = vpack.c.bf16 %v1706_v22, %v1705_v21  ;;  %v1303_v22 = vld [vmem:[%s7395_s6] sm:$0x3] }
 0x70c   : > { %5128 = vmatprep.mubr.msk.bf16.mxu1 %vm1389_vm2, %v1708_v24  ;;  %v1312_v24 = vrot.slane %v1303_v22, %v5987_v46 }
 0x70d   : > { %5129 = vmatmul.mubr.msk.bf16.vlgmr.msra.gmra.mxu1 %vm1389_vm2, %v1709_v23  ;;  %v1308_v23 = vrot.slane %v1303_v22, %v5990_v47 }
 0x70e   : > { %5133 = vmatpush3.bf16.xpose.msra.mxu1 %v1901_v15  ;;  %5136 = vmatprep.mubr.msk.bf16.mxu1 %vm1325_vm1, %v6133_v14 }
 0x70f   : > { %5169 = vmatprep.subr.msk.bf16.mxu1 %vm1325_vm1, %v6135_v54  ;;  %v1315_v15 = vadd.f32 %v5627_v1, %v1308_v23  ;;  %v1317_v20 = vadd.f32 %v5629_v32, %v1308_v23 }
 0x711   : > { %v1594_v41 = vadd.f32 %v6235_v10, %v1315_v15  ;;  %v5357_v15 = vld [vmem:[%s7394_s5 + $0x90] ss:$8 sps:$4 sm:$0xff]  }
 0x716   : > { %5135 = vmatpush3.bf16.xpose.msra.mxu1 %v1898_v31 }
 0x717   : > { %5140 = vmatprep.subr.bf16.mxu1 %v1998_v28 }
 0x71d   : > { %5137 = vmatmul.mubr.msk.bf16.vlgmr.msra.gmra.mxu1 %vm1325_vm1, %v6294_v29 }
 0x71e   : > { %5141 = vmatpush3.bf16.msra.mxu1 %v1998_v28  ;;  %v5628_v28 = vld [vmem:[%s5729_s30 + $0x8] sm:$0xff] }
 0x71f   : > { %5142 = vmatprep.subr.bf16.mxu1 %v6169_v38  ;;  %v1316_v31 = vadd.f32 %v5628_v28, %v1312_v24  ;;  %v5360_v28 = vld [vmem:[%s7394_s5 + $0x80] ss:$8 sps:$4 sm:$0xff]  }
 0x721   : > { %v1595_v53 = vadd.f32 %v6237_v11, %v1316_v31  ;;  %v5362_v31 = vld [vmem:[%s7394_s5 + $0x84] ss:$8 sps:$4 sm:$0xff]  }
 0x722   : > { %5143 = vmatpush3.bf16.msra.mxu1 %v6169_v38 }
 0x7cd   : > { %v5130_v33 = vpop.f32.mrf.mxu1 }
 0x7ce   : > { %v1775_v36 = vpack.c.bf16 %v5130_v33, %v5130_v33  ;;  %v5630_v33 = vld [vmem:[%s5729_s30 + $0x18] sm:$0xff] }
 0x7cf   : > { %v1760_v9 = vpop.f32.mrf.mxu1 }
 0x7d1   : > { %v5131_v34 = vpop.f32.mrf.mxu1 }
 0x7d3   : > { %v1763_v35 = vpop.f32.mrf.mxu1 }
 0x7d4   : > { %v1774_v17 = vpack.c.bf16 %v1763_v35, %v1760_v9  ;;  %v1318_v9 = vadd.f32 %v5630_v33, %v1312_v24 }
 0x7d6   : > { %4780 = vmatmul.mubr.msk.bf16.vlgmr.msra.gmra.mxu0 %vm1325_vm1, %v1774_v17  ;;  %v1596_v17 = vadd.f32 %v6239_v12, %v1317_v20  ;;  %v1597_v11 = vadd.f32 %v6241_v13, %v1318_v9 }
 0x7d7   : > { %1872 = vmatprep.mubr.bf16.mxu0 %v5641_v51 }
 0x7dd   : > { %v5138_v37 = vpop.f32.mrf.mxu1 }
 0x7de   : > { %4781 = vmatmul.mubr.msk.bf16.gmra.mxu0 %vm1325_vm1, %v1775_v36  ;;  %v1953_v56 = vmul.f32 0.125, %v5138_v37  ;;  %v5631_v36 = vld [vmem:[%s5729_s30 + $0x20] sm:$0x1] }
 0x7df   : > { %v1937_v26 = vpop.f32.mrf.mxu1  ;;  %2136 = vmatprep.mubr.bf16.mxu0 %v5641_v51  ;;  %v1319_v37 = vadd.f32 %v5631_v36, %v1308_v23 }
 0x7e0   : > { %v1951_v39 = vmul.f32 0.125, %v1937_v26  ;;  %v1960_v63 = vsel %vm1396_vm3, %v1953_v56, -inf }
 0x7e1   : > { %v5139_v42 = vpop.f32.mrf.mxu1  ;;  %v1598_v12 = vadd.f32 %v6243_v59, %v1319_v37  ;;  %v5351_v59 = vld [vmem:[%s7394_s5 + $0xb0] ss:$8 sps:$4 sm:$0xff]  }
 0x7e2   : > { %v1954_v44 = vsel %vm1389_vm2, %v1951_v39, -inf }
 0x7e3   : > { %1955 = vmax.xlane.f32.xlu1 %v1954_v44  ;;  %v1940_v48 = vpop.f32.mrf.mxu1 }
 0x7e4   : > { %v1952_v52 = vmul.f32 0.125, %v1940_v48 }
 0x7e6   : > { %v1957_v60 = vsel %vm1389_vm2, %v1952_v52, -inf }
 0x7e7   : > { %1958 = vmax.xlane.f32.xlu0 %v1957_v60 }
 0x7eb   : > { %1961 = vmax.xlane.f32.xlu0 %v1960_v63 }
 0x86c   : > { %v1956_v0 = vpop.xlane.xlu1 %1955 }
 0x86d   : > { %v1963_v2 = vsub.f32 %v1951_v39, %v1956_v0  ;;  %v5632_v39 = vld [vmem:[%s5729_s30 + $0x28] sm:$0x1] }
 0x86e   : > { %v1320_v42 = vadd.f32 %v5632_v39, %v1312_v24 }
 0x86f   : > { %v1966_v57 = vmul.f32 1.442695, %v1963_v2 }
 0x870   : > { %v1959_v43 = vpop.xlane.xlu0 %1958 }
 0x871   : > { %5597 = vpow2.f32 %v1966_v57  ;;  %v1964_v3 = vsub.f32 %v1952_v52, %v1959_v43 }
 0x873   : > { %v1968_v4 = vmul.f32 1.442695, %v1964_v3 }
 0x874   : > { %v1962_v5 = vpop.xlane.xlu0 %1961 }
 0x875   : > { %5599 = vpow2.f32 %v1968_v4  ;;  %v1965_v6 = vsub.f32 %v1953_v56, %v1962_v5  ;;  %v1599_v56 = vadd.f32 %v6245_v58, %v1320_v42  ;;  %v5356_v58 = vld [vmem:[%s7394_s5 + $0xa4] ss:$8 sps:$4 sm:$0xff]  }
 0x877   : > { %v1970_v7 = vmul.f32 1.442695, %v1965_v6 }
 0x879   : > { %5601 = vpow2.f32 %v1970_v7 }
 0x87e   : > { %v6319_v8 = vpop.eup %5597 }
 0x87f   : > { %v1972_v49 = vsel %vm1389_vm2, %v6319_v8, 0.0 }
 0x880   : > { %1973 = vadd.xlane.f32.xlu1 %v1972_v49 }
 0x882   : > { %v6323_v16 = vpop.eup %5599 }
 0x883   : > { %v1975_v18 = vsel %vm1389_vm2, %v6323_v16, 0.0 }
 0x884   : > { %1976 = vadd.xlane.f32.xlu0 %v1975_v18 }
 0x886   : > { %v6327_v19 = vpop.eup %5601 }
 0x887   : > { %v1978_v21 = vsel %vm1396_vm3, %v6327_v19, 0.0 }
 0x888   : > { %1979 = vadd.xlane.f32.xlu1 %v1978_v21 }
 0x896   : > { %v1864_v62 = vpop.f32.mrf.mxu0 }
 0x897   : > { %v6342_v34 = vadd.f32 %v1864_v62, %v1594_v41 }
 0x898   : > { %v1866_v35 = vpop.f32.mrf.mxu0 }
 0x899   : > { %2169 = vrot.lane.b32.xlu1 %v6135_v54, %s5642_s17  ;;  %v6348_v26 = vadd.f32 %v1866_v35, %v1595_v53 }
 0x89a   : > { %2171 = vrot.lane.b32.xlu0 %v6272_v50, %s5642_s17  ;;  %v1868_v10 = vpop.f32.mrf.mxu0 }
 0x89b   : > { %v6354_v44 = vadd.f32 %v1868_v10, %v1596_v17 }
 0x89c   : > { %v1870_v48 = vpop.f32.mrf.mxu0 }
 0x89d   : > { %2163 = vrot.lane.b32.xlu1 %v6133_v14, %s5642_s17  ;;  %v6359_v52 = vadd.f32 %v1870_v48, %v1597_v11  ;;  %v5353_v14 = vld [vmem:[%s7394_s5 + $0xb4] ss:$8 sps:$4 sm:$0xff]  }
 0x89e   : > { %v1874_v54 = vpop.f32.mrf.mxu0  ;;  %2112 = vmatprep.subr.bf16.mxu0 %v5353_v14 }
 0x89f   : > { %v6362_v60 = vadd.f32 %v1874_v54, %v1598_v12  ;;  %2113 = vmatpush1.bf16.msra.mxu0 %v5351_v59 }
 0x8a0   : > { %v1876_v50 = vpop.f32.mrf.mxu0  ;;  %2114 = vmatprep.subr.bf16.mxu0 %v5356_v58 }
 0x8a1   : > { %2165 = vrot.lane.b32.xlu1 %v6294_v29, %s5642_s17  ;;  %v6366_v13 = vadd.f32 %v1876_v50, %v1599_v56  ;;  %v5354_v29 = vld [vmem:[%s7394_s5 + $0xa0] ss:$8 sps:$4 sm:$0xff]  }
 0x8a2   : > { %v1878_v63 = vpop.f32.mrf.mxu0 }
 0x8a3   : > { %2115 = vmatpush1.bf16.msra.mxu0 %v5354_v29 }
 0x8a4   : > { %v1879_v0 = vpop.f32.mrf.mxu0 }
 0x909   : > { %v1974_v2 = vpop.xlane.xlu1 %1973 }
 0x90a   : > { %5603 = vrcp.f32 %v1974_v2 }
 0x90d   : > { %v1977_v57 = vpop.xlane.xlu0 %1976 }
 0x90e   : > { %5605 = vrcp.f32 %v1977_v57 }
 0x911   : > { %v1980_v43 = vpop.xlane.xlu1 %1979  ;;  %v2172_v3 = vpop.permute.xlu0 %2171 }
 0x912   : > { %5607 = vrcp.f32 %v1980_v43  ;;  %5170 = vmatprep.subr.msk.bf16.mxu1 %vm1325_vm1, %v2172_v3  ;;  %v2183_v24 = vsel %vm1325_vm1, %v2172_v3, 0 }
 0x915   : > { %v2170_v49 = vpop.permute.xlu1 %2169 }
 0x917   : > { %v5604_v4 = vpop.eup %5603 }
 0x918   : > { %v1984_v6 = vmul.f32 %v5604_v4, %v6319_v8  ;;  %v2180_v8 = vsel %vm1325_vm1, %v2170_v49, 0 }
 0x919   : > { %v2164_v1 = vpop.permute.xlu1 %2163 }
 0x91b   : > { %v5606_v5 = vpop.eup %5605 }
 0x91c   : > { %v1985_v7 = vmul.f32 %v5606_v5, %v6323_v16 }
 0x91d   : > { %v2166_v16 = vpop.permute.xlu1 %2165 }
 0x91e   : > { %v1987_v18 = vpack.c.bf16 %v1985_v7, %v1984_v6 }
 0x91f   : > { %v5608_v21 = vpop.eup %5607 }
 0x920   : > { %5144 = vmatprep.mubr.msk.bf16.mxu1 %vm1389_vm2, %v1987_v18  ;;  %v1986_v22 = vmul.f32 %v5608_v21, %v6327_v19  ;;  %v5359_v19 = vld [vmem:[%s7394_s5 + $0x94] ss:$8 sps:$4 sm:$0xff]  }
 0x921   : > { %2116 = vmatprep.subr.bf16.mxu0 %v5359_v19 }
 0x922   : > { %v1988_v23 = vpack.c.bf16 %v1986_v22, %v1986_v22  ;;  %2117 = vmatpush1.bf16.msra.mxu0 %v5357_v15 }
 0x923   : > { %2118 = vmatprep.subr.bf16.mxu0 %v5362_v31 }
 0x924   : > { %5145 = vmatmul.mubr.msk.bf16.vlgmr.msra.gmra.mxu1 %vm1389_vm2, %v1988_v23 }
 0x925   : > { %5149 = vmatpush3.bf16.xpose.msra.mxu1 %v2183_v24  ;;  %5152 = vmatprep.mubr.msk.bf16.mxu1 %vm1325_vm1, %v2164_v1 }
 0x926   : > { %5171 = vmatprep.subr.msk.bf16.mxu1 %vm1325_vm1, %v2170_v49  ;;  %2119 = vmatpush1.bf16.msra.mxu0 %v5360_v28 }
 0x92d   : > { %5151 = vmatpush3.bf16.xpose.msra.mxu1 %v2180_v8 }
 0x934   : > { %5153 = vmatmul.mubr.msk.bf16.vlgmr.msra.gmra.mxu1 %vm1325_vm1, %v2166_v16 }
 0x935   : > { %2423 = vmatprep.mubr.bf16.mxu1 %v5641_v51 }
 0x9e4   : > { %v5146_v41 = vpop.f32.mrf.mxu1 }
 0x9e5   : > { %v2049_v33 = vpack.c.bf16 %v5146_v41, %v5146_v41 }
 0x9e6   : > { %v2034_v32 = vpop.f32.mrf.mxu1 }
 0x9e8   : > { %v5147_v20 = vpop.f32.mrf.mxu1 }
 0x9ea   : > { %v2037_v62 = vpop.f32.mrf.mxu1 }
 0x9eb   : > { %v2048_v53 = vpack.c.bf16 %v2037_v62, %v2034_v32 }
 0x9ed   : > { %4794 = vmatmul.mubr.msk.bf16.vlgmr.msra.gmra.mxu0 %vm1325_vm1, %v2048_v53 }
 0x9ee   : > { %2146 = vmatprep.mubr.bf16.mxu0 %v5641_v51 }
 0x9f4   : > { %v5154_v9 = vpop.f32.mrf.mxu1 }
 0x9f5   : > { %4795 = vmatmul.mubr.msk.bf16.gmra.mxu0 %vm1325_vm1, %v2049_v33  ;;  %v2235_v37 = vmul.f32 0.125, %v5154_v9 }
 0x9f6   : > { %v2219_v35 = vpop.f32.mrf.mxu1 }
 0x9f7   : > { %v2233_v17 = vmul.f32 0.125, %v2219_v35  ;;  %v2242_v42 = vsel %vm1396_vm3, %v2235_v37, -inf }
 0x9f8   : > { %v5155_v36 = vpop.f32.mrf.mxu1 }
 0x9f9   : > { %v2236_v10 = vsel %vm1389_vm2, %v2233_v17, -inf  ;;  %v5374_v36 = vld [vmem:[%s7394_s5 + $0xc4] ss:$8 sps:$4 sm:$0xff]  }
 0x9fa   : > { %2237 = vmax.xlane.f32.xlu0 %v2236_v10  ;;  %v2222_v11 = vpop.f32.mrf.mxu1 }
 0x9fb   : > { %v2234_v39 = vmul.f32 0.125, %v2222_v11 }
 0x9fd   : > { %v2239_v48 = vsel %vm1389_vm2, %v2234_v39, -inf }
 0x9fe   : > { %2243 = vmax.xlane.f32.xlu0 %v2242_v42  ;;  %2240 = vmax.xlane.f32.xlu1 %v2239_v48 }
 0xa83   : > { %v2238_v12 = vpop.xlane.xlu0 %2237 }
 0xa84   : > { %v2245_v54 = vsub.f32 %v2233_v17, %v2238_v12  ;;  %v5369_v17 = vld [vmem:[%s7394_s5 + $0xd0] ss:$8 sps:$4 sm:$0xff]  }
 0xa86   : > { %v2248_v56 = vmul.f32 1.442695, %v2245_v54 }
 0xa87   : > { %v2244_v50 = vpop.xlane.xlu0 %2243  ;;  %v2241_v63 = vpop.xlane.xlu1 %2240 }
 0xa88   : > { %5609 = vpow2.f32 %v2248_v56  ;;  %v2247_v0 = vsub.f32 %v2235_v37, %v2244_v50  ;;  %v2246_v59 = vsub.f32 %v2234_v39, %v2241_v63  ;;  %v5372_v37 = vld [vmem:[%s7394_s5 + $0xc0] ss:$8 sps:$4 sm:$0xff]  }
 0xa8a   : > { %v2252_v14 = vmul.f32 1.442695, %v2247_v0  ;;  %v2250_v58 = vmul.f32 1.442695, %v2246_v59 }
 0xa8c   : > { %5611 = vpow2.f32 %v2252_v14 }
 0xa8d   : > { %5613 = vpow2.f32 %v2250_v58 }
 0xa95   : > { %v5610_v29 = vpop.eup %5609 }
 0xa96   : > { %v2254_v2 = vsel %vm1389_vm2, %v5610_v29, 0.0 }
 0xa97   : > { %2255 = vadd.xlane.f32.xlu0 %v2254_v2 }
 0xa99   : > { %v5612_v57 = vpop.eup %5611 }
 0xa9a   : > { %v5614_v43 = vpop.eup %5613  ;;  %v2260_v3 = vsel %vm1396_vm3, %v5612_v57, 0.0 }
 0xa9b   : > { %2261 = vadd.xlane.f32.xlu1 %v2260_v3  ;;  %v2257_v4 = vsel %vm1389_vm2, %v5614_v43, 0.0 }
 0xa9c   : > { %2258 = vadd.xlane.f32.xlu0 %v2257_v4 }
 0xaac   : > { %2273 = vrot.lane.b32.xlu1 %v6169_v38, %s5642_s17 }
 0xaad   : > { %v2138_v5 = vpop.f32.mrf.mxu0 }
 0xaae   : > { %v6416_v6 = vadd.f32 %v2138_v5, %v6342_v34 }
 0xaaf   : > { %v2140_v7 = vpop.f32.mrf.mxu0 }
 0xab0   : > { %v6419_v49 = vadd.f32 %v2140_v7, %v6348_v26 }
 0xab1   : > { %v2142_v18 = vpop.f32.mrf.mxu0 }
 0xab2   : > { %2275 = vrot.lane.b32.xlu0 %v6286_v25, %s5642_s17  ;;  %v6424_v21 = vadd.f32 %v2142_v18, %v6354_v44  ;;  %v5363_v25 = vld [vmem:[%s7394_s5 + $0xf0] ss:$8 sps:$4 sm:$0xff]   ;;  %v5365_v44 = vld [vmem:[%s7394_s5 + $0xf4] ss:$8 sps:$4 sm:$0xff]   ;;  %v2596_v18 = vld [vmem:[%s7398_s9 + $0x1c0] sm:$0xff] }
 0xab3   : > { %v2144_v22 = vpop.f32.mrf.mxu0  ;;  %2399 = vmatprep.subr.bf16.mxu1 %v5365_v44 }
 0xab4   : > { %v6427_v23 = vadd.f32 %v2144_v22, %v6359_v52  ;;  %v5368_v52 = vld [vmem:[%s7394_s5 + $0xe4] ss:$8 sps:$4 sm:$0xff]   ;;  %2400 = vmatpush1.bf16.msra.mxu1 %v5363_v25 }
 0xab5   : > { %v2148_v38 = vpop.f32.mrf.mxu0  ;;  %2401 = vmatprep.subr.bf16.mxu1 %v5368_v52  ;;  %v2597_v22 = vld [vmem:[%s7398_s9 + $0x1c8] sm:$0xff] }
 0xab6   : > { %v6430_v24 = vadd.f32 %v2148_v38, %v6362_v60  ;;  %v5366_v60 = vld [vmem:[%s7394_s5 + $0xe0] ss:$8 sps:$4 sm:$0xff]  }
 0xab7   : > { %v2150_v34 = vpop.f32.mrf.mxu0  ;;  %v2589_v52 = vld [vmem:[%s7398_s9 + $0x188] sm:$0xff] }
 0xab8   : > { %v6433_v1 = vadd.f32 %v2150_v34, %v6366_v13  ;;  %2402 = vmatpush1.bf16.msra.mxu1 %v5366_v60  ;;  %v2588_v34 = vld [vmem:[%s7398_s9 + $0x180] sm:$0xff] }
 0xab9   : > { %v2152_v26 = vpop.f32.mrf.mxu0  ;;  %v2580_v60 = vld [vmem:[%s7398_s9 + $0x140] sm:$0xff] }
 0xabb   : > { %v2153_v8 = vpop.f32.mrf.mxu0 }
 0xabc   : > { %v2593_v8 = vld [vmem:[%s7398_s9 + $0x1a8] sm:$0xff] }
 0xb20   : > { %v2256_v13 = vpop.xlane.xlu0 %2255 }
 0xb21   : > { %5615 = vrcp.f32 %v2256_v13  ;;  %v4861_v13 = vcombine.high %v2589_v52, %v2593_v8 }
 0xb24   : > { %v2262_v16 = vpop.xlane.xlu1 %2261 }
 0xb25   : > { %v2259_v19 = vpop.xlane.xlu0 %2258  ;;  %5617 = vrcp.f32 %v2262_v16  ;;  %v2584_v16 = vld [vmem:[%s7398_s9 + $0x160] sm:$0xff] }
 0xb26   : > { %5619 = vrcp.f32 %v2259_v19  ;;  %v2581_v19 = vld [vmem:[%s7398_s9 + $0x148] sm:$0xff] }
 0xb28   : > { %v2274_v31 = vpop.permute.xlu1 %2273 }
 0xb29   : > { %v2276_v15 = vpop.permute.xlu0 %2275 }
 0xb2a   : > { %v2285_v28 = vand.u32 %v2276_v15, %v6173_v40  ;;  %v5371_v40 = vld [vmem:[%s7394_s5 + $0xd4] ss:$8 sps:$4 sm:$0xff]   ;;  %v2585_v15 = vld [vmem:[%s7398_s9 + $0x168] sm:$0xff] }
 0xb2b   : > { %2403 = vmatprep.subr.bf16.mxu1 %v5371_v40 }
 0xb2c   : > { %5156 = vmatprep.subr.bf16.mxu0 %v2285_v28  ;;  %2404 = vmatpush1.bf16.msra.mxu1 %v5369_v17 }
 0xb2d   : > { %5157 = vmatpush3.bf16.msra.mxu0 %v2285_v28  ;;  %2405 = vmatprep.subr.bf16.mxu1 %v5374_v36  ;;  %v2564_v36 = vld [vmem:[%s7398_s9 + $0xc0] sm:$0xff] }
 0xb2e   : > { %5158 = vmatprep.subr.bf16.mxu0 %v2274_v31  ;;  %v5616_v41 = vpop.eup %5615 }
 0xb2f   : > { %v2266_v53 = vmul.f32 %v5616_v41, %v5610_v29  ;;  %v4851_v41 = vcombine.high %v2580_v60, %v2584_v16 }
 0xb30   : > { %2406 = vmatpush1.bf16.msra.mxu1 %v5372_v37  ;;  %v2568_v37 = vld [vmem:[%s7398_s9 + $0xe0] sm:$0xff] }
 0xb31   : > { %5159 = vmatpush3.bf16.msra.mxu0 %v2274_v31  ;;  %v4860_v31 = vcombine.low %v2589_v52, %v2593_v8  ;;  %v2660_v52 = vld [vmem:[%s7398_s9 + $0x3c0] sm:$0xff] }
 0xb32   : > { %v5618_v32 = vpop.eup %5617  ;;  %v2664_v8 = vld [vmem:[%s7398_s9 + $0x3e0] sm:$0xff] }
 0xb33   : > { %v5620_v20 = vpop.eup %5619  ;;  %v2268_v62 = vmul.f32 %v5618_v32, %v5612_v57  ;;  %v4853_v32 = vcombine.high %v2581_v19, %v2585_v15 }
 0xb34   : > { %v2267_v33 = vmul.f32 %v5620_v20, %v5614_v43  ;;  %v2572_v20 = vld [vmem:[%s7398_s9 + $0x100] sm:$0xff] }
 0xb35   : > { %v2270_v9 = vpack.c.bf16 %v2268_v62, %v2268_v62  ;;  %v2576_v62 = vld [vmem:[%s7398_s9 + $0x120] sm:$0xff] }
 0xb36   : > { %v2269_v35 = vpack.c.bf16 %v2267_v33, %v2266_v53  ;;  %v2573_v53 = vld [vmem:[%s7398_s9 + $0x108] sm:$0xff]  ;;  %v4843_v40 = vcombine.high %v2572_v20, %v2576_v62 }
 0xb37   : > { %v2577_v33 = vld [vmem:[%s7398_s9 + $0x128] sm:$0xff] }
 0xb38   : > { %5160 = vmatprep.mubr.msk.bf16.mxu0 %vm1389_vm2, %v2269_v35  ;;  %v4852_v35 = vcombine.low %v2581_v19, %v2585_v15  ;;  %v4845_v17 = vcombine.high %v2573_v53, %v2577_v33  ;;  %v4931_v15 = vcombine.high %v2660_v52, %v2664_v8 }
 0xb39   : > { %5161 = vmatmul.mubr.msk.bf16.vlgmr.msra.gmra.mxu0 %vm1389_vm2, %v2270_v9  ;;  %v4850_v9 = vcombine.low %v2580_v60, %v2584_v16  ;;  %v2661_v60 = vld [vmem:[%s7398_s9 + $0x3c8] sm:$0xff] }
 0xbf9   : > { %v5162_v10 = vpop.f32.mrf.mxu0 }
 0xbfa   : > { %v2336_v12 = vpack.c.bf16 %v5162_v10, %v5162_v10  ;;  %v2565_v10 = vld [vmem:[%s7398_s9 + $0xc8] sm:$0xff] }
 0xbfb   : > { %v2321_v11 = vpop.f32.mrf.mxu0 }
 0xbfd   : > { %v5163_v39 = vpop.f32.mrf.mxu0 }
 0xbfe   : > { %v4842_v39 = vcombine.low %v2572_v20, %v2576_v62 }
 0xbff   : > { %v2324_v42 = vpop.f32.mrf.mxu0 }
 0xc00   : > { %v2335_v48 = vpack.c.bf16 %v2324_v42, %v2321_v11  ;;  %v2569_v11 = vld [vmem:[%s7398_s9 + $0xe8] sm:$0xff]  ;;  %v4844_v42 = vcombine.low %v2573_v53, %v2577_v33 }
 0xc02   : > { %4808 = vmatmul.mubr.msk.bf16.vlgmr.msra.gmra.mxu1 %vm1325_vm1, %v2335_v48  ;;  %v4835_v48 = vcombine.high %v2564_v36, %v2568_v37 }
 0xc03   : > { %2433 = vmatprep.mubr.bf16.mxu1 %v5641_v51 }
 0xc0a   : > { %4809 = vmatmul.mubr.msk.bf16.gmra.mxu1 %vm1325_vm1, %v2336_v12  ;;  %v4837_v12 = vcombine.high %v2565_v10, %v2569_v11 }
 0xcc2   : > { %v2425_v54 = vpop.f32.mrf.mxu1 }
 0xcc3   : > { %v6466_v50 = vadd.f32 %v2425_v54, %v6416_v6  ;;  %v2556_v54 = vld [vmem:[%s7398_s9 + $0x80] sm:$0xff] }
 0xcc4   : > { %v2427_v56 = vpop.f32.mrf.mxu1 }
 0xcc5   : > { %v6469_v63 = vadd.f32 %v2427_v56, %v6419_v49  ;;  %v2560_v56 = vld [vmem:[%s7398_s9 + $0xa0] sm:$0xff] }
 0xcc6   : > { %v2429_v0 = vpop.f32.mrf.mxu1 }
 0xcc7   : > { %v2450_v59 = vadd.f32 %v6469_v63, %v6466_v50  ;;  %v6474_v58 = vadd.f32 %v2429_v0, %v6424_v21  ;;  %v2600_v21 = vld [vmem:[%s7398_s9 + $0x1e0] sm:$0xff]  ;;  %v2557_v0 = vld [vmem:[%s7398_s9 + $0x88] sm:$0xff] }
 0xcc8   : > { %v2431_v14 = vpop.f32.mrf.mxu1  ;;  %v4867_v38 = vcombine.high %v2596_v18, %v2600_v21 }
 0xcc9   : > { %v6477_v51 = vadd.f32 %v2431_v14, %v6427_v23  ;;  %2451 = vadd.xlane.f32.xlu1 %v2450_v59  ;;  %v4866_v23 = vcombine.low %v2596_v18, %v2600_v21  ;;  %v2561_v59 = vld [vmem:[%s7398_s9 + $0xa8] sm:$0xff]  ;;  %v4834_v14 = vcombine.low %v2564_v36, %v2568_v37 }
 0xcca   : > { %v2435_v29 = vpop.f32.mrf.mxu1  ;;  %3350 = vmatprep.subr.bf16.mxu0 %v4867_v38  ;;  %v4828_v18 = vcombine.low %v2557_v0, %v2561_v59  ;;  %v2544_v38 = vld [vmem:[%s7398_s9 + $0x20] sm:$0xff] }
 0xccb   : > { %v6480_v2 = vadd.f32 %v2435_v29, %v6430_v24  ;;  %v2453_v57 = vadd.f32 %v6477_v51, %v6474_v58  ;;  %v2601_v24 = vld [vmem:[%s7398_s9 + $0x1e8] sm:$0xff]  ;;  %3351 = vmatpush1.bf16.msra.mxu0 %v4866_v23  ;;  %v4836_v29 = vcombine.low %v2565_v10, %v2569_v11  ;;  %v2540_v23 = vld [vmem:[%s7398_s9] sm:$0xff] }
 0xccc   : > { %v2437_v43 = vpop.f32.mrf.mxu1  ;;  %v4868_v26 = vcombine.low %v2597_v22, %v2601_v24  ;;  %v4869_v25 = vcombine.high %v2597_v22, %v2601_v24  ;;  %v2541_v24 = vld [vmem:[%s7398_s9 + $0x8] sm:$0xff]  ;;  %v4810_v16 = vcombine.low %v2540_v23, %v2544_v38 }
 0xccd   : > { %v6485_v3 = vadd.f32 %v2437_v43, %v6433_v1  ;;  %2454 = vadd.xlane.f32.xlu0 %v2453_v57  ;;  %v2456_v5 = vsel %vm456_vm0, %v6480_v2, 0.0  ;;  %v2592_v1 = vld [vmem:[%s7398_s9 + $0x1a0] sm:$0xff]  ;;  %v4827_v57 = vcombine.high %v2556_v54, %v2560_v56  ;;  %v4829_v43 = vcombine.high %v2557_v0, %v2561_v59 }
 0xcce   : > { %v2439_v4 = vpop.f32.mrf.mxu1  ;;  %v4859_v44 = vcombine.high %v2588_v34, %v2592_v1  ;;  %3401 = vmatprep.subr.bf16.mxu1 %v4869_v25  ;;  %v4858_v28 = vcombine.low %v2588_v34, %v2592_v1  ;;  %v2545_v34 = vld [vmem:[%s7398_s9 + $0x28] sm:$0xff]  ;;  %v4811_v25 = vcombine.high %v2540_v23, %v2544_v38 }
 0xccf   : > { %v2457_v6 = vsel %vm456_vm0, %v6485_v3, 0.0  ;;  %3402 = vmatpush1.bf16.msra.mxu1 %v4868_v26  ;;  %v2548_v4 = vld [vmem:[%s7398_s9 + $0x40] sm:$0xff]  ;;  %v4812_v19 = vcombine.low %v2541_v24, %v2545_v34  ;;  %v2645_v23 = vld [vmem:[%s7398_s9 + $0x348] sm:$0xff] }
 0xcd0   : > { %v2440_v7 = vpop.f32.mrf.mxu1  ;;  %v2458_v49 = vadd.f32 %v2457_v6, %v2456_v5  ;;  %3352 = vmatprep.subr.bf16.mxu0 %v4859_v44  ;;  %3403 = vmatprep.subr.bf16.mxu1 %v4861_v13  ;;  %v2552_v5 = vld [vmem:[%s7398_s9 + $0x60] sm:$0xff]  ;;  %v2549_v6 = vld [vmem:[%s7398_s9 + $0x48] sm:$0xff]  ;;  %v4813_v44 = vcombine.high %v2541_v24, %v2545_v34 }
 0xcd1   : > { %3353 = vmatpush1.bf16.msra.mxu0 %v4858_v28  ;;  %v2553_v7 = vld [vmem:[%s7398_s9 + $0x68] sm:$0xff]  ;;  %v4819_v21 = vcombine.high %v2548_v4, %v2552_v5  ;;  %v4818_v1 = vcombine.low %v2548_v4, %v2552_v5 }
 0xcd2   : > { %2459 = vadd.xlane.f32.xlu0 %v2458_v49  ;;  %3354 = vmatprep.subr.bf16.mxu0 %v4851_v41  ;;  %v4826_v49 = vcombine.low %v2556_v54, %v2560_v56  ;;  %v4821_v22 = vcombine.high %v2549_v6, %v2553_v7  ;;  %v4820_v26 = vcombine.low %v2549_v6, %v2553_v7  ;;  %v2665_v13 = vld [vmem:[%s7398_s9 + $0x3e8] sm:$0xff] }
 0xcd3   : > { %3404 = vmatpush1.bf16.msra.mxu1 %v4860_v31  ;;  %v4933_v28 = vcombine.high %v2661_v60, %v2665_v13  ;;  %v4930_v31 = vcombine.low %v2660_v52, %v2664_v8  ;;  %v4932_v41 = vcombine.low %v2661_v60, %v2665_v13  ;;  %v2653_v4 = vld [vmem:[%s7398_s9 + $0x388] sm:$0xff] }
 0xcd4   : > { %3405 = vmatprep.subr.bf16.mxu1 %v4853_v32  ;;  %v2657_v6 = vld [vmem:[%s7398_s9 + $0x3a8] sm:$0xff] }
 0xcd5   : > { %3355 = vmatpush1.bf16.msra.mxu0 %v4850_v9  ;;  %v2649_v24 = vld [vmem:[%s7398_s9 + $0x368] sm:$0xff] }
 0xcd6   : > { %3356 = vmatprep.subr.bf16.mxu0 %v4843_v40  ;;  %v2637_v52 = vld [vmem:[%s7398_s9 + $0x308] sm:$0xff] }
 0xcd7   : > { %3406 = vmatpush1.bf16.msra.mxu1 %v4852_v35  ;;  %v2641_v60 = vld [vmem:[%s7398_s9 + $0x328] sm:$0xff] }
 0xcd8   : > { %3407 = vmatprep.subr.bf16.mxu1 %v4845_v17 }
 0xcd9   : > { %3357 = vmatpush1.bf16.msra.mxu0 %v4842_v39 }
 0xcda   : > { %3358 = vmatprep.subr.bf16.mxu0 %v4835_v48 }
 0xcdb   : > { %3408 = vmatpush1.bf16.msra.mxu1 %v4844_v42 }
 0xcdc   : > { %3409 = vmatprep.subr.bf16.mxu1 %v4837_v12 }
 0xcdd   : > { %3359 = vmatpush1.bf16.msra.mxu0 %v4834_v14 }
 0xcde   : > { %3360 = vmatprep.subr.bf16.mxu0 %v4827_v57  ;;  %v2652_v57 = vld [vmem:[%s7398_s9 + $0x380] sm:$0xff] }
 0xcdf   : > { %3410 = vmatpush1.bf16.msra.mxu1 %v4836_v29 }
 0xce0   : > { %3411 = vmatprep.subr.bf16.mxu1 %v4829_v43  ;;  %v2656_v43 = vld [vmem:[%s7398_s9 + $0x3a0] sm:$0xff] }
 0xce1   : > { %3361 = vmatpush1.bf16.msra.mxu0 %v4826_v49  ;;  %v4923_v5 = vcombine.high %v2652_v57, %v2656_v43  ;;  %v4922_v7 = vcombine.low %v2652_v57, %v2656_v43  ;;  %v4924_v49 = vcombine.low %v2653_v4, %v2657_v6  ;;  %v2604_v43 = vld [vmem:[%s7398_s9 + $0x200] sm:$0xff] }
 0xce2   : > { %3362 = vmatprep.subr.bf16.mxu0 %v4819_v21  ;;  %v2644_v21 = vld [vmem:[%s7398_s9 + $0x340] sm:$0xff] }
 0xce3   : > { %3412 = vmatpush1.bf16.msra.mxu1 %v4828_v18  ;;  %v4925_v18 = vcombine.high %v2653_v4, %v2657_v6  ;;  %v2608_v4 = vld [vmem:[%s7398_s9 + $0x220] sm:$0xff]  ;;  %v2609_v6 = vld [vmem:[%s7398_s9 + $0x228] sm:$0xff] }
 0xce4   : > { %3413 = vmatprep.subr.bf16.mxu1 %v4821_v22  ;;  %v2648_v22 = vld [vmem:[%s7398_s9 + $0x360] sm:$0xff] }
 0xce5   : > { %3363 = vmatpush1.bf16.msra.mxu0 %v4818_v1  ;;  %v4915_v38 = vcombine.high %v2644_v21, %v2648_v22  ;;  %v4914_v34 = vcombine.low %v2644_v21, %v2648_v22  ;;  %v4916_v1 = vcombine.low %v2645_v23, %v2649_v24  ;;  %v4874_v22 = vcombine.low %v2604_v43, %v2608_v4 }
 0xce6   : > { %3364 = vmatprep.subr.bf16.mxu0 %v4811_v25  ;;  %v2636_v25 = vld [vmem:[%s7398_s9 + $0x300] sm:$0xff] }
 0xce7   : > { %3414 = vmatpush1.bf16.msra.mxu1 %v4820_v26  ;;  %v4917_v26 = vcombine.high %v2645_v23, %v2649_v24  ;;  %v6723_v24 = vld [vmem:[%s7398_s9 + $0x1f0] sm:$0xff] }
 0xce8   : > { %3415 = vmatprep.subr.bf16.mxu1 %v4813_v44  ;;  %v2640_v44 = vld [vmem:[%s7398_s9 + $0x320] sm:$0xff] }
 0xce9   : > { %3365 = vmatpush1.bf16.msra.mxu0 %v4810_v16  ;;  %v4907_v8 = vcombine.high %v2636_v25, %v2640_v44  ;;  %v4906_v13 = vcombine.low %v2636_v25, %v2640_v44  ;;  %v4908_v16 = vcombine.low %v2637_v52, %v2641_v60 }
 0xcea   : > { %3366 = vmatprep.subr.bf16.mxu0 %v4931_v15  ;;  %v2628_v15 = vld [vmem:[%s7398_s9 + $0x2c0] sm:$0xff] }
 0xceb   : > { %3416 = vmatpush1.bf16.msra.mxu1 %v4812_v19  ;;  %v4909_v19 = vcombine.high %v2637_v52, %v2641_v60 }
 0xcec   : > { %3417 = vmatprep.subr.bf16.mxu1 %v4933_v28  ;;  %v2632_v28 = vld [vmem:[%s7398_s9 + $0x2e0] sm:$0xff] }
 0xced   : > { %3367 = vmatpush2.bf16.msra.mxu0 %v4930_v31  ;;  %v2629_v31 = vld [vmem:[%s7398_s9 + $0x2c8] sm:$0xff] }
 0xcee   : > { %3368 = vmatprep.subr.bf16.mxu0 %v4923_v5  ;;  %v2605_v5 = vld [vmem:[%s7398_s9 + $0x208] sm:$0xff] }
 0xcef   : > { %3418 = vmatpush2.bf16.msra.mxu1 %v4932_v41  ;;  %v4899_v41 = vcombine.high %v2628_v15, %v2632_v28  ;;  %v4877_v21 = vcombine.high %v2605_v5, %v2609_v6  ;;  %v4876_v23 = vcombine.low %v2605_v5, %v2609_v6 }
 0xcf0   : > { %3419 = vmatprep.subr.bf16.mxu1 %v4925_v18  ;;  %v4875_v18 = vcombine.high %v2604_v43, %v2608_v4  ;;  %v2594_v4 = vld [vmem:[%s7398_s9 + $0x1b0] sm:$0xff] }
 0xcf1   : > { %3369 = vmatpush2.bf16.msra.mxu0 %v4922_v7 }
 0xcf2   : > { %3370 = vmatprep.subr.bf16.mxu0 %v4915_v38  ;;  %v6718_v38 = vld [vmem:[%s7398_s9 + $0x1d0] sm:$0xff] }
 0xcf3   : > { %3420 = vmatpush2.bf16.msra.mxu1 %v4924_v49  ;;  %v4870_v25 = vcombine.low %v6718_v38, %v6723_v24 }
 0xcf4   : > { %3421 = vmatprep.subr.bf16.mxu1 %v4917_v26  ;;  %v2603_v26 = vld [vmem:[%s7398_s9 + $0x1f8] sm:$0xff] }
 0xcf5   : > { %3371 = vmatpush2.bf16.msra.mxu0 %v4914_v34  ;;  %v6728_v34 = vld [vmem:[%s7398_s9 + $0x1d8] sm:$0xff] }
 0xcf6   : > { %3372 = vmatprep.subr.bf16.mxu0 %v4907_v8  ;;  %v4872_v44 = vcombine.low %v6728_v34, %v2603_v26  ;;  %v4873_v52 = vcombine.high %v6728_v34, %v2603_v26  ;;  %v2587_v34 = vld [vmem:[%s7398_s9 + $0x178] sm:$0xff] }
 0xcf7   : > { %3422 = vmatpush2.bf16.msra.mxu1 %v4916_v1  ;;  %v4871_v1 = vcombine.high %v6718_v38, %v6723_v24  ;;  %v2582_v38 = vld [vmem:[%s7398_s9 + $0x150] sm:$0xff] }
 0xcf8   : > { %3423 = vmatprep.subr.bf16.mxu1 %v4909_v19 }
 0xcf9   : > { %3373 = vmatpush2.bf16.msra.mxu0 %v4906_v13 }
 0xcfa   : > { %3374 = vmatprep.subr.bf16.mxu0 %v4899_v41 }
 0xcfb   : > { %3424 = vmatpush2.bf16.msra.mxu1 %v4908_v16 }
 0xd52   : > { %v2452_v32 = vpop.xlane.xlu1 %2451 }
 0xd53   : > { %v2461_v20 = vmul.f32 0.00390625, %v2452_v32  ;;  %v2633_v32 = vld [vmem:[%s7398_s9 + $0x2e8] sm:$0xff] }
 0xd55   : > { %v6600_v62 = vsub.f32 %v6466_v50, %v2461_v20  ;;  %v6603_v53 = vsub.f32 %v6469_v63, %v2461_v20  ;;  %v4898_v20 = vcombine.low %v2628_v15, %v2632_v28 }
 0xd56   : > { %v2455_v33 = vpop.xlane.xlu0 %2454 }
 0xd57   : > { %v2462_v9 = vmul.f32 0.00390625, %v2455_v33  ;;  %v2470_v35 = vmul.f32 %v6600_v62, %v6600_v62  ;;  %v2471_v40 = vmul.f32 %v6603_v53, %v6603_v53  ;;  %v4900_v33 = vcombine.low %v2629_v31, %v2633_v32  ;;  %3375 = vmatpush2.bf16.msra.mxu0 %v4898_v20 }
 0xd59   : > { %v6610_v17 = vsub.f32 %v6474_v58, %v2462_v9  ;;  %v6613_v36 = vsub.f32 %v6477_v51, %v2462_v9  ;;  %v2476_v37 = vadd.f32 %v2471_v40, %v2470_v35  ;;  %v4901_v9 = vcombine.high %v2629_v31, %v2633_v32  ;;  %v2620_v35 = vld [vmem:[%s7398_s9 + $0x280] sm:$0xff] }
 0xd5a   : > { %v2624_v40 = vld [vmem:[%s7398_s9 + $0x2a0] sm:$0xff] }
 0xd5b   : > { %2477 = vadd.xlane.f32.xlu1 %v2476_v37  ;;  %v2460_v10 = vpop.xlane.xlu0 %2459  ;;  %v2472_v11 = vmul.f32 %v6610_v17, %v6610_v17  ;;  %v2473_v39 = vmul.f32 %v6613_v36, %v6613_v36  ;;  %v2621_v37 = vld [vmem:[%s7398_s9 + $0x288] sm:$0xff]  ;;  %3425 = vmatprep.subr.bf16.mxu1 %v4901_v9  ;;  %v2448_v32 = vld [vmem:[%s7396_s7] sm:$0x3] }
 0xd5c   : > { %v2463_v42 = vmul.f32 0.00390625, %v2460_v10  ;;  %v4890_v10 = vcombine.low %v2620_v35, %v2624_v40  ;;  %3426 = vmatpush2.bf16.msra.mxu1 %v4900_v33  ;;  %v2449_v33 = vld [vmem:[%s7397_s8] sm:$0x3] }
 0xd5d   : > { %v2479_v48 = vadd.f32 %v2473_v39, %v2472_v11  ;;  %v4891_v11 = vcombine.high %v2620_v35, %v2624_v40  ;;  %v2625_v39 = vld [vmem:[%s7398_s9 + $0x2a8] sm:$0xff]  ;;  %v2510_v35 = vrot.slane %v2448_v32, %v5987_v46 }
 0xd5e   : > { %v6620_v12 = vsub.f32 %v6480_v2, %v2463_v42  ;;  %v6623_v54 = vsub.f32 %v6485_v3, %v2463_v42  ;;  %v2612_v42 = vld [vmem:[%s7398_s9 + $0x240] sm:$0xff] }
 0xd5f   : > { %2480 = vadd.xlane.f32.xlu0 %v2479_v48  ;;  %v2616_v48 = vld [vmem:[%s7398_s9 + $0x260] sm:$0xff]  ;;  %3376 = vmatprep.subr.bf16.mxu0 %v4891_v11  ;;  %v2527_v11 = vrot.slane %v2449_v33, %v5987_v46 }
 0xd60   : > { %v2474_v56 = vmul.f32 %v6620_v12, %v6620_v12  ;;  %v2475_v0 = vmul.f32 %v6623_v54, %v6623_v54  ;;  %3377 = vmatpush2.bf16.msra.mxu0 %v4890_v10  ;;  %v4882_v7 = vcombine.low %v2612_v42, %v2616_v48 }
 0xd62   : > { %v2482_v59 = vsel %vm456_vm0, %v2474_v56, 0.0  ;;  %v2483_v14 = vsel %vm456_vm0, %v2475_v0, 0.0  ;;  %v4892_v56 = vcombine.low %v2621_v37, %v2625_v39  ;;  %v4893_v0 = vcombine.high %v2621_v37, %v2625_v39 }
 0xd63   : > { %v2484_v29 = vadd.f32 %v2483_v14, %v2482_v59  ;;  %v4883_v59 = vcombine.high %v2612_v42, %v2616_v48  ;;  %v2613_v14 = vld [vmem:[%s7398_s9 + $0x248] sm:$0xff]  ;;  %v2506_v37 = vrot.slane %v2448_v32, %v5990_v47  ;;  %v2523_v39 = vrot.slane %v2449_v33, %v5990_v47  ;;  %v2566_v32 = vld [vmem:[%s7398_s9 + $0xd0] sm:$0xff] }
 0xd64   : > { %3427 = vmatprep.subr.bf16.mxu1 %v4893_v0 }
 0xd65   : > { %2485 = vadd.xlane.f32.xlu1 %v2484_v29  ;;  %v2617_v29 = vld [vmem:[%s7398_s9 + $0x268] sm:$0xff]  ;;  %3428 = vmatpush2.bf16.msra.mxu1 %v4892_v56 }
 0xd66   : > { %v4885_v57 = vcombine.high %v2613_v14, %v2617_v29  ;;  %3378 = vmatprep.subr.bf16.mxu0 %v4883_v59  ;;  %v4884_v49 = vcombine.low %v2613_v14, %v2617_v29 }
 0xd67   : > { %3379 = vmatpush2.bf16.msra.mxu0 %v4882_v7 }
 0xd68   : > { %3429 = vmatprep.subr.bf16.mxu1 %v4885_v57  ;;  %3380 = vmatprep.subr.bf16.mxu0 %v4875_v18 }
 0xd69   : > { %3430 = vmatpush2.bf16.msra.mxu1 %v4884_v49 }
 0xd6a   : > { %3431 = vmatprep.subr.bf16.mxu1 %v4877_v21 }
 0xd6b   : > { %3381 = vmatpush2.bf16.msra.mxu0 %v4874_v22 }
 0xd6c   : > { %3452 = vmatprep.subr.bf16.mxu0 %v4871_v1 }
 0xd6d   : > { %3432 = vmatpush2.bf16.msra.mxu1 %v4876_v23 }
 0xd6e   : > { %3503 = vmatprep.subr.bf16.mxu1 %v4873_v52 }
 0xde4   : > { %v2478_v8 = vpop.xlane.xlu1 %2477 }
 0xde5   : > { %v2487_v60 = vmul.f32 0.00390625, %v2478_v8 }
 0xde7   : > { %v2490_v13 = vadd.f32 1e-05, %v2487_v60 }
 0xde8   : > { %v2481_v16 = vpop.xlane.xlu0 %2480 }
 0xde9   : > { %5621 = vrsqrt.f32 %v2490_v13  ;;  %v2488_v19 = vmul.f32 0.00390625, %v2481_v16 }
 0xdeb   : > { %v2491_v15 = vadd.f32 1e-05, %v2488_v19  ;;  %v2574_v19 = vld [vmem:[%s7398_s9 + $0x110] sm:$0xff] }
 0xded   : > { %5623 = vrsqrt.f32 %v2491_v15  ;;  %v2578_v15 = vld [vmem:[%s7398_s9 + $0x130] sm:$0xff] }
 0xdee   : > { %v2486_v28 = vpop.xlane.xlu1 %2485 }
 0xdef   : > { %v2489_v31 = vmul.f32 0.00390625, %v2486_v28 }
 0xdf1   : > { %v2492_v41 = vadd.f32 1e-05, %v2489_v31 }
 0xdf3   : > { %5625 = vrsqrt.f32 %v2492_v41 }
 0xdf6   : > { %v5622_v20 = vpop.eup %5621 }
 0xdf7   : > { %v2497_v9 = vmul.f32 %v5622_v20, %v6603_v53  ;;  %v2496_v40 = vmul.f32 %v5622_v20, %v6600_v62  ;;  %v2590_v53 = vld [vmem:[%s7398_s9 + $0x190] sm:$0xff]  ;;  %v4847_v20 = vcombine.high %v2574_v19, %v2578_v15 }
 0xdf8   : > { %v4863_v21 = vcombine.high %v2590_v53, %v2594_v4  ;;  %v4862_v1 = vcombine.low %v2590_v53, %v2594_v4  ;;  %v2555_v4 = vld [vmem:[%s7398_s9 + $0x78] sm:$0xff] }
 0xdf9   : > { %v2514_v48 = vmul.f32 %v2510_v35, %v2497_v9  ;;  %v2513_v0 = vmul.f32 %v2506_v37, %v2496_v40  ;;  %v2570_v9 = vld [vmem:[%s7398_s9 + $0xf0] sm:$0xff]  ;;  %v2571_v40 = vld [vmem:[%s7398_s9 + $0xf8] sm:$0xff] }
 0xdfa   : > { %v5624_v10 = vpop.eup %5623 }
 0xdfb   : > { %v2499_v42 = vmul.f32 %v5624_v10, %v6613_v36  ;;  %v2498_v56 = vmul.f32 %v5624_v10, %v6610_v17  ;;  %v2531_v62 = vadd.f32 %v2527_v11, %v2514_v48  ;;  %v2530_v57 = vadd.f32 %v2523_v39, %v2513_v0  ;;  %v2591_v36 = vld [vmem:[%s7398_s9 + $0x198] sm:$0xff]  ;;  %v2562_v48 = vld [vmem:[%s7398_s9 + $0xb0] sm:$0xff] }
 0xdfc   : > { %v2595_v17 = vld [vmem:[%s7398_s9 + $0x1b8] sm:$0xff] }
 0xdfd   : > { %v2516_v59 = vmul.f32 %v2510_v35, %v2499_v42  ;;  %v2515_v14 = vmul.f32 %v2506_v37, %v2498_v56  ;;  %v4865_v22 = vcombine.high %v2591_v36, %v2595_v17  ;;  %v4864_v26 = vcombine.low %v2591_v36, %v2595_v17  ;;  %v2558_v42 = vld [vmem:[%s7398_s9 + $0x90] sm:$0xff]  ;;  %v2559_v56 = vld [vmem:[%s7398_s9 + $0x98] sm:$0xff] }
 0xdfe   : > { %v2563_v0 = vld [vmem:[%s7398_s9 + $0xb8] sm:$0xff]  ;;  %v4831_v53 = vcombine.high %v2558_v42, %v2562_v48  ;;  %v4830_v36 = vcombine.low %v2558_v42, %v2562_v48  ;;  %v2638_v42 = vld [vmem:[%s7398_s9 + $0x310] sm:$0xff] }
 0xdff   : > { %v2533_v29 = vadd.f32 %v2527_v11, %v2516_v59  ;;  %v2532_v43 = vadd.f32 %v2523_v39, %v2515_v14  ;;  %v4838_v59 = vcombine.low %v2566_v32, %v2570_v9  ;;  %v4832_v17 = vcombine.low %v2559_v56, %v2563_v0  ;;  %v2642_v48 = vld [vmem:[%s7398_s9 + $0x330] sm:$0xff] }
 0xe00   : > { %v5626_v5 = vpop.eup %5625 }
 0xe01   : > { %v2537_v6 = vpack.c.bf16 %v2533_v29, %v2531_v62  ;;  %v6765_v7 = vpack.c.bf16 %v2532_v43, %v2530_v57  ;;  %v2501_v49 = vmul.f32 %v5626_v5, %v6623_v54  ;;  %v2500_v18 = vmul.f32 %v5626_v5, %v6620_v12  ;;  %v2586_v54 = vld [vmem:[%s7398_s9 + $0x170] sm:$0xff]  ;;  %v2583_v12 = vld [vmem:[%s7398_s9 + $0x158] sm:$0xff] }
 0xe02   : > { %v4855_v13 = vcombine.high %v2582_v38, %v2586_v54  ;;  %v4857_v16 = vcombine.high %v2583_v12, %v2587_v34  ;;  %v4854_v28 = vcombine.low %v2582_v38, %v2586_v54  ;;  %v4856_v31 = vcombine.low %v2583_v12, %v2587_v34  ;;  %v2550_v29 = vld [vmem:[%s7398_s9 + $0x50] sm:$0xff]  ;;  %v2551_v43 = vld [vmem:[%s7398_s9 + $0x58] sm:$0xff] }
 0xe03   : > { %3382 = vmatprep.mubr.bf16.mxu0 %v2537_v6  ;;  %3433 = vmatprep.mubr.bf16.mxu1 %v2537_v6  ;;  %v2518_v23 = vmul.f32 %v2510_v35, %v2501_v49  ;;  %v2517_v24 = vmul.f32 %v2506_v37, %v2500_v18  ;;  %v2567_v35 = vld [vmem:[%s7398_s9 + $0xd8] sm:$0xff]  ;;  %v4846_v37 = vcombine.low %v2574_v19, %v2578_v15  ;;  %v2554_v57 = vld [vmem:[%s7398_s9 + $0x70] sm:$0xff] }
 0xe04   : > { %3383 = vmatmul.mubr.bf16.vlgmr.msra.gmra.mxu0 %v6765_v7  ;;  %3434 = vmatmul.mubr.bf16.vlgmr.msra.gmra.mxu1 %v6765_v7  ;;  %v4840_v14 = vcombine.low %v2567_v35, %v2571_v40  ;;  %v4833_v62 = vcombine.high %v2559_v56, %v2563_v0  ;;  %v4823_v5 = vcombine.high %v2550_v29, %v2554_v57  ;;  %v2542_v49 = vld [vmem:[%s7398_s9 + $0x10] sm:$0xff]  ;;  %v2639_v56 = vld [vmem:[%s7398_s9 + $0x318] sm:$0xff] }
 0xe05   : > { %3453 = vmatpush1.bf16.msra.mxu0 %v4870_v25  ;;  %3504 = vmatpush1.bf16.msra.mxu1 %v4872_v44  ;;  %v2535_v52 = vadd.f32 %v2527_v11, %v2518_v23  ;;  %v2534_v8 = vadd.f32 %v2523_v39, %v2517_v24  ;;  %v2575_v25 = vld [vmem:[%s7398_s9 + $0x118] sm:$0xff]  ;;  %v4839_v11 = vcombine.high %v2566_v32, %v2570_v9  ;;  %v2546_v18 = vld [vmem:[%s7398_s9 + $0x30] sm:$0xff] }
 0xe06   : > { %3454 = vmatprep.subr.bf16.mxu0 %v4863_v21  ;;  %3505 = vmatprep.subr.bf16.mxu1 %v4865_v22  ;;  %v2579_v44 = vld [vmem:[%s7398_s9 + $0x138] sm:$0xff]  ;;  %v4841_v39 = vcombine.high %v2567_v35, %v2571_v40  ;;  %v4822_v23 = vcombine.low %v2550_v29, %v2554_v57  ;;  %v4824_v38 = vcombine.low %v2551_v43, %v2555_v4  ;;  %v2662_v12 = vld [vmem:[%s7398_s9 + $0x3d0] sm:$0xff] }
 0xe07   : > { %v6783_v60 = vpack.c.bf16 %v2535_v52, %v2535_v52  ;;  %v6799_v41 = vpack.c.bf16 %v2534_v8, %v2534_v8  ;;  %v4849_v33 = vcombine.high %v2575_v25, %v2579_v44  ;;  %v4848_v10 = vcombine.low %v2575_v25, %v2579_v44  ;;  %v2543_v21 = vld [vmem:[%s7398_s9 + $0x18] sm:$0xff]  ;;  %v2666_v34 = vld [vmem:[%s7398_s9 + $0x3f0] sm:$0xff] }
 0xe08   : > { %v2547_v22 = vld [vmem:[%s7398_s9 + $0x38] sm:$0xff]  ;;  %v4815_v24 = vcombine.high %v2542_v49, %v2546_v18  ;;  %v4814_v52 = vcombine.low %v2542_v49, %v2546_v18  ;;  %v2654_v19 = vld [vmem:[%s7398_s9 + $0x390] sm:$0xff] }
 0xe09   : > { %3455 = vmatpush1.bf16.msra.mxu0 %v4862_v1  ;;  %3506 = vmatpush1.bf16.msra.mxu1 %v4864_v26  ;;  %v4817_v54 = vcombine.high %v2543_v21, %v2547_v22  ;;  %v2663_v1 = vld [vmem:[%s7398_s9 + $0x3d8] sm:$0xff]  ;;  %v4816_v8 = vcombine.low %v2543_v21, %v2547_v22  ;;  %v2658_v15 = vld [vmem:[%s7398_s9 + $0x3b0] sm:$0xff] }
 0xe0a   : > { %3392 = vmatprep.mubr.bf16.mxu0 %v6783_v60  ;;  %3443 = vmatprep.mubr.bf16.mxu1 %v6783_v60  ;;  %v2667_v26 = vld [vmem:[%s7398_s9 + $0x3f8] sm:$0xff]  ;;  %v4927_v32 = vcombine.high %v2654_v19, %v2658_v15  ;;  %v2650_v9 = vld [vmem:[%s7398_s9 + $0x370] sm:$0xff] }
 0xe0b   : > { %3456 = vmatprep.subr.bf16.mxu0 %v4855_v13  ;;  %3507 = vmatprep.subr.bf16.mxu1 %v4857_v16  ;;  %v4935_v13 = vcombine.high %v2662_v12, %v2666_v34  ;;  %v4937_v16 = vcombine.high %v2663_v1, %v2667_v26  ;;  %v2655_v25 = vld [vmem:[%s7398_s9 + $0x398] sm:$0xff]  ;;  %v2630_v29 = vld [vmem:[%s7398_s9 + $0x2d0] sm:$0xff] }
 0xe0c   : > { %3393 = vmatmul.mubr.bf16.gmra.mxu0 %v6799_v41  ;;  %3444 = vmatmul.mubr.bf16.gmra.mxu1 %v6799_v41  ;;  %v2659_v44 = vld [vmem:[%s7398_s9 + $0x3b8] sm:$0xff]  ;;  %v2634_v57 = vld [vmem:[%s7398_s9 + $0x2f0] sm:$0xff] }
 0xe0d   : > { %3457 = vmatpush1.bf16.msra.mxu0 %v4854_v28  ;;  %3508 = vmatpush1.bf16.msra.mxu1 %v4856_v31  ;;  %v4934_v28 = vcombine.low %v2662_v12, %v2666_v34  ;;  %v4936_v31 = vcombine.low %v2663_v1, %v2667_v26  ;;  %v2647_v35 = vld [vmem:[%s7398_s9 + $0x358] sm:$0xff]  ;;  %v2622_v49 = vld [vmem:[%s7398_s9 + $0x290] sm:$0xff] }
 0xe0e   : > { %3484 = vmatprep.mubr.bf16.mxu0 %v2537_v6  ;;  %3535 = vmatprep.mubr.bf16.mxu1 %v2537_v6  ;;  %v4825_v6 = vcombine.high %v2551_v43, %v2555_v4  ;;  %v2651_v40 = vld [vmem:[%s7398_s9 + $0x378] sm:$0xff]  ;;  %v2626_v18 = vld [vmem:[%s7398_s9 + $0x2b0] sm:$0xff] }
 0xe0f   : > { %3458 = vmatprep.subr.bf16.mxu0 %v4847_v20  ;;  %3509 = vmatprep.subr.bf16.mxu1 %v4849_v33  ;;  %v4929_v20 = vcombine.high %v2655_v25, %v2659_v44  ;;  %v2646_v33 = vld [vmem:[%s7398_s9 + $0x350] sm:$0xff]  ;;  %v2643_v0 = vld [vmem:[%s7398_s9 + $0x338] sm:$0xff] }
 0xe10   : > { %v2631_v43 = vld [vmem:[%s7398_s9 + $0x2d8] sm:$0xff]  ;;  %v2614_v12 = vld [vmem:[%s7398_s9 + $0x250] sm:$0xff] }
 0xe11   : > { %3459 = vmatpush1.bf16.msra.mxu0 %v4846_v37  ;;  %3510 = vmatpush1.bf16.msra.mxu1 %v4848_v10  ;;  %v4926_v37 = vcombine.low %v2654_v19, %v2658_v15  ;;  %v4928_v10 = vcombine.low %v2655_v25, %v2659_v44  ;;  %v2635_v4 = vld [vmem:[%s7398_s9 + $0x2f8] sm:$0xff]  ;;  %v2618_v34 = vld [vmem:[%s7398_s9 + $0x270] sm:$0xff] }
 0xe12   : > { %3460 = vmatprep.subr.bf16.mxu0 %v4839_v11  ;;  %3511 = vmatprep.subr.bf16.mxu1 %v4841_v39  ;;  %v4919_v11 = vcombine.high %v2646_v33, %v2650_v9  ;;  %v4921_v39 = vcombine.high %v2647_v35, %v2651_v40  ;;  %v2623_v21 = vld [vmem:[%s7398_s9 + $0x298] sm:$0xff]  ;;  %v2606_v19 = vld [vmem:[%s7398_s9 + $0x210] sm:$0xff] }
 0xe13   : > { %v2627_v22 = vld [vmem:[%s7398_s9 + $0x2b8] sm:$0xff]  ;;  %v2610_v15 = vld [vmem:[%s7398_s9 + $0x230] sm:$0xff] }
 0xe14   : > { %v2615_v1 = vld [vmem:[%s7398_s9 + $0x258] sm:$0xff] }
 0xe15   : > { %3461 = vmatpush1.bf16.msra.mxu0 %v4838_v59  ;;  %3512 = vmatpush1.bf16.msra.mxu1 %v4840_v14  ;;  %v4918_v59 = vcombine.low %v2646_v33, %v2650_v9  ;;  %v4920_v14 = vcombine.low %v2647_v35, %v2651_v40  ;;  %v2619_v26 = vld [vmem:[%s7398_s9 + $0x278] sm:$0xff]  ;;  %v4878_v33 = vcombine.low %v2606_v19, %v2610_v15 }
 0xe16   : > { %3462 = vmatprep.subr.bf16.mxu0 %v4831_v53  ;;  %3513 = vmatprep.subr.bf16.mxu1 %v4833_v62  ;;  %v4911_v53 = vcombine.high %v2638_v42, %v2642_v48  ;;  %v4913_v62 = vcombine.high %v2639_v56, %v2643_v0  ;;  %v2607_v25 = vld [vmem:[%s7398_s9 + $0x218] sm:$0xff] }
 0xe17   : > { %v2611_v44 = vld [vmem:[%s7398_s9 + $0x238] sm:$0xff] }
 0xe18   : > { %v4880_v9 = vcombine.low %v2607_v25, %v2611_v44  ;;  %v5377_v35 = vld [vmem:[%s7400_s11 + $0x74] ss:$8 sps:$4 sm:$0xff]  }
 0xe19   : > { %3463 = vmatpush1.bf16.msra.mxu0 %v4830_v36  ;;  %3514 = vmatpush1.bf16.msra.mxu1 %v4832_v17  ;;  %v4910_v36 = vcombine.low %v2638_v42, %v2642_v48  ;;  %v4912_v17 = vcombine.low %v2639_v56, %v2643_v0  ;;  %v5380_v40 = vld [vmem:[%s7400_s11 + $0x174] ss:$8 sps:$4 sm:$0xff]   ;;  %v5381_v42 = vld [vmem:[%s7400_s11 + $0x60] ss:$8 sps:$4 sm:$0xff]   ;;  %v5387_v56 = vld [vmem:[%s7400_s11 + $0x50] ss:$8 sps:$4 sm:$0xff]  }
 0xe1a   : > { %3464 = vmatprep.subr.bf16.mxu0 %v4823_v5  ;;  %3515 = vmatprep.subr.bf16.mxu1 %v4825_v6  ;;  %v4903_v5 = vcombine.high %v2630_v29, %v2634_v57  ;;  %v4905_v6 = vcombine.high %v2631_v43, %v2635_v4  ;;  %v5384_v48 = vld [vmem:[%s7400_s11 + $0x160] ss:$8 sps:$4 sm:$0xff]   ;;  %v5390_v0 = vld [vmem:[%s7400_s11 + $0x150] ss:$8 sps:$4 sm:$0xff]  }
 0xe1d   : > { %3465 = vmatpush1.bf16.msra.mxu0 %v4822_v23  ;;  %3516 = vmatpush1.bf16.msra.mxu1 %v4824_v38  ;;  %v4902_v23 = vcombine.low %v2630_v29, %v2634_v57  ;;  %v4904_v38 = vcombine.low %v2631_v43, %v2635_v4  ;;  %v5401_v29 = vld [vmem:[%s7400_s11 + $0x34] ss:$8 sps:$4 sm:$0xff]   ;;  %v5399_v57 = vld [vmem:[%s7400_s11 + $0x30] ss:$8 sps:$4 sm:$0xff]   ;;  %v5407_v4 = vld [vmem:[%s7400_s11 + $0x24] ss:$8 sps:$4 sm:$0xff]  }
 0xe1e   : > { %3466 = vmatprep.subr.bf16.mxu0 %v4815_v24  ;;  %3517 = vmatprep.subr.bf16.mxu1 %v4817_v54  ;;  %v4895_v24 = vcombine.high %v2622_v49, %v2626_v18  ;;  %v4897_v54 = vcombine.high %v2623_v21, %v2627_v22  ;;  %v5402_v43 = vld [vmem:[%s7400_s11 + $0x130] ss:$8 sps:$4 sm:$0xff]  }
 0xe21   : > { %3467 = vmatpush1.bf16.msra.mxu0 %v4814_v52  ;;  %3518 = vmatpush1.bf16.msra.mxu1 %v4816_v8  ;;  %v4894_v52 = vcombine.low %v2622_v49, %v2626_v18  ;;  %v4896_v8 = vcombine.low %v2623_v21, %v2627_v22  ;;  %v5416_v49 = vld [vmem:[%s7400_s11 + $0x114] ss:$8 sps:$4 sm:$0xff]   ;;  %v5411_v18 = vld [vmem:[%s7400_s11 + $0x10] ss:$8 sps:$4 sm:$0xff]   ;;  %v5419_v22 = vld [vmem:[%s7400_s11 + $0x4] ss:$8 sps:$4 sm:$0xff]  }
 0xe22   : > { %3468 = vmatprep.subr.bf16.mxu0 %v4935_v13  ;;  %3519 = vmatprep.subr.bf16.mxu1 %v4937_v16  ;;  %v4887_v13 = vcombine.high %v2614_v12, %v2618_v34  ;;  %v4889_v16 = vcombine.high %v2615_v1, %v2619_v26  ;;  %v5414_v21 = vld [vmem:[%s7400_s11 + $0x110] ss:$8 sps:$4 sm:$0xff]  }
 0xe25   : > { %3469 = vmatpush2.bf16.msra.mxu0 %v4934_v28  ;;  %3520 = vmatpush2.bf16.msra.mxu1 %v4936_v31  ;;  %v4886_v28 = vcombine.low %v2614_v12, %v2618_v34  ;;  %v4888_v31 = vcombine.low %v2615_v1, %v2619_v26  ;;  %v5428_v12 = vld [vmem:[%s7400_s11 + $0x1f4] ss:$8 sps:$4 sm:$0xff]   ;;  %v5423_v34 = vld [vmem:[%s7400_s11 + $0xf0] ss:$8 sps:$4 sm:$0xff]   ;;  %v5431_v26 = vld [vmem:[%s7400_s11 + $0xe4] ss:$8 sps:$4 sm:$0xff]  }
 0xe26   : > { %3470 = vmatprep.subr.bf16.mxu0 %v4927_v32  ;;  %3521 = vmatprep.subr.bf16.mxu1 %v4929_v20  ;;  %v4879_v32 = vcombine.high %v2606_v19, %v2610_v15  ;;  %v4881_v20 = vcombine.high %v2607_v25, %v2611_v44  ;;  %v5426_v1 = vld [vmem:[%s7400_s11 + $0x1f0] ss:$8 sps:$4 sm:$0xff]   ;;  %v5440_v19 = vld [vmem:[%s7400_s11 + $0x1d4] ss:$8 sps:$4 sm:$0xff]   ;;  %v5443_v44 = vld [vmem:[%s7400_s11 + $0xc4] ss:$8 sps:$4 sm:$0xff]  }
 0xe27   : > { %v5435_v15 = vld [vmem:[%s7400_s11 + $0xd0] ss:$8 sps:$4 sm:$0xff]  }
 0xe28   : > { %v5438_v25 = vld [vmem:[%s7400_s11 + $0x1d0] ss:$8 sps:$4 sm:$0xff]  }
 0xe29   : > { %3471 = vmatpush2.bf16.msra.mxu0 %v4926_v37  ;;  %3522 = vmatpush2.bf16.msra.mxu1 %v4928_v10  ;;  %v5375_v37 = vld [vmem:[%s7400_s11 + $0x70] ss:$8 sps:$4 sm:$0xff]  }
 0xe2a   : > { %3472 = vmatprep.subr.bf16.mxu0 %v4919_v11  ;;  %3523 = vmatprep.subr.bf16.mxu1 %v4921_v39  ;;  %v5378_v10 = vld [vmem:[%s7400_s11 + $0x170] ss:$8 sps:$4 sm:$0xff]   ;;  %v5383_v11 = vld [vmem:[%s7400_s11 + $0x64] ss:$8 sps:$4 sm:$0xff]  }
 0xe2b   : > { %v5386_v39 = vld [vmem:[%s7400_s11 + $0x164] ss:$8 sps:$4 sm:$0xff]  }
 0xe2d   : > { %3473 = vmatpush2.bf16.msra.mxu0 %v4918_v59  ;;  %3524 = vmatpush2.bf16.msra.mxu1 %v4920_v14  ;;  %v5395_v59 = vld [vmem:[%s7400_s11 + $0x44] ss:$8 sps:$4 sm:$0xff]  }
 0xe2e   : > { %3474 = vmatprep.subr.bf16.mxu0 %v4911_v53  ;;  %3525 = vmatprep.subr.bf16.mxu1 %v4913_v62  ;;  %v5398_v14 = vld [vmem:[%s7400_s11 + $0x144] ss:$8 sps:$4 sm:$0xff]   ;;  %v5393_v53 = vld [vmem:[%s7400_s11 + $0x40] ss:$8 sps:$4 sm:$0xff]  }
 0xe2f   : > { %v5396_v62 = vld [vmem:[%s7400_s11 + $0x140] ss:$8 sps:$4 sm:$0xff]  }
 0xe31   : > { %3475 = vmatpush2.bf16.msra.mxu0 %v4910_v36  ;;  %3526 = vmatpush2.bf16.msra.mxu1 %v4912_v17  ;;  %v5410_v36 = vld [vmem:[%s7400_s11 + $0x124] ss:$8 sps:$4 sm:$0xff]   ;;  %v5405_v17 = vld [vmem:[%s7400_s11 + $0x20] ss:$8 sps:$4 sm:$0xff]  }
 0xe32   : > { %3476 = vmatprep.subr.bf16.mxu0 %v4903_v5  ;;  %3527 = vmatprep.subr.bf16.mxu1 %v4905_v6  ;;  %v5408_v5 = vld [vmem:[%s7400_s11 + $0x120] ss:$8 sps:$4 sm:$0xff]   ;;  %v5413_v6 = vld [vmem:[%s7400_s11 + $0x14] ss:$8 sps:$4 sm:$0xff]  }
 0xe35   : > { %3477 = vmatpush2.bf16.msra.mxu0 %v4902_v23  ;;  %3528 = vmatpush2.bf16.msra.mxu1 %v4904_v38  ;;  %v5422_v23 = vld [vmem:[%s7400_s11 + $0x104] ss:$8 sps:$4 sm:$0xff]   ;;  %v5417_v38 = vld [vmem:[%s7400_s11] ss:$8 sps:$4 sm:$0xff]  }
 0xe36   : > { %3478 = vmatprep.subr.bf16.mxu0 %v4895_v24  ;;  %3529 = vmatprep.subr.bf16.mxu1 %v4897_v54  ;;  %v5420_v24 = vld [vmem:[%s7400_s11 + $0x100] ss:$8 sps:$4 sm:$0xff]   ;;  %v5425_v54 = vld [vmem:[%s7400_s11 + $0xf4] ss:$8 sps:$4 sm:$0xff]  }
 0xe39   : > { %3479 = vmatpush2.bf16.msra.mxu0 %v4894_v52  ;;  %3530 = vmatpush2.bf16.msra.mxu1 %v4896_v8  ;;  %v5434_v52 = vld [vmem:[%s7400_s11 + $0x1e4] ss:$8 sps:$4 sm:$0xff]   ;;  %v5429_v8 = vld [vmem:[%s7400_s11 + $0xe0] ss:$8 sps:$4 sm:$0xff]  }
 0xe3a   : > { %3480 = vmatprep.subr.bf16.mxu0 %v4887_v13  ;;  %3531 = vmatprep.subr.bf16.mxu1 %v4889_v16  ;;  %v5432_v13 = vld [vmem:[%s7400_s11 + $0x1e0] ss:$8 sps:$4 sm:$0xff]   ;;  %v5437_v16 = vld [vmem:[%s7400_s11 + $0xd4] ss:$8 sps:$4 sm:$0xff]  }
 0xe3d   : > { %3481 = vmatpush2.bf16.msra.mxu0 %v4886_v28  ;;  %3532 = vmatpush2.bf16.msra.mxu1 %v4888_v31  ;;  %v5446_v28 = vld [vmem:[%s7400_s11 + $0x1c4] ss:$8 sps:$4 sm:$0xff]   ;;  %v5441_v31 = vld [vmem:[%s7400_s11 + $0xc0] ss:$8 sps:$4 sm:$0xff]  }
 0xe3e   : > { %3482 = vmatprep.subr.bf16.mxu0 %v4879_v32  ;;  %3533 = vmatprep.subr.bf16.mxu1 %v4881_v20  ;;  %v5444_v32 = vld [vmem:[%s7400_s11 + $0x1c0] ss:$8 sps:$4 sm:$0xff]   ;;  %v5449_v20 = vld [vmem:[%s7400_s11 + $0xb4] ss:$8 sps:$4 sm:$0xff]  }
 0xe41   : > { %3483 = vmatpush2.bf16.msra.mxu0 %v4878_v33  ;;  %3534 = vmatpush2.bf16.msra.mxu1 %v4880_v9  ;;  %v5452_v33 = vld [vmem:[%s7400_s11 + $0x1b4] ss:$8 sps:$4 sm:$0xff]   ;;  %v5447_v9 = vld [vmem:[%s7400_s11 + $0xb0] ss:$8 sps:$4 sm:$0xff]  }
 0xe42   : > { %4362 = vmatprep.subr.bf16.mxu0 %v5377_v35  ;;  %4413 = vmatprep.subr.bf16.mxu1 %v5380_v40  ;;  %v5450_v35 = vld [vmem:[%s7400_s11 + $0x1b0] ss:$8 sps:$4 sm:$0xff]   ;;  %v5455_v40 = vld [vmem:[%s7400_s11 + $0xa4] ss:$8 sps:$4 sm:$0xff]  }
 0xe44   : > { %3485 = vmatmul.mubr.bf16.vlgmr.msra.gmra.mxu0 %v6765_v7  ;;  %3536 = vmatmul.mubr.bf16.vlgmr.msra.gmra.mxu1 %v6765_v7  ;;  %v5389_v7 = vld [vmem:[%s7400_s11 + $0x54] ss:$8 sps:$4 sm:$0xff]  }
 0xe45   : > { %3494 = vmatprep.mubr.bf16.mxu0 %v6783_v60  ;;  %3545 = vmatprep.mubr.bf16.mxu1 %v6783_v60  ;;  %v5392_v60 = vld [vmem:[%s7400_s11 + $0x154] ss:$8 sps:$4 sm:$0xff]  }
 0xe46   : > { %4363 = vmatpush1.bf16.msra.mxu0 %v5375_v37  ;;  %4414 = vmatpush1.bf16.msra.mxu1 %v5378_v10  ;;  %v5458_v37 = vld [vmem:[%s7400_s11 + $0x1a4] ss:$8 sps:$4 sm:$0xff]   ;;  %v5453_v10 = vld [vmem:[%s7400_s11 + $0xa0] ss:$8 sps:$4 sm:$0xff]  }
 0xe47   : > { %4364 = vmatprep.subr.bf16.mxu0 %v5383_v11  ;;  %4415 = vmatprep.subr.bf16.mxu1 %v5386_v39  ;;  %v5456_v11 = vld [vmem:[%s7400_s11 + $0x1a0] ss:$8 sps:$4 sm:$0xff]   ;;  %v5461_v39 = vld [vmem:[%s7400_s11 + $0x94] ss:$8 sps:$4 sm:$0xff]  }
 0xe4a   : > { %4365 = vmatpush1.bf16.msra.mxu0 %v5381_v42  ;;  %4416 = vmatpush1.bf16.msra.mxu1 %v5384_v48  ;;  %v5464_v42 = vld [vmem:[%s7400_s11 + $0x194] ss:$8 sps:$4 sm:$0xff]   ;;  %v5459_v48 = vld [vmem:[%s7400_s11 + $0x90] ss:$8 sps:$4 sm:$0xff]  }
 0xe4b   : > { %4366 = vmatprep.subr.bf16.mxu0 %v5389_v7  ;;  %4417 = vmatprep.subr.bf16.mxu1 %v5392_v60  ;;  %v5462_v7 = vld [vmem:[%s7400_s11 + $0x190] ss:$8 sps:$4 sm:$0xff]   ;;  %v5467_v60 = vld [vmem:[%s7400_s11 + $0x84] ss:$8 sps:$4 sm:$0xff]  }
 0xe4c   : > { %3495 = vmatmul.mubr.bf16.gmra.mxu0 %v6799_v41  ;;  %3546 = vmatmul.mubr.bf16.gmra.mxu1 %v6799_v41  ;;  %v5404_v41 = vld [vmem:[%s7400_s11 + $0x134] ss:$8 sps:$4 sm:$0xff]  }
 0xe4e   : > { %4367 = vmatpush1.bf16.msra.mxu0 %v5387_v56  ;;  %4418 = vmatpush1.bf16.msra.mxu1 %v5390_v0  ;;  %v5470_v56 = vld [vmem:[%s7400_s11 + $0x184] ss:$8 sps:$4 sm:$0xff]   ;;  %v5465_v0 = vld [vmem:[%s7400_s11 + $0x80] ss:$8 sps:$4 sm:$0xff]  }
 0xe4f   : > { %4368 = vmatprep.subr.bf16.mxu0 %v5395_v59  ;;  %4419 = vmatprep.subr.bf16.mxu1 %v5398_v14  ;;  %v5468_v59 = vld [vmem:[%s7400_s11 + $0x180] ss:$8 sps:$4 sm:$0xff]   ;;  %v5473_v14 = vld [vmem:[%s7400_s11 + $0x274] ss:$8 sps:$4 sm:$0xff]  }
 0xe52   : > { %4369 = vmatpush1.bf16.msra.mxu0 %v5393_v53  ;;  %4420 = vmatpush1.bf16.msra.mxu1 %v5396_v62  ;;  %v5476_v53 = vld [vmem:[%s7400_s11 + $0x374] ss:$8 sps:$4 sm:$0xff]   ;;  %v7154_v62 = vld [vmem:[%s7399_s10] sm:$0xff] }
 0xe53   : > { %4370 = vmatprep.subr.bf16.mxu0 %v5401_v29  ;;  %4421 = vmatprep.subr.bf16.mxu1 %v5404_v41 }
 0xe56   : > { %4371 = vmatpush1.bf16.msra.mxu0 %v5399_v57  ;;  %4422 = vmatpush1.bf16.msra.mxu1 %v5402_v43  ;;  %v2677_v57 = vrot.slane %v7154_v62, %v5987_v46  ;;  %v2685_v43 = vrot.slane %v7154_v62, %v654_v55 }
 0xe57   : > { %4372 = vmatprep.subr.bf16.mxu0 %v5407_v4  ;;  %4423 = vmatprep.subr.bf16.mxu1 %v5410_v36  ;;  %v2673_v4 = vrot.slane %v7154_v62, %v5990_v47  ;;  %v2681_v36 = vrot.slane %v7154_v62, %v650_v61 }
 0xe5a   : > { %4373 = vmatpush1.bf16.msra.mxu0 %v5405_v17  ;;  %4424 = vmatpush1.bf16.msra.mxu1 %v5408_v5 }
 0xe5b   : > { %4374 = vmatprep.subr.bf16.mxu0 %v5413_v6  ;;  %4425 = vmatprep.subr.bf16.mxu1 %v5416_v49 }
 0xe5e   : > { %4375 = vmatpush1.bf16.msra.mxu0 %v5411_v18  ;;  %4426 = vmatpush1.bf16.msra.mxu1 %v5414_v21 }
 0xe5f   : > { %4376 = vmatprep.subr.bf16.mxu0 %v5419_v22  ;;  %4427 = vmatprep.subr.bf16.mxu1 %v5422_v23 }
 0xe62   : > { %4377 = vmatpush1.bf16.msra.mxu0 %v5417_v38  ;;  %4428 = vmatpush1.bf16.msra.mxu1 %v5420_v24 }
 0xe63   : > { %4378 = vmatprep.subr.bf16.mxu0 %v5425_v54  ;;  %4429 = vmatprep.subr.bf16.mxu1 %v5428_v12 }
 0xe66   : > { %4379 = vmatpush2.bf16.msra.mxu0 %v5423_v34  ;;  %4430 = vmatpush2.bf16.msra.mxu1 %v5426_v1 }
 0xe67   : > { %4380 = vmatprep.subr.bf16.mxu0 %v5431_v26  ;;  %4431 = vmatprep.subr.bf16.mxu1 %v5434_v52 }
 0xe6a   : > { %4381 = vmatpush2.bf16.msra.mxu0 %v5429_v8  ;;  %4432 = vmatpush2.bf16.msra.mxu1 %v5432_v13 }
 0xe6b   : > { %4382 = vmatprep.subr.bf16.mxu0 %v5437_v16  ;;  %4433 = vmatprep.subr.bf16.mxu1 %v5440_v19 }
 0xe6e   : > { %4383 = vmatpush2.bf16.msra.mxu0 %v5435_v15  ;;  %4434 = vmatpush2.bf16.msra.mxu1 %v5438_v25 }
 0xe6f   : > { %4384 = vmatprep.subr.bf16.mxu0 %v5443_v44  ;;  %4435 = vmatprep.subr.bf16.mxu1 %v5446_v28 }
 0xe72   : > { %4385 = vmatpush2.bf16.msra.mxu0 %v5441_v31  ;;  %4436 = vmatpush2.bf16.msra.mxu1 %v5444_v32 }
 0xe73   : > { %4386 = vmatprep.subr.bf16.mxu0 %v5449_v20  ;;  %4437 = vmatprep.subr.bf16.mxu1 %v5452_v33 }
 0xe76   : > { %4387 = vmatpush2.bf16.msra.mxu0 %v5447_v9  ;;  %4438 = vmatpush2.bf16.msra.mxu1 %v5450_v35  ;;  %v5471_v9 = vld [vmem:[%s7400_s11 + $0x270] ss:$8 sps:$4 sm:$0xff]  }
 0xe77   : > { %4388 = vmatprep.subr.bf16.mxu0 %v5455_v40  ;;  %4439 = vmatprep.subr.bf16.mxu1 %v5458_v37  ;;  %v5474_v35 = vld [vmem:[%s7400_s11 + $0x370] ss:$8 sps:$4 sm:$0xff]  }
 0xe7a   : > { %4389 = vmatpush2.bf16.msra.mxu0 %v5453_v10  ;;  %4440 = vmatpush2.bf16.msra.mxu1 %v5456_v11 }
 0xe7b   : > { %4390 = vmatprep.subr.bf16.mxu0 %v5461_v39  ;;  %4441 = vmatprep.subr.bf16.mxu1 %v5464_v42 }
 0xe7e   : > { %4391 = vmatpush2.bf16.msra.mxu0 %v5459_v48  ;;  %4442 = vmatpush2.bf16.msra.mxu1 %v5462_v7  ;;  %v5479_v48 = vld [vmem:[%s7400_s11 + $0x264] ss:$8 sps:$4 sm:$0xff]  }
 0xe7f   : > { %4392 = vmatprep.subr.bf16.mxu0 %v5467_v60  ;;  %4443 = vmatprep.subr.bf16.mxu1 %v5470_v56  ;;  %v5482_v7 = vld [vmem:[%s7400_s11 + $0x364] ss:$8 sps:$4 sm:$0xff]  }
 0xe82   : > { %4393 = vmatpush2.bf16.msra.mxu0 %v5465_v0  ;;  %4444 = vmatpush2.bf16.msra.mxu1 %v5468_v59 }
 0xe83   : > { %4464 = vmatprep.subr.bf16.mxu0 %v5473_v14  ;;  %4515 = vmatprep.subr.bf16.mxu1 %v5476_v53 }
 0xec4   : > { %v3384_v29 = vpop.f32.mrf.mxu0  ;;  %v3435_v41 = vpop.f32.mrf.mxu1 }
 0xec5   : > { %v3385_v38 = vadd.f32 %v3384_v29, %v2673_v4  ;;  %v3436_v24 = vadd.f32 %v3435_v41, %v2681_v36  ;;  %v5477_v29 = vld [vmem:[%s7400_s11 + $0x260] ss:$8 sps:$4 sm:$0xff]  }
 0xec6   : > { %v3386_v17 = vpop.f32.mrf.mxu0  ;;  %v3437_v5 = vpop.f32.mrf.mxu1  ;;  %v5480_v41 = vld [vmem:[%s7400_s11 + $0x360] ss:$8 sps:$4 sm:$0xff]  }
 0xec7   : > { %v3387_v18 = vadd.f32 %v3386_v17, %v2677_v57  ;;  %v3438_v21 = vadd.f32 %v3437_v5, %v2685_v43  ;;  %v3554_v15 = vmax.f32 %v3385_v38, 0.0  ;;  %v3556_v25 = vmax.f32 %v3436_v24, 0.0  ;;  %v5483_v17 = vld [vmem:[%s7400_s11 + $0x250] ss:$8 sps:$4 sm:$0xff]   ;;  %v5497_v38 = vld [vmem:[%s7400_s11 + $0x234] ss:$8 sps:$4 sm:$0xff]  }
 0xec8   : > { %v3388_v6 = vpop.f32.mrf.mxu0  ;;  %v3439_v49 = vpop.f32.mrf.mxu1  ;;  %v5486_v5 = vld [vmem:[%s7400_s11 + $0x350] ss:$8 sps:$4 sm:$0xff]   ;;  %v5500_v24 = vld [vmem:[%s7400_s11 + $0x334] ss:$8 sps:$4 sm:$0xff]  }
 0xec9   : > { %v3389_v22 = vadd.f32 %v3388_v6, %v2673_v4  ;;  %v3440_v23 = vadd.f32 %v3439_v49, %v2681_v36  ;;  %v3555_v13 = vmax.f32 %v3387_v18, 0.0  ;;  %v3557_v61 = vmax.f32 %v3438_v21, 0.0  ;;  %v5491_v18 = vld [vmem:[%s7400_s11 + $0x244] ss:$8 sps:$4 sm:$0xff]  }
 0xeca   : > { %v3390_v54 = vpop.f32.mrf.mxu0  ;;  %v3441_v12 = vpop.f32.mrf.mxu1  ;;  %v5494_v21 = vld [vmem:[%s7400_s11 + $0x344] ss:$8 sps:$4 sm:$0xff]  }
 0xecb   : > { %v3391_v55 = vadd.f32 %v3390_v54, %v2677_v57  ;;  %v3442_v34 = vadd.f32 %v3441_v12, %v2685_v43  ;;  %v3562_v1 = vmax.f32 %v3389_v22, 0.0  ;;  %v3564_v26 = vmax.f32 %v3440_v23, 0.0  ;;  %v5489_v22 = vld [vmem:[%s7400_s11 + $0x240] ss:$8 sps:$4 sm:$0xff]   ;;  %v5495_v54 = vld [vmem:[%s7400_s11 + $0x230] ss:$8 sps:$4 sm:$0xff]  }
 0xecc   : > { %v3394_v52 = vpop.f32.mrf.mxu0  ;;  %v3445_v8 = vpop.f32.mrf.mxu1  ;;  %v5492_v23 = vld [vmem:[%s7400_s11 + $0x340] ss:$8 sps:$4 sm:$0xff]   ;;  %v5498_v12 = vld [vmem:[%s7400_s11 + $0x330] ss:$8 sps:$4 sm:$0xff]  }
 0xecd   : > { %v3563_v16 = vmax.f32 %v3391_v55, 0.0  ;;  %v3565_v19 = vmax.f32 %v3442_v34, 0.0  ;;  %v3578_v40 = vpack.c.bf16 %v3562_v1, %v3554_v15  ;;  %v3580_v37 = vpack.c.bf16 %v3564_v26, %v3556_v25  ;;  %v5503_v55 = vld [vmem:[%s7400_s11 + $0x224] ss:$8 sps:$4 sm:$0xff]   ;;  %v5501_v1 = vld [vmem:[%s7400_s11 + $0x220] ss:$8 sps:$4 sm:$0xff]  }
 0xece   : > { %v3396_v44 = vpop.f32.mrf.mxu0  ;;  %v3447_v28 = vpop.f32.mrf.mxu1  ;;  %v3395_v10 = vadd.f32 %v3394_v52, %v2673_v4  ;;  %v3446_v11 = vadd.f32 %v3445_v8, %v2681_v36  ;;  %v5485_v4 = vld [vmem:[%s7400_s11 + $0x254] ss:$8 sps:$4 sm:$0xff]   ;;  %v5506_v34 = vld [vmem:[%s7400_s11 + $0x324] ss:$8 sps:$4 sm:$0xff]   ;;  %v5504_v26 = vld [vmem:[%s7400_s11 + $0x320] ss:$8 sps:$4 sm:$0xff]  }
 0xecf   : > { %v3579_v31 = vpack.c.bf16 %v3563_v16, %v3555_v13  ;;  %v3581_v32 = vpack.c.bf16 %v3565_v19, %v3557_v61  ;;  %v3397_v20 = vadd.f32 %v3396_v44, %v2677_v57  ;;  %v3448_v33 = vadd.f32 %v3447_v28, %v2685_v43  ;;  %v5488_v36 = vld [vmem:[%s7400_s11 + $0x354] ss:$8 sps:$4 sm:$0xff]   ;;  %v5507_v13 = vld [vmem:[%s7400_s11 + $0x210] ss:$8 sps:$4 sm:$0xff]   ;;  %v5515_v16 = vld [vmem:[%s7400_s11 + $0x204] ss:$8 sps:$4 sm:$0xff]  }
 0xed0   : > { %v3398_v39 = vpop.f32.mrf.mxu0  ;;  %v3449_v42 = vpop.f32.mrf.mxu1  ;;  %v3570_v57 = vmax.f32 %v3395_v10, 0.0  ;;  %v3572_v43 = vmax.f32 %v3446_v11, 0.0  ;;  %v5509_v52 = vld [vmem:[%s7400_s11 + $0x214] ss:$8 sps:$4 sm:$0xff]   ;;  %v5510_v61 = vld [vmem:[%s7400_s11 + $0x310] ss:$8 sps:$4 sm:$0xff]  }
 0xed1   : > { %v3571_v60 = vmax.f32 %v3397_v20, 0.0  ;;  %v3573_v56 = vmax.f32 %v3448_v33, 0.0  ;;  %4394 = vmatprep.mubr.bf16.mxu0 %v3579_v31  ;;  %4445 = vmatprep.mubr.bf16.mxu1 %v3581_v32  ;;  %v5512_v8 = vld [vmem:[%s7400_s11 + $0x314] ss:$8 sps:$4 sm:$0xff]   ;;  %v5518_v19 = vld [vmem:[%s7400_s11 + $0x304] ss:$8 sps:$4 sm:$0xff]  }
 0xed2   : > { %v3399_v0 = vpop.f32.mrf.mxu0  ;;  %v3450_v59 = vpop.f32.mrf.mxu1  ;;  %4395 = vmatmul.mubr.bf16.vlgmr.msra.gmra.mxu0 %v3578_v40  ;;  %4446 = vmatmul.mubr.bf16.vlgmr.msra.gmra.mxu1 %v3580_v37  ;;  %v3586_v6 = vpack.c.bf16 %v3570_v57, %v3570_v57  ;;  %v3588_v49 = vpack.c.bf16 %v3572_v43, %v3572_v43  ;;  %v5513_v15 = vld [vmem:[%s7400_s11 + $0x200] ss:$8 sps:$4 sm:$0xff]   ;;  %v5521_v44 = vld [vmem:[%s7400_s11 + $0x2f4] ss:$8 sps:$4 sm:$0xff]   ;;  %v5519_v31 = vld [vmem:[%s7400_s11 + $0x2f0] ss:$8 sps:$4 sm:$0xff]  }
 0xed3   : > { %v3587_v14 = vpack.c.bf16 %v3571_v60, %v3571_v60  ;;  %v3589_v53 = vpack.c.bf16 %v3573_v56, %v3573_v56  ;;  %4465 = vmatpush1.bf16.msra.mxu0 %v5471_v9  ;;  %4516 = vmatpush1.bf16.msra.mxu1 %v5474_v35  ;;  %v5516_v25 = vld [vmem:[%s7400_s11 + $0x300] ss:$8 sps:$4 sm:$0xff]   ;;  %v5524_v28 = vld [vmem:[%s7400_s11 + $0x3f4] ss:$8 sps:$4 sm:$0xff]   ;;  %v5522_v32 = vld [vmem:[%s7400_s11 + $0x3f0] ss:$8 sps:$4 sm:$0xff]  }
 0xed4   : > { %4466 = vmatprep.subr.bf16.mxu0 %v5479_v48  ;;  %4517 = vmatprep.subr.bf16.mxu1 %v5482_v7  ;;  %v5527_v20 = vld [vmem:[%s7400_s11 + $0x2e4] ss:$8 sps:$4 sm:$0xff]   ;;  %v5525_v9 = vld [vmem:[%s7400_s11 + $0x2e0] ss:$8 sps:$4 sm:$0xff]   ;;  %v5533_v40 = vld [vmem:[%s7400_s11 + $0x2d4] ss:$8 sps:$4 sm:$0xff]  }
 0xed5   : > { %4404 = vmatprep.mubr.bf16.mxu0 %v3587_v14  ;;  %4455 = vmatprep.mubr.bf16.mxu1 %v3589_v53  ;;  %v5530_v33 = vld [vmem:[%s7400_s11 + $0x3e4] ss:$8 sps:$4 sm:$0xff]   ;;  %v5528_v35 = vld [vmem:[%s7400_s11 + $0x3e0] ss:$8 sps:$4 sm:$0xff]   ;;  %v5536_v37 = vld [vmem:[%s7400_s11 + $0x3d4] ss:$8 sps:$4 sm:$0xff]  }
 0xed6   : > { %v5531_v10 = vld [vmem:[%s7400_s11 + $0x2d0] ss:$8 sps:$4 sm:$0xff]   ;;  %v5539_v39 = vld [vmem:[%s7400_s11 + $0x2c4] ss:$8 sps:$4 sm:$0xff]   ;;  %v5537_v48 = vld [vmem:[%s7400_s11 + $0x2c0] ss:$8 sps:$4 sm:$0xff]  }
 0xed7   : > { %4467 = vmatpush1.bf16.msra.mxu0 %v5477_v29  ;;  %4518 = vmatpush1.bf16.msra.mxu1 %v5480_v41  ;;  %v5534_v11 = vld [vmem:[%s7400_s11 + $0x3d0] ss:$8 sps:$4 sm:$0xff]   ;;  %v5542_v42 = vld [vmem:[%s7400_s11 + $0x3c4] ss:$8 sps:$4 sm:$0xff]   ;;  %v5540_v7 = vld [vmem:[%s7400_s11 + $0x3c0] ss:$8 sps:$4 sm:$0xff]  }
 0xed8   : > { %4468 = vmatprep.subr.bf16.mxu0 %v5485_v4  ;;  %4519 = vmatprep.subr.bf16.mxu1 %v5488_v36  ;;  %v5545_v60 = vld [vmem:[%s7400_s11 + $0x2b4] ss:$8 sps:$4 sm:$0xff]   ;;  %v5543_v0 = vld [vmem:[%s7400_s11 + $0x2b0] ss:$8 sps:$4 sm:$0xff]   ;;  %v5551_v14 = vld [vmem:[%s7400_s11 + $0x2a4] ss:$8 sps:$4 sm:$0xff]  }
 0xed9   : > { %v5548_v56 = vld [vmem:[%s7400_s11 + $0x3b4] ss:$8 sps:$4 sm:$0xff]   ;;  %v5546_v59 = vld [vmem:[%s7400_s11 + $0x3b0] ss:$8 sps:$4 sm:$0xff]   ;;  %v5554_v53 = vld [vmem:[%s7400_s11 + $0x3a4] ss:$8 sps:$4 sm:$0xff]  }
 0xeda   : > { %4405 = vmatmul.mubr.bf16.gmra.mxu0 %v3586_v6  ;;  %4456 = vmatmul.mubr.bf16.gmra.mxu1 %v3588_v49  ;;  %v2700_v29 = vsub.s32 7, %v5984_v45  ;;  %v2696_v41 = vsub.s32 6, %v5984_v45  ;;  %v5549_v57 = vld [vmem:[%s7400_s11 + $0x2a0] ss:$8 sps:$4 sm:$0xff]   ;;  %v5560_v6 = vld [vmem:[%s7400_s11 + $0x394] ss:$8 sps:$4 sm:$0xff]  }
 0xedb   : > { %4469 = vmatpush1.bf16.msra.mxu0 %v5483_v17  ;;  %4520 = vmatpush1.bf16.msra.mxu1 %v5486_v5  ;;  %v5552_v43 = vld [vmem:[%s7400_s11 + $0x3a0] ss:$8 sps:$4 sm:$0xff]   ;;  %v2693_v17 = vrot.slane %v7154_v62, %v662_v27  ;;  %v5557_v5 = vld [vmem:[%s7400_s11 + $0x294] ss:$8 sps:$4 sm:$0xff]   ;;  %v5563_v45 = vld [vmem:[%s7400_s11 + $0x284] ss:$8 sps:$4 sm:$0xff]  }
 0xedc   : > { %4470 = vmatprep.subr.bf16.mxu0 %v5491_v18  ;;  %4521 = vmatprep.subr.bf16.mxu1 %v5494_v21  ;;  %v2701_v49 = vrot.slane %v7154_v62, %v2700_v29  ;;  %v2689_v18 = vrot.slane %v7154_v62, %v658_v30  ;;  %v2697_v21 = vrot.slane %v7154_v62, %v2696_v41  ;;  %v5566_v30 = vld [vmem:[%s7400_s11 + $0x384] ss:$8 sps:$4 sm:$0xff]  }
 0xedf   : > { %4471 = vmatpush1.bf16.msra.mxu0 %v5489_v22  ;;  %4522 = vmatpush1.bf16.msra.mxu1 %v5492_v23  ;;  %v5555_v23 = vld [vmem:[%s7400_s11 + $0x290] ss:$8 sps:$4 sm:$0xff]  }
 0xee0   : > { %4472 = vmatprep.subr.bf16.mxu0 %v5497_v38  ;;  %4523 = vmatprep.subr.bf16.mxu1 %v5500_v24  ;;  %v5558_v38 = vld [vmem:[%s7400_s11 + $0x390] ss:$8 sps:$4 sm:$0xff]  }
 0xee3   : > { %4473 = vmatpush1.bf16.msra.mxu0 %v5495_v54  ;;  %4524 = vmatpush1.bf16.msra.mxu1 %v5498_v12 }
 0xee4   : > { %4474 = vmatprep.subr.bf16.mxu0 %v5503_v55  ;;  %4525 = vmatprep.subr.bf16.mxu1 %v5506_v34 }
 0xee7   : > { %4475 = vmatpush1.bf16.msra.mxu0 %v5501_v1  ;;  %4526 = vmatpush1.bf16.msra.mxu1 %v5504_v26 }
 0xee8   : > { %4476 = vmatprep.subr.bf16.mxu0 %v5509_v52  ;;  %4527 = vmatprep.subr.bf16.mxu1 %v5512_v8 }
 0xeeb   : > { %4477 = vmatpush1.bf16.msra.mxu0 %v5507_v13  ;;  %4528 = vmatpush1.bf16.msra.mxu1 %v5510_v61 }
 0xeec   : > { %4478 = vmatprep.subr.bf16.mxu0 %v5515_v16  ;;  %4529 = vmatprep.subr.bf16.mxu1 %v5518_v19  ;;  %v5561_v16 = vld [vmem:[%s7400_s11 + $0x280] ss:$8 sps:$4 sm:$0xff]  }
 0xeef   : > { %4479 = vmatpush1.bf16.msra.mxu0 %v5513_v15  ;;  %4530 = vmatpush1.bf16.msra.mxu1 %v5516_v25 }
 0xef0   : > { %4480 = vmatprep.subr.bf16.mxu0 %v5521_v44  ;;  %4531 = vmatprep.subr.bf16.mxu1 %v5524_v28  ;;  %v5564_v28 = vld [vmem:[%s7400_s11 + $0x380] ss:$8 sps:$4 sm:$0xff]  }
 0xef3   : > { %4481 = vmatpush2.bf16.msra.mxu0 %v5519_v31  ;;  %4532 = vmatpush2.bf16.msra.mxu1 %v5522_v32 }
 0xef4   : > { %4482 = vmatprep.subr.bf16.mxu0 %v5527_v20  ;;  %4533 = vmatprep.subr.bf16.mxu1 %v5530_v33 }
 0xef7   : > { %4483 = vmatpush2.bf16.msra.mxu0 %v5525_v9  ;;  %4534 = vmatpush2.bf16.msra.mxu1 %v5528_v35 }
 0xef8   : > { %4484 = vmatprep.subr.bf16.mxu0 %v5533_v40  ;;  %4535 = vmatprep.subr.bf16.mxu1 %v5536_v37 }
 0xefb   : > { %4485 = vmatpush2.bf16.msra.mxu0 %v5531_v10  ;;  %4536 = vmatpush2.bf16.msra.mxu1 %v5534_v11 }
 0xefc   : > { %4486 = vmatprep.subr.bf16.mxu0 %v5539_v39  ;;  %4537 = vmatprep.subr.bf16.mxu1 %v5542_v42 }
 0xeff   : > { %4487 = vmatpush2.bf16.msra.mxu0 %v5537_v48  ;;  %4538 = vmatpush2.bf16.msra.mxu1 %v5540_v7 }
 0xf00   : > { %4488 = vmatprep.subr.bf16.mxu0 %v5545_v60  ;;  %4539 = vmatprep.subr.bf16.mxu1 %v5548_v56 }
 0xf03   : > { %4489 = vmatpush2.bf16.msra.mxu0 %v5543_v0  ;;  %4540 = vmatpush2.bf16.msra.mxu1 %v5546_v59 }
 0xf04   : > { %v3486_v4 = vpop.f32.mrf.mxu0  ;;  %v3537_v36 = vpop.f32.mrf.mxu1  ;;  %4490 = vmatprep.subr.bf16.mxu0 %v5551_v14  ;;  %4541 = vmatprep.subr.bf16.mxu1 %v5554_v53 }
 0xf05   : > { %v3487_v1 = vadd.f32 %v3486_v4, %v2689_v18  ;;  %v3538_v26 = vadd.f32 %v3537_v36, %v2697_v21 }
 0xf06   : > { %v3488_v22 = vpop.f32.mrf.mxu0  ;;  %v3539_v27 = vpop.f32.mrf.mxu1 }
 0xf07   : > { %4491 = vmatpush2.bf16.msra.mxu0 %v5549_v57  ;;  %4542 = vmatpush2.bf16.msra.mxu1 %v5552_v43  ;;  %v3489_v24 = vadd.f32 %v3488_v22, %v2693_v17  ;;  %v3540_v62 = vadd.f32 %v3539_v27, %v2701_v49  ;;  %v3558_v9 = vmax.f32 %v3487_v1, 0.0  ;;  %v3560_v35 = vmax.f32 %v3538_v26, 0.0 }
 0xf08   : > { %v3490_v54 = vpop.f32.mrf.mxu0  ;;  %v3541_v12 = vpop.f32.mrf.mxu1  ;;  %4492 = vmatprep.subr.bf16.mxu0 %v5557_v5  ;;  %4543 = vmatprep.subr.bf16.mxu1 %v5560_v6 }
 0xf09   : > { %v3491_v55 = vadd.f32 %v3490_v54, %v2689_v18  ;;  %v3542_v34 = vadd.f32 %v3541_v12, %v2697_v21  ;;  %v3559_v19 = vmax.f32 %v3489_v24, 0.0  ;;  %v3561_v31 = vmax.f32 %v3540_v62, 0.0 }
 0xf0a   : > { %v3492_v52 = vpop.f32.mrf.mxu0  ;;  %v3543_v8 = vpop.f32.mrf.mxu1 }
 0xf0b   : > { %v3493_v13 = vadd.f32 %v3492_v52, %v2693_v17  ;;  %v3544_v61 = vadd.f32 %v3543_v8, %v2701_v49  ;;  %4493 = vmatpush2.bf16.msra.mxu0 %v5555_v23  ;;  %4544 = vmatpush2.bf16.msra.mxu1 %v5558_v38  ;;  %v3566_v15 = vmax.f32 %v3491_v55, 0.0  ;;  %v3568_v32 = vmax.f32 %v3542_v34, 0.0  ;;  %v4572_v52 = vld [vmem:[%s7401_s12] sm:$0x3] }
 0xf0c   : > { %v3496_v25 = vpop.f32.mrf.mxu0  ;;  %v3547_v44 = vpop.f32.mrf.mxu1  ;;  %4494 = vmatprep.subr.bf16.mxu0 %v5563_v45  ;;  %4545 = vmatprep.subr.bf16.mxu1 %v5566_v30 }
 0xf0d   : > { %v3567_v20 = vmax.f32 %v3493_v13, 0.0  ;;  %v3569_v33 = vmax.f32 %v3544_v61, 0.0  ;;  %v3582_v48 = vpack.c.bf16 %v3566_v15, %v3558_v9  ;;  %v3497_v7 = vadd.f32 %v3496_v25, %v2689_v18 }
 0xf0e   : > { %v3498_v40 = vpop.f32.mrf.mxu0  ;;  %v3549_v37 = vpop.f32.mrf.mxu1  ;;  %v3584_v0 = vpack.c.bf16 %v3568_v32, %v3560_v35  ;;  %v3548_v59 = vadd.f32 %v3547_v44, %v2697_v21  ;;  %v4577_v25 = vrot.slane %v4572_v52, %v5990_v47 }
 0xf0f   : > { %v3583_v10 = vpack.c.bf16 %v3567_v20, %v3559_v19  ;;  %v3585_v11 = vpack.c.bf16 %v3569_v33, %v3561_v31  ;;  %v3499_v39 = vadd.f32 %v3498_v40, %v2693_v17  ;;  %v3550_v42 = vadd.f32 %v3549_v37, %v2701_v49  ;;  %4495 = vmatpush2.bf16.msra.mxu0 %v5561_v16 }
 0xf10   : > { %4546 = vmatpush2.bf16.msra.mxu1 %v5564_v28  ;;  %v3500_v60 = vpop.f32.mrf.mxu0  ;;  %v3551_v56 = vpop.f32.mrf.mxu1  ;;  %v3574_v4 = vmax.f32 %v3497_v7, 0.0  ;;  %v3576_v36 = vmax.f32 %v3548_v59, 0.0  ;;  %v4581_v31 = vrot.slane %v4572_v52, %v5987_v46 }
 0xf11   : > { %v3575_v14 = vmax.f32 %v3499_v39, 0.0  ;;  %v3577_v53 = vmax.f32 %v3550_v42, 0.0  ;;  %4496 = vmatprep.mubr.bf16.mxu0 %v3583_v10  ;;  %4547 = vmatprep.mubr.bf16.mxu1 %v3585_v11 }
 0xf12   : > { %v3501_v29 = vpop.f32.mrf.mxu0  ;;  %v3552_v41 = vpop.f32.mrf.mxu1  ;;  %4497 = vmatmul.mubr.bf16.vlgmr.msra.gmra.mxu0 %v3582_v48  ;;  %v3590_v17 = vpack.c.bf16 %v3574_v4, %v3574_v4  ;;  %v3592_v5 = vpack.c.bf16 %v3576_v36, %v3576_v36 }
 0xf13   : > { %v3591_v57 = vpack.c.bf16 %v3575_v14, %v3575_v14  ;;  %v3593_v43 = vpack.c.bf16 %v3577_v53, %v3577_v53  ;;  %4548 = vmatmul.mubr.bf16.vlgmr.msra.gmra.mxu1 %v3584_v0 }
 0xf15   : > { %4506 = vmatprep.mubr.bf16.mxu0 %v3591_v57  ;;  %4557 = vmatprep.mubr.bf16.mxu1 %v3593_v43 }
 0xf1a   : > { %4507 = vmatmul.mubr.bf16.gmra.mxu0 %v3590_v17 }
 0xf1b   : > { %4558 = vmatmul.mubr.bf16.gmra.mxu1 %v3592_v5 }
 0xf92   : > { %v4396_v6 = vpop.f32.mrf.mxu0  ;;  %v4447_v49 = vpop.f32.mrf.mxu1 }
 0xf93   : > { %v4448_v1 = vadd.f32 %v4447_v49, %v4396_v6 }
 0xf94   : > { %v4398_v18 = vpop.f32.mrf.mxu0  ;;  %v4449_v21 = vpop.f32.mrf.mxu1 }
 0xf95   : > { %v4450_v8 = vadd.f32 %v4449_v21, %v4398_v18 }
 0xf96   : > { %v4400_v22 = vpop.f32.mrf.mxu0  ;;  %v4451_v27 = vpop.f32.mrf.mxu1 }
 0xf97   : > { %v4452_v19 = vadd.f32 %v4451_v27, %v4400_v22 }
 0xf98   : > { %v4402_v23 = vpop.f32.mrf.mxu0  ;;  %v4453_v38 = vpop.f32.mrf.mxu1 }
 0xf99   : > { %v4454_v20 = vadd.f32 %v4453_v38, %v4402_v23 }
 0xf9a   : > { %v4406_v24 = vpop.f32.mrf.mxu0  ;;  %v4457_v54 = vpop.f32.mrf.mxu1 }
 0xf9b   : > { %v4458_v37 = vadd.f32 %v4457_v54, %v4406_v24 }
 0xf9c   : > { %v4408_v12 = vpop.f32.mrf.mxu0  ;;  %v4459_v45 = vpop.f32.mrf.mxu1 }
 0xf9e   : > { %v4410_v30 = vpop.f32.mrf.mxu0  ;;  %v4461_v62 = vpop.f32.mrf.mxu1 }
 0xfa0   : > { %v4411_v55 = vpop.f32.mrf.mxu0  ;;  %v4462_v34 = vpop.f32.mrf.mxu1 }
 0xfd2   : > { %v4498_v26 = vpop.f32.mrf.mxu0 }
 0xfd3   : > { %v4499_v13 = vadd.f32 %v4498_v26, %v4448_v1  ;;  %v4549_v61 = vpop.f32.mrf.mxu1 }
 0xfd4   : > { %v4500_v16 = vpop.f32.mrf.mxu0 }
 0xfd5   : > { %v4550_v15 = vadd.f32 %v4549_v61, %v4499_v13  ;;  %v4501_v44 = vadd.f32 %v4500_v16, %v4450_v8  ;;  %v4551_v28 = vpop.f32.mrf.mxu1 }
 0xfd6   : > { %v4502_v32 = vpop.f32.mrf.mxu0 }
 0xfd7   : > { %v4566_v33 = vadd.f32 %v4550_v15, %v6466_v50  ;;  %v4552_v9 = vadd.f32 %v4551_v28, %v4501_v44  ;;  %v4503_v35 = vadd.f32 %v4502_v32, %v4452_v19  ;;  %v4553_v40 = vpop.f32.mrf.mxu1  ;;  %v4460_v50 = vadd.f32 %v4459_v45, %v4408_v12 }
 0xfd8   : > { %v4504_v47 = vpop.f32.mrf.mxu0 }
 0xfd9   : > { %v4584_v10 = vadd.f32 %v4577_v25, %v4566_v33  ;;  %v4567_v46 = vadd.f32 %v4552_v9, %v6469_v63  ;;  %v4554_v11 = vadd.f32 %v4553_v40, %v4503_v35  ;;  %v4505_v39 = vadd.f32 %v4504_v47, %v4454_v20  ;;  %v4555_v42 = vpop.f32.mrf.mxu1 }
 0xfda   : > { %v4508_v48 = vpop.f32.mrf.mxu0 }
 0xfdb   : > { %4590 = vst [vmem:[%s7373_s23] sm:$0xff] %v4584_v10  ;;  %v4585_v7 = vadd.f32 %v4581_v31, %v4567_v46  ;;  %v4568_v60 = vadd.f32 %v4554_v11, %v6474_v58  ;;  %v4556_v56 = vadd.f32 %v4555_v42, %v4505_v39  ;;  %v4509_v0 = vadd.f32 %v4508_v48, %v4458_v37  ;;  %v4559_v59 = vpop.f32.mrf.mxu1 }
 0xfdc   : > { %v4510_v14 = vpop.f32.mrf.mxu0 }
 0xfdd   : > { %4591 = vst [vmem:[%s7373_s23 + $0x8] sm:$0xff] %v4585_v7  ;;  %v4586_v53 = vadd.f32 %v4577_v25, %v4568_v60  ;;  %v4569_v63 = vadd.f32 %v4556_v56, %v6477_v51  ;;  %v4560_v29 = vadd.f32 %v4559_v59, %v4509_v0  ;;  %v4511_v41 = vadd.f32 %v4510_v14, %v4460_v50  ;;  %v4561_v57 = vpop.f32.mrf.mxu1 }
 0xfde   : > { %v4512_v43 = vpop.f32.mrf.mxu0 }
 0xfdf   : > { %4592 = vst [vmem:[%s7373_s23 + $0x10] sm:$0xff] %v4586_v53  ;;  %v4587_v4 = vadd.f32 %v4581_v31, %v4569_v63  ;;  %v4570_v36 = vadd.f32 %v4560_v29, %v6480_v2  ;;  %v4562_v58 = vadd.f32 %v4561_v57, %v4511_v41  ;;  %v4563_v17 = vpop.f32.mrf.mxu1 }
 0xfe0   : > { %v4513_v5 = vpop.f32.mrf.mxu0 }
 0xfe1   : > { %4593 = vst [vmem:[%s7373_s23 + $0x18] sm:$0xff] %v4587_v4  ;;  %v4588_v6 = vadd.f32 %v4577_v25, %v4570_v36  ;;  %v4571_v49 = vadd.f32 %v4562_v58, %v6485_v3  ;;  %v4564_v18 = vpop.f32.mrf.mxu1 }
 0xfe3   : > { %4594 = vst [vmem:[%s7373_s23 + $0x20] sm:$0x1] %v4588_v6  ;;  %v4589_v21 = vadd.f32 %v4581_v31, %v4571_v49 }
 0xfe5   : > { %4595 = vst [vmem:[%s7373_s23 + $0x28] sm:$0x1] %v4589_v21 }
 0xfe6 PF: > { %s23_s25 = sadd.s32 1, %s5639_s25  }
 0xfe7   : > { %p20_p4 = scmp.ge.s32.totalorder %s23_s25, 4  }
 0xfe9   :  { %22 = sbr.rel (!%p20_p4) target bundleno = 1 (0x1), region = 102 }

</bundles_post_ra>
